<compile_context>
chip_gen: v7x
topology: tpu7x:2x2x1
jax: 0.10.0
libtpu: 0.0.40
codegen_flags: <defaults>
</compile_context>

<pallas_src>
import functools

import jax
import jax.numpy as jnp
from jax import lax
from jax.experimental import pallas as pl
from jax.experimental.pallas import tpu as pltpu


# ----------------------------- activations ---------------------------------

_ACTIVATIONS = {
    "relu": jax.nn.relu,
    "swish": jax.nn.silu,
    "silu": jax.nn.silu,
    # PyTorch nn.GELU() is exact erf, not the tanh approximation.
    "gelu": functools.partial(jax.nn.gelu, approximate=False),
    "mish": lambda x: x * jnp.tanh(jax.nn.softplus(x)),
}

_LEAD = 8   # leading zero rows of every flat scratch (index LEAD-1 is the virtual left
            # pad of the first padded row; 8 keeps every data store sublane aligned)
_TAIL = 8   # trailing slack rows (only ever read for never-used pad-column outputs)


def _round_up(x, m):
    return (x + m - 1) // m * m


# ------------------------------- kernel --------------------------------------

def _conv3x3_flat(f_ref, w_ref, b_ref, rows_in, rows_out, wp):
    """3x3 conv over a flat, trailing-column-padded patch held in VMEM.

    f_ref : (_LEAD + rows_in*wp + _TAIL, C) flat patch.  Padded row r, column c lives
            at flat index _LEAD + r*wp + c; columns [W, wp) of every row are zero, so
            the left/right conv padding comes "for free" from the neighbouring row.
    w_ref : (3, 3*C, Cout) weights, contraction rows ordered [kw, ci].
    b_ref : (1, Cout) f32 bias.
    Returns (rows_out*wp, Cout) f32 pre-activation.  Entries at pad columns are
    garbage; the caller masks them before they can ever be read again.
    """
    n_in = rows_in * wp
    n_out = rows_out * wp
    cout = w_ref.shape[-1]

    # kw taps are plain sublane-shifted slices of the single flat buffer (no per-tap
    # reshape/copy); one lane-concat widens the MXU contraction to K = 3*C.
    taps = [f_ref[pl.ds(_LEAD + kw - 1, n_in), :] for kw in range(3)]
    qcat = jnp.concatenate(taps, axis=-1)                           # (n_in, 3C)

    # bias-initialized accumulator (saves a zero fill + a full-tile add per conv)
    acc = jnp.broadcast_to(b_ref[...], (n_out, cout)).astype(jnp.float32)
    for kh in range(3):
        lhs = qcat[kh * wp:kh * wp + n_out, :]                      # aligned value slice
        acc = acc + jnp.dot(lhs, w_ref[kh],
                            preferred_element_type=jnp.float32)
    return acc


def _tiny_block_kernel(x_ref, halo_ref, w1_ref, b1_ref, w2_ref, b2_ref,
                       w3_ref, b3_ref, *rest,
                       tile_h, width, wp, act, has_skip):
    """Fused tiny-VAE residual block for one (batch, row-tile) grid step.

    x_ref    : (1, Cin, TH*W)      current spatial tile (flattened H*W, NCHW)
    halo_ref : (1, 1, Cin, 6*W)    3 rows above + 3 rows below (zeros at image edges)
    w*_ref   : (3, 3*C, Cout)      weights,  b*_ref: (1, Cout) f32 biases
    [sw_ref] : (Cin, Cout)         1x1 skip weights (only when Cin != Cout)
    o_ref    : (1, Cout, TH*W)     channel-major, lane-dense output block
    scratch  : flat padded activations xflat / h1flat / h2flat (see _conv3x3_flat)
    """
    if has_skip:
        sw_ref, o_ref, xflat, h1flat, h2flat = rest
    else:
        sw_ref = None
        o_ref, xflat, h1flat, h2flat = rest

    tile = pl.program_id(1)
    last_tile = pl.num_programs(1) - 1
    cin = x_ref.shape[1]
    cout = o_ref.shape[1]
    th, w = tile_h, width
    cdt = xflat.dtype

    def pad_cols(a):                 # (r, W, C) -> (r, wp, C), trailing zero columns
        r = a.shape[0]
        return jnp.concatenate(
            [a, jnp.zeros((r, wp - w, a.shape[-1]), a.dtype)], axis=1)

    # -- border-only zeroing: just the tiny slack strips (everything else that is read
    #    this step is also written this step) --
    for ref, c in ((xflat, cin), (h1flat, cout), (h2flat, cout)):
        ref[pl.ds(0, _LEAD), :] = jnp.zeros((_LEAD, c), cdt)
        n = ref.shape[0]
        ref[pl.ds(n - _TAIL, _TAIL), :] = jnp.zeros((_TAIL, c), cdt)

    # -- input tile + 3-row halos -> flat padded layout (all stores sublane aligned) --
    xt = x_ref[0].T                                                  # (TH*W, Cin)
    xtp = pad_cols(xt.reshape(th, w, cin)).reshape(th * wp, cin)     # (TH*wp, Cin)
    xflat[pl.ds(_LEAD + 3 * wp, th * wp), :] = xtp.astype(cdt)

    halo = pad_cols(halo_ref[0, 0].T.reshape(6, w, cin))             # edge zeros baked in
    xflat[pl.ds(_LEAD, 3 * wp), :] = halo[:3].reshape(3 * wp, cin).astype(cdt)
    xflat[pl.ds(_LEAD + (3 + th) * wp, 3 * wp), :] = (
        halo[3:].reshape(3 * wp, cin).astype(cdt))

    # column mask: True at real image columns, False at the wp-W trailing pad columns
    colmask = (lax.broadcasted_iota(jnp.int32, ((th + 4) * wp, 1), 0) % wp) < w

    # ---- conv1 -> act : image rows [tile*TH-2, tile*TH+TH+2) ----
    y1 = act(_conv3x3_flat(xflat, w1_ref, b1_ref, th + 6, th + 4, wp))
    h1flat[pl.ds(_LEAD, (th + 4) * wp), :] = jnp.where(colmask, y1, 0.0).astype(cdt)

    # rows that fall outside the image act as conv2's zero padding
    @pl.when(tile == 0)
    def _():
        h1flat[pl.ds(_LEAD, 2 * wp), :] = jnp.zeros((2 * wp, cout), cdt)

    @pl.when(tile == last_tile)
    def _():
        h1flat[pl.ds(_LEAD + (th + 2) * wp, 2 * wp), :] = jnp.zeros((2 * wp, cout), cdt)

    # ---- conv2 -> act : image rows [tile*TH-1, tile*TH+TH+1) ----
    y2 = act(_conv3x3_flat(h1flat, w2_ref, b2_ref, th + 4, th + 2, wp))
    h2flat[pl.ds(_LEAD, (th + 2) * wp), :] = jnp.where(
        colmask[:(th + 2) * wp], y2, 0.0).astype(cdt)

    @pl.when(tile == 0)
    def _():
        h2flat[pl.ds(_LEAD, wp), :] = jnp.zeros((wp, cout), cdt)

    @pl.when(tile == last_tile)
    def _():
        h2flat[pl.ds(_LEAD + (th + 1) * wp, wp), :] = jnp.zeros((wp, cout), cdt)

    # ---- conv3 + skip + fused ReLU ----
    y3 = _conv3x3_flat(h2flat, w3_ref, b3_ref, th + 2, th, wp)       # (TH*wp, Cout) f32
    if has_skip:
        y3 = y3 + jnp.dot(xtp.astype(sw_ref.dtype), sw_ref[...],
                          preferred_element_type=jnp.float32)
    else:
        y3 = y3 + xtp.astype(jnp.float32)          # nn.Identity() skip (Cin == Cout)
    y3 = jnp.maximum(y3, 0.0)                      # self.fuse = nn.ReLU()

    # drop the pad columns once, then one lane-dense channel-major store
    yd = y3.reshape(th, wp, cout)[:, :w, :].reshape(th * w, cout)
    o_ref[...] = yd.T.reshape(1, cout, th * w).astype(o_ref.dtype)


# ------------------------------ wrapper ---------------------------------------

def _vmem_capacity_bytes():
    try:
        return int(pltpu.get_tpu_info().vmem_capacity_bytes)
    except Exception:
        return 64 * 1024 * 1024        # conservative fallback (v7x per-core VMEM)


def _num_tensorcores():
    try:
        dev = jax.devices()[0]
        return max(1, int(getattr(dev, "num_cores", 1) or 1))
    except Exception:
        return 1


def _pick_tile_rows(height, width, cin, cout, in_itemsize, cdt_itemsize,
                    budget_bytes, prefer_split):
    """Largest row-tile that divides H, satisfies layout constraints, fits the budget."""
    wp = _round_up(width + 1, 8)

    def ok(th):
        if height % th:
            return False
        if th == height:
            return True
        return th >= 8 and th % 8 == 0 and (th * width) % 128 == 0

    def vmem_est(th):
        # double-buffered pipeline blocks (input tile, halo slab, output tile, weights)
        blk = 2 * in_itemsize * (cin * th * width + cin * 6 * width + cout * th * width)
        blk += 2 * (cdt_itemsize * (9 * cin * cout + 18 * cout * cout + cin * cout)
                    + 4 * 3 * cout)
        # persistent flat scratches
        scr = cdt_itemsize * ((_LEAD + (th + 6) * wp + _TAIL) * cin
                              + (_LEAD + (th + 4) * wp + _TAIL) * cout
                              + (_LEAD + (th + 2) * wp + _TAIL) * cout)
        # in-flight temporaries: qcat (3C wide) + f32 accumulator / activation values
        c = max(cin, cout)
        tmp = (th + 6) * wp * (6 * c * cdt_itemsize + 3 * cout * 4)
        return blk + scr + tmp

    cands = [th for th in range(height, 0, -1) if ok(th)]
    fits = [th for th in cands if vmem_est(th) <= budget_bytes]
    if prefer_split:                    # v7x: keep both TensorCores busy when B == 1
        split_fits = [th for th in fits if th < height]
        if split_fits:
            return split_fits[0]
    if fits:
        return fits[0]
    return cands[-1]


class AutoencoderTinyBlockPallas:
    """JAX/Pallas re-implementation of AutoencoderTinyBlock (forward only).

    compute_dtype: jnp.float32 (default, exact; recommended on v5e) or jnp.bfloat16
    (recommended on v6e/v7x: halves scratch VMEM and relayout bytes, f32 accumulation
    is kept either way).
    """

    def __init__(self, in_channels, out_channels, act_fn, key,
                 compute_dtype=jnp.float32, tile_rows=None):
        self.in_channels = in_channels
        self.out_channels = out_channels
        self.act = _ACTIVATIONS[act_fn]
        self.compute_dtype = compute_dtype
        self.tile_rows = tile_rows

        cap = _vmem_capacity_bytes()
        self._vmem_capacity = cap
        self._vmem_limit = int(cap * 0.9)
        self._num_cores = _num_tensorcores()

        k = jax.random.split(key, 7)
        s = 0.1
        # Torch-layout (OIHW) master parameters, f32 (synthetic deterministic init).
        self.w1 = s * jax.random.normal(k[0], (out_channels, in_channels, 3, 3), jnp.float32)
        self.b1 = s * jax.random.normal(k[1], (out_channels,), jnp.float32)
        self.w2 = s * jax.random.normal(k[2], (out_channels, out_channels, 3, 3), jnp.float32)
        self.b2 = s * jax.random.normal(k[3], (out_channels,), jnp.float32)
        self.w3 = s * jax.random.normal(k[4], (out_channels, out_channels, 3, 3), jnp.float32)
        self.b3 = s * jax.random.normal(k[5], (out_channels,), jnp.float32)
        if in_channels != out_channels:
            self.wskip = s * jax.random.normal(k[6], (out_channels, in_channels), jnp.float32)
        else:
            self.wskip = None              # nn.Identity(): no matmul, no weight DMA

        def to_kernel_layout(w):           # OIHW -> (3, 3*Cin, Cout), rows = [kw, ci]
            co, ci = w.shape[0], w.shape[1]
            return jnp.transpose(w, (2, 3, 1, 0)).reshape(3, 3 * ci, co).astype(compute_dtype)

        self.w1_k = to_kernel_layout(self.w1)
        self.w2_k = to_kernel_layout(self.w2)
        self.w3_k = to_kernel_layout(self.w3)
        self.b1_k = self.b1.reshape(1, -1)
        self.b2_k = self.b2.reshape(1, -1)
        self.b3_k = self.b3.reshape(1, -1)
        self.wskip_k = (None if self.wskip is None
                        else jnp.transpose(self.wskip, (1, 0)).astype(compute_dtype))

    def __call__(self, x_nchw):
        B, cin, H, W = x_nchw.shape
        assert cin == self.in_channels
        cout = self.out_channels
        wp = _round_up(W + 1, 8)
        cdt = self.compute_dtype

        budget = int(self._vmem_capacity * 0.45)
        prefer_split = (B == 1 and self._num_cores >= 2)
        th = self.tile_rows or _pick_tile_rows(
            H, W, cin, cout, x_nchw.dtype.itemsize,
            jnp.dtype(cdt).itemsize, budget, prefer_split)
        assert H % th == 0, "tile_rows must divide H"
        n_tiles = H // th
        if n_tiles > 1:
            assert th >= 8 and th % 8 == 0 and (th * W) % 128 == 0, \
                "row tile must be >=8, a multiple of 8, and tile*W a multiple of 128"

        has_skip = self.wskip_k is not None
        xf = x_nchw.reshape(B, cin, H * W)          # free metadata reshape, stays NCHW

        # 3-row halo slabs above/below every tile, zero at the image border.  Tiny XLA
        # precompute (~6/TH of the input) so each grid step DMAs one tile + 6 rows
        # instead of three full tiles.
        if n_tiles == 1:
            halo = jnp.zeros((B, 1, cin, 6 * W), x_nchw.dtype)
        else:
            xr = x_nchw.reshape(B, cin, n_tiles, th, W)
            last3 = xr[:, :, :, th - 3:, :]
            first3 = xr[:, :, :, :3, :]
            z3 = jnp.zeros_like(last3[:, :, :1])
            prev_h = jnp.concatenate([z3, last3[:, :, :-1]], axis=2)
            next_h = jnp.concatenate([first3[:, :, 1:], z3], axis=2)
            halo = jnp.transpose(jnp.concatenate([prev_h, next_h], axis=3),
                                 (0, 2, 1, 3, 4)).reshape(B, n_tiles, cin, 6 * W)

        in_specs = [
            pl.BlockSpec((1, cin, th * W), lambda b, i: (b, 0, i)),         # current tile
            pl.BlockSpec((1, 1, cin, 6 * W), lambda b, i: (b, i, 0, 0)),    # halo rows
            pl.BlockSpec((3, 3 * cin, cout), lambda b, i: (0, 0, 0)),
            pl.BlockSpec((1, cout), lambda b, i: (0, 0)),
            pl.BlockSpec((3, 3 * cout, cout), lambda b, i: (0, 0, 0)),
            pl.BlockSpec((1, cout), lambda b, i: (0, 0)),
            pl.BlockSpec((3, 3 * cout, cout), lambda b, i: (0, 0, 0)),
            pl.BlockSpec((1, cout), lambda b, i: (0, 0)),
        ]
        args = [xf, halo, self.w1_k, self.b1_k, self.w2_k, self.b2_k,
                self.w3_k, self.b3_k]
        if has_skip:
            in_specs.append(pl.BlockSpec((cin, cout), lambda b, i: (0, 0)))
            args.append(self.wskip_k)

        kernel = functools.partial(
            _tiny_block_kernel, tile_h=th, width=W, wp=wp,
            act=self.act, has_skip=has_skip)

        y = pl.pallas_call(
            kernel,
            out_shape=jax.ShapeDtypeStruct((B, cout, H * W), x_nchw.dtype),
            grid=(B, n_tiles),
            in_specs=in_specs,
            out_specs=pl.BlockSpec((1, cout, th * W), lambda b, i: (b, 0, i)),
            scratch_shapes=[
                pltpu.VMEM((_LEAD + (th + 6) * wp + _TAIL, cin), cdt),
                pltpu.VMEM((_LEAD + (th + 4) * wp + _TAIL, cout), cdt),
                pltpu.VMEM((_LEAD + (th + 2) * wp + _TAIL, cout), cdt),
            ],
            compiler_params=pltpu.CompilerParams(
                dimension_semantics=("parallel", "parallel"),
                vmem_limit_bytes=self._vmem_limit),
        )(*args)
        return y.reshape(B, cout, H, W)

    # Pure-JAX/XLA reference for verification.
    def reference(self, x_nchw):
        dn = ("NCHW", "OIHW", "NCHW")

        def conv(h, w, b):
            y = lax.conv_general_dilated(h, w, (1, 1), "SAME", dimension_numbers=dn)
            return y + b.reshape(1, -1, 1, 1)

        h = self.act(conv(x_nchw, self.w1, self.b1))
        h = self.act(conv(h, self.w2, self.b2))
        h = conv(h, self.w3, self.b3)
        skip = x_nchw if self.wskip is None else jnp.einsum("oc,bchw->bohw",
                                                            self.wskip, x_nchw)
        return jax.nn.relu(h + skip)


if __name__ == "__main__":
    key = jax.random.PRNGKey(0)
    kp1, kx1, kp2, kx2, kp3, kx3 = jax.random.split(key, 6)

    # Case 1: Cin != Cout (1x1-conv skip), forced 2 row-tiles -> exercises the halo path.
    B, Cin, Cout, H, W = 2, 4, 8, 16, 16
    block = AutoencoderTinyBlockPallas(Cin, Cout, act_fn="relu", key=kp1, tile_rows=8)
    x = jax.random.normal(kx1, (B, Cin, H, W), jnp.float32)     # NCHW, like PyTorch
    out = jax.block_until_ready(block(x))
    ref = block.reference(x)
    assert out.shape == (B, Cout, H, W)
    err = float(jnp.max(jnp.abs(out - ref)))
    assert err < 1e-3, f"case1 err={err}"

    # Case 2: Cin == Cout (identity skip), automatic generation-aware tile selection.
    block2 = AutoencoderTinyBlockPallas(8, 8, act_fn="relu", key=kp2)
    x2 = jax.random.normal(kx2, (1, 8, 16, 16), jnp.float32)
    out2 = jax.block_until_ready(block2(x2))
    err2 = float(jnp.max(jnp.abs(out2 - block2.reference(x2))))
    assert err2 < 1e-3, f"case2 err={err2}"

    # Case 3: bf16 compute path (recommended on v6e/v7x), transcendental activation.
    block3 = AutoencoderTinyBlockPallas(4, 8, act_fn="swish", key=kp3,
                                        compute_dtype=jnp.bfloat16, tile_rows=8)
    x3 = jax.random.normal(kx3, (2, 4, 16, 16), jnp.float32)
    out3 = jax.block_until_ready(block3(x3))
    err3 = float(jnp.max(jnp.abs(out3 - block3.reference(x3))))
    assert err3 < 5e-2, f"case3 bf16 err={err3}"

    print("KERNEL_OK")
</pallas_src>

<mosaic_0001>
module attributes {stable_mosaic.version = 11 : i64} {
  func.func @_tiny_block_kernel(%arg0: i32, %arg1: i32, %arg2: memref<1x4x128xf32, #tpu.memory_space<vmem>>, %arg3: memref<1x1x4x96xf32, #tpu.memory_space<vmem>>, %arg4: memref<3x12x8xf32, #tpu.memory_space<vmem>>, %arg5: memref<1x8xf32, #tpu.memory_space<vmem>>, %arg6: memref<3x24x8xf32, #tpu.memory_space<vmem>>, %arg7: memref<1x8xf32, #tpu.memory_space<vmem>>, %arg8: memref<3x24x8xf32, #tpu.memory_space<vmem>>, %arg9: memref<1x8xf32, #tpu.memory_space<vmem>>, %arg10: memref<4x8xf32, #tpu.memory_space<vmem>>, %arg11: memref<1x8x128xf32, #tpu.memory_space<vmem>>, %arg12: memref<352x4xf32, #tpu.memory_space<vmem>>, %arg13: memref<304x8xf32, #tpu.memory_space<vmem>>, %arg14: memref<256x8xf32, #tpu.memory_space<vmem>>) attributes {dimension_semantics = [#tpu.dimension_semantics<parallel>, #tpu.dimension_semantics<parallel>], iteration_bounds = array<i64: 2, 2>, scalar_prefetch = 0 : i64, scratch_operands = 3 : i64, tpu.core_type = #tpu.core_type<tc>, window_params = [{transform_indices = @transform_0, window_bounds = array<i64: 1, 4, 128>}, {transform_indices = @transform_1, window_bounds = array<i64: 1, 1, 4, 96>}, {pipeline_mode = #tpu.pipeline_mode<synchronous>, transform_indices = @transform_2, window_bounds = array<i64: 3, 12, 8>}, {pipeline_mode = #tpu.pipeline_mode<synchronous>, transform_indices = @transform_3, window_bounds = array<i64: 1, 8>}, {pipeline_mode = #tpu.pipeline_mode<synchronous>, transform_indices = @transform_4, window_bounds = array<i64: 3, 24, 8>}, {pipeline_mode = #tpu.pipeline_mode<synchronous>, transform_indices = @transform_5, window_bounds = array<i64: 1, 8>}, {pipeline_mode = #tpu.pipeline_mode<synchronous>, transform_indices = @transform_6, window_bounds = array<i64: 3, 24, 8>}, {pipeline_mode = #tpu.pipeline_mode<synchronous>, transform_indices = @transform_7, window_bounds = array<i64: 1, 8>}, {pipeline_mode = #tpu.pipeline_mode<synchronous>, transform_indices = @transform_8, window_bounds = array<i64: 4, 8>}, {transform_indices = @transform_9, window_bounds = array<i64: 1, 8, 128>}]} {
    %cst = arith.constant 0.000000e+00 : f32
    %0 = vector.broadcast %cst : f32 to vector<8x4xf32>
    %c0 = arith.constant 0 : index
    %c0_0 = arith.constant 0 : index
    %1 = vector.load %arg12[%c0, %c0_0] : memref<352x4xf32, #tpu.memory_space<vmem>>, vector<8x4xf32>
    tpu.vector_store %arg12[%c0, %c0_0], %0 {strides = array<i32>} : memref<352x4xf32, #tpu.memory_space<vmem>>, vector<8x4xf32>,
    %cst_1 = arith.constant 0.000000e+00 : f32
    %2 = vector.broadcast %cst_1 : f32 to vector<8x4xf32>
    %c344 = arith.constant 344 : index
    %c0_2 = arith.constant 0 : index
    %3 = vector.load %arg12[%c344, %c0_2] : memref<352x4xf32, #tpu.memory_space<vmem>>, vector<8x4xf32>
    tpu.vector_store %arg12[%c344, %c0_2], %2 {strides = array<i32>} : memref<352x4xf32, #tpu.memory_space<vmem>>, vector<8x4xf32>,
    %cst_3 = arith.constant 0.000000e+00 : f32
    %4 = vector.broadcast %cst_3 : f32 to vector<8x8xf32>
    %c0_4 = arith.constant 0 : index
    %c0_5 = arith.constant 0 : index
    %5 = vector.load %arg13[%c0_4, %c0_5] : memref<304x8xf32, #tpu.memory_space<vmem>>, vector<8x8xf32>
    tpu.vector_store %arg13[%c0_4, %c0_5], %4 {strides = array<i32>} : memref<304x8xf32, #tpu.memory_space<vmem>>, vector<8x8xf32>,
    %cst_6 = arith.constant 0.000000e+00 : f32
    %6 = vector.broadcast %cst_6 : f32 to vector<8x8xf32>
    %c296 = arith.constant 296 : index
    %c0_7 = arith.constant 0 : index
    %7 = vector.load %arg13[%c296, %c0_7] : memref<304x8xf32, #tpu.memory_space<vmem>>, vector<8x8xf32>
    tpu.vector_store %arg13[%c296, %c0_7], %6 {strides = array<i32>} : memref<304x8xf32, #tpu.memory_space<vmem>>, vector<8x8xf32>,
    %cst_8 = arith.constant 0.000000e+00 : f32
    %8 = vector.broadcast %cst_8 : f32 to vector<8x8xf32>
    %c0_9 = arith.constant 0 : index
    %c0_10 = arith.constant 0 : index
    %9 = vector.load %arg14[%c0_9, %c0_10] : memref<256x8xf32, #tpu.memory_space<vmem>>, vector<8x8xf32>
    tpu.vector_store %arg14[%c0_9, %c0_10], %8 {strides = array<i32>} : memref<256x8xf32, #tpu.memory_space<vmem>>, vector<8x8xf32>,
    %cst_11 = arith.constant 0.000000e+00 : f32
    %10 = vector.broadcast %cst_11 : f32 to vector<8x8xf32>
    %c248 = arith.constant 248 : index
    %c0_12 = arith.constant 0 : index
    %11 = vector.load %arg14[%c248, %c0_12] : memref<256x8xf32, #tpu.memory_space<vmem>>, vector<8x8xf32>
    tpu.vector_store %arg14[%c248, %c0_12], %10 {strides = array<i32>} : memref<256x8xf32, #tpu.memory_space<vmem>>, vector<8x8xf32>,
    %c0_13 = arith.constant 0 : index
    %c0_14 = arith.constant 0 : index
    %c0_15 = arith.constant 0 : index
    %12 = vector.load %arg2[%c0_13, %c0_14, %c0_15] : memref<1x4x128xf32, #tpu.memory_space<vmem>>, vector<1x4x128xf32>
    %13 = vector.shape_cast %12 : vector<1x4x128xf32> to vector<4x128xf32>
    %14 = tpu.transpose %13, [1, 0] : vector<4x128xf32> -> vector<128x4xf32>
    %15 = vector.shape_cast %14 : vector<128x4xf32> to vector<8x16x4xf32>
    %cst_16 = arith.constant 0.000000e+00 : f32
    %16 = vector.broadcast %cst_16 : f32 to vector<8x8x4xf32>
    %17 = tpu.concatenate %15, %16 in 1 : vector<8x16x4xf32>, vector<8x8x4xf32> -> vector<8x24x4xf32>
    %18 = vector.shape_cast %17 : vector<8x24x4xf32> to vector<192x4xf32>
    %c80 = arith.constant 80 : index
    %c0_17 = arith.constant 0 : index
    %19 = vector.load %arg12[%c80, %c0_17] : memref<352x4xf32, #tpu.memory_space<vmem>>, vector<192x4xf32>
    tpu.vector_store %arg12[%c80, %c0_17], %18 {strides = array<i32>} : memref<352x4xf32, #tpu.memory_space<vmem>>, vector<192x4xf32>,
    %c0_18 = arith.constant 0 : index
    %c0_19 = arith.constant 0 : index
    %c0_20 = arith.constant 0 : index
    %c0_21 = arith.constant 0 : index
    %20 = vector.load %arg3[%c0_18, %c0_19, %c0_20, %c0_21] : memref<1x1x4x96xf32, #tpu.memory_space<vmem>>, vector<1x1x4x96xf32>
    %21 = vector.shape_cast %20 : vector<1x1x4x96xf32> to vector<4x96xf32>
    %22 = tpu.transpose %21, [1, 0] : vector<4x96xf32> -> vector<96x4xf32>
    %23 = vector.shape_cast %22 : vector<96x4xf32> to vector<6x16x4xf32>
    %cst_22 = arith.constant 0.000000e+00 : f32
    %24 = vector.broadcast %cst_22 : f32 to vector<6x8x4xf32>
    %25 = tpu.concatenate %23, %24 in 1 : vector<6x16x4xf32>, vector<6x8x4xf32> -> vector<6x24x4xf32>
    %26 = vector.extract_strided_slice %25 {offsets = [0, 0, 0], sizes = [3, 24, 4], strides = [1, 1, 1]} : vector<6x24x4xf32> to vector<3x24x4xf32>
    %27 = vector.shape_cast %26 : vector<3x24x4xf32> to vector<72x4xf32>
    %c8 = arith.constant 8 : index
    %c0_23 = arith.constant 0 : index
    %28 = vector.load %arg12[%c8, %c0_23] : memref<352x4xf32, #tpu.memory_space<vmem>>, vector<72x4xf32>
    tpu.vector_store %arg12[%c8, %c0_23], %27 {strides = array<i32>} : memref<352x4xf32, #tpu.memory_space<vmem>>, vector<72x4xf32>,
    %29 = vector.extract_strided_slice %25 {offsets = [3, 0, 0], sizes = [3, 24, 4], strides = [1, 1, 1]} : vector<6x24x4xf32> to vector<3x24x4xf32>
    %30 = vector.shape_cast %29 : vector<3x24x4xf32> to vector<72x4xf32>
    %c272 = arith.constant 272 : index
    %c0_24 = arith.constant 0 : index
    %31 = vector.load %arg12[%c272, %c0_24] : memref<352x4xf32, #tpu.memory_space<vmem>>, vector<72x4xf32>
    tpu.vector_store %arg12[%c272, %c0_24], %30 {strides = array<i32>} : memref<352x4xf32, #tpu.memory_space<vmem>>, vector<72x4xf32>,
    %32 = tpu.iota {dimensions = array<i32: 0>} : vector<288x1xi32>
    %c24_i32 = arith.constant 24 : i32
    %c0_i32 = arith.constant 0 : i32
    %33 = arith.cmpi eq, %c24_i32, %c0_i32 : i32
    %c1_i32 = arith.constant 1 : i32
    %34 = arith.select %33, %c1_i32, %c24_i32 : i32
    %35 = vector.broadcast %34 : i32 to vector<288x1xi32>
    %36 = arith.remsi %32, %35 : vector<288x1xi32>
    %c0_i32_25 = arith.constant 0 : i32
    %37 = vector.broadcast %c0_i32_25 : i32 to vector<288x1xi32>
    %38 = arith.cmpi ne, %36, %37 : vector<288x1xi32>
    %c0_i32_26 = arith.constant 0 : i32
    %39 = vector.broadcast %c0_i32_26 : i32 to vector<288x1xi32>
    %40 = arith.cmpi slt, %36, %39 : vector<288x1xi32>
    %c0_i32_27 = arith.constant 0 : i32
    %41 = arith.cmpi slt, %34, %c0_i32_27 : i32
    %42 = vector.broadcast %41 : i1 to vector<288x1xi1>
    %43 = vector.broadcast %42 : vector<288x1xi1> to vector<288x1xi1>
    %44 = arith.xori %40, %43 : vector<288x1xi1>
    %45 = arith.andi %44, %38 : vector<288x1xi1>
    %46 = vector.broadcast %34 : i32 to vector<288x1xi32>
    %47 = arith.addi %36, %46 : vector<288x1xi32>
    %48 = arith.select %45, %47, %36 : vector<288x1xi1>, vector<288x1xi32>
    %c16_i32 = arith.constant 16 : i32
    %49 = vector.broadcast %c16_i32 : i32 to vector<288x1xi32>
    %50 = arith.cmpi slt, %48, %49 : vector<288x1xi32>
    %c7 = arith.constant 7 : index
    %c0_28 = arith.constant 0 : index
    %51 = vector.load %arg12[%c7, %c0_28] : memref<352x4xf32, #tpu.memory_space<vmem>>, vector<336x4xf32>
    %c8_29 = arith.constant 8 : index
    %c0_30 = arith.constant 0 : index
    %52 = vector.load %arg12[%c8_29, %c0_30] : memref<352x4xf32, #tpu.memory_space<vmem>>, vector<336x4xf32>
    %c9 = arith.constant 9 : index
    %c0_31 = arith.constant 0 : index
    %53 = vector.load %arg12[%c9, %c0_31] : memref<352x4xf32, #tpu.memory_space<vmem>>, vector<336x4xf32>
    %54 = tpu.concatenate %51, %52, %53 in 1 : vector<336x4xf32>, vector<336x4xf32>, vector<336x4xf32> -> vector<336x12xf32>
    %c0_32 = arith.constant 0 : index
    %c0_33 = arith.constant 0 : index
    %55 = vector.load %arg5[%c0_32, %c0_33] : memref<1x8xf32, #tpu.memory_space<vmem>>, vector<1x8xf32>
    %56 = vector.shape_cast %55 : vector<1x8xf32> to vector<1x8xf32>
    %57 = vector.broadcast %56 : vector<1x8xf32> to vector<288x8xf32>
    %58 = vector.extract_strided_slice %54 {offsets = [0, 0], sizes = [288, 12], strides = [1, 1]} : vector<336x12xf32> to vector<288x12xf32>
    %c0_34 = arith.constant 0 : index
    %c0_35 = arith.constant 0 : index
    %c0_36 = arith.constant 0 : index
    %59 = vector.load %arg4[%c0_34, %c0_35, %c0_36] : memref<3x12x8xf32, #tpu.memory_space<vmem>>, vector<1x12x8xf32>
    %60 = vector.shape_cast %59 : vector<1x12x8xf32> to vector<12x8xf32>
    %cst_37 = arith.constant dense<0.000000e+00> : vector<288x8xf32>
    %61 = tpu.matmul %58, %60, %cst_37 {dimension_numbers = #tpu.dot_dimension_numbers<[1], [0], [0], [1], [0, 0, 1, 1], [], []>} : vector<288x12xf32>, vector<12x8xf32>, vector<288x8xf32> -> vector<288x8xf32>
    %62 = arith.addf %57, %61 : vector<288x8xf32>
    %63 = vector.extract_strided_slice %54 {offsets = [24, 0], sizes = [288, 12], strides = [1, 1]} : vector<336x12xf32> to vector<288x12xf32>
    %c1 = arith.constant 1 : index
    %c0_38 = arith.constant 0 : index
    %c0_39 = arith.constant 0 : index
    %64 = vector.load %arg4[%c1, %c0_38, %c0_39] : memref<3x12x8xf32, #tpu.memory_space<vmem>>, vector<1x12x8xf32>
    %65 = vector.shape_cast %64 : vector<1x12x8xf32> to vector<12x8xf32>
    %cst_40 = arith.constant dense<0.000000e+00> : vector<288x8xf32>
    %66 = tpu.matmul %63, %65, %cst_40 {dimension_numbers = #tpu.dot_dimension_numbers<[1], [0], [0], [1], [0, 0, 1, 1], [], []>} : vector<288x12xf32>, vector<12x8xf32>, vector<288x8xf32> -> vector<288x8xf32>
    %67 = arith.addf %62, %66 : vector<288x8xf32>
    %68 = vector.extract_strided_slice %54 {offsets = [48, 0], sizes = [288, 12], strides = [1, 1]} : vector<336x12xf32> to vector<288x12xf32>
    %c2 = arith.constant 2 : index
    %c0_41 = arith.constant 0 : index
    %c0_42 = arith.constant 0 : index
    %69 = vector.load %arg4[%c2, %c0_41, %c0_42] : memref<3x12x8xf32, #tpu.memory_space<vmem>>, vector<1x12x8xf32>
    %70 = vector.shape_cast %69 : vector<1x12x8xf32> to vector<12x8xf32>
    %cst_43 = arith.constant dense<0.000000e+00> : vector<288x8xf32>
    %71 = tpu.matmul %68, %70, %cst_43 {dimension_numbers = #tpu.dot_dimension_numbers<[1], [0], [0], [1], [0, 0, 1, 1], [], []>} : vector<288x12xf32>, vector<12x8xf32>, vector<288x8xf32> -> vector<288x8xf32>
    %72 = arith.addf %67, %71 : vector<288x8xf32>
    %cst_44 = arith.constant 0.000000e+00 : f32
    %73 = vector.broadcast %cst_44 : f32 to vector<288x8xf32>
    %74 = arith.maximumf %72, %73 : vector<288x8xf32>
    %cst_45 = arith.constant 0.000000e+00 : f32
    %75 = vector.shape_cast %50 : vector<288x1xi1> to vector<288x1xi1>
    %76 = vector.broadcast %75 : vector<288x1xi1> to vector<288x8xi1>
    %77 = vector.broadcast %cst_45 : f32 to vector<288x8xf32>
    %78 = arith.select %76, %74, %77 : vector<288x8xi1>, vector<288x8xf32>
    %c8_46 = arith.constant 8 : index
    %c0_47 = arith.constant 0 : index
    %79 = vector.load %arg13[%c8_46, %c0_47] : memref<304x8xf32, #tpu.memory_space<vmem>>, vector<288x8xf32>
    tpu.vector_store %arg13[%c8_46, %c0_47], %78 {strides = array<i32>} : memref<304x8xf32, #tpu.memory_space<vmem>>, vector<288x8xf32>,
    %c0_i32_48 = arith.constant 0 : i32
    %80 = arith.cmpi eq, %arg1, %c0_i32_48 : i32
    %81 = arith.extui %80 : i1 to i32
    %c0_i32_49 = arith.constant 0 : i32
    %82 = arith.cmpi ne, %81, %c0_i32_49 : i32
    scf.if %82 {
      %cst_107 = arith.constant 0.000000e+00 : f32
      %155 = vector.broadcast %cst_107 : f32 to vector<48x8xf32>
      %c8_108 = arith.constant 8 : index
      %c0_109 = arith.constant 0 : index
      %156 = vector.load %arg13[%c8_108, %c0_109] : memref<304x8xf32, #tpu.memory_space<vmem>>, vector<48x8xf32>
      tpu.vector_store %arg13[%c8_108, %c0_109], %155 {strides = array<i32>} : memref<304x8xf32, #tpu.memory_space<vmem>>, vector<48x8xf32>,
    } else {
    }
    %c1_i32_50 = arith.constant 1 : i32
    %83 = arith.cmpi eq, %arg1, %c1_i32_50 : i32
    %84 = arith.extui %83 : i1 to i32
    %c0_i32_51 = arith.constant 0 : i32
    %85 = arith.cmpi ne, %84, %c0_i32_51 : i32
    scf.if %85 {
      %cst_107 = arith.constant 0.000000e+00 : f32
      %155 = vector.broadcast %cst_107 : f32 to vector<48x8xf32>
      %c248_108 = arith.constant 248 : index
      %c0_109 = arith.constant 0 : index
      %156 = vector.load %arg13[%c248_108, %c0_109] : memref<304x8xf32, #tpu.memory_space<vmem>>, vector<48x8xf32>
      tpu.vector_store %arg13[%c248_108, %c0_109], %155 {strides = array<i32>} : memref<304x8xf32, #tpu.memory_space<vmem>>, vector<48x8xf32>,
    } else {
    }
    %c7_52 = arith.constant 7 : index
    %c0_53 = arith.constant 0 : index
    %86 = vector.load %arg13[%c7_52, %c0_53] : memref<304x8xf32, #tpu.memory_space<vmem>>, vector<288x8xf32>
    %c8_54 = arith.constant 8 : index
    %c0_55 = arith.constant 0 : index
    %87 = vector.load %arg13[%c8_54, %c0_55] : memref<304x8xf32, #tpu.memory_space<vmem>>, vector<288x8xf32>
    %c9_56 = arith.constant 9 : index
    %c0_57 = arith.constant 0 : index
    %88 = vector.load %arg13[%c9_56, %c0_57] : memref<304x8xf32, #tpu.memory_space<vmem>>, vector<288x8xf32>
    %89 = tpu.concatenate %86, %87, %88 in 1 : vector<288x8xf32>, vector<288x8xf32>, vector<288x8xf32> -> vector<288x24xf32>
    %c0_58 = arith.constant 0 : index
    %c0_59 = arith.constant 0 : index
    %90 = vector.load %arg7[%c0_58, %c0_59] : memref<1x8xf32, #tpu.memory_space<vmem>>, vector<1x8xf32>
    %91 = vector.shape_cast %90 : vector<1x8xf32> to vector<1x8xf32>
    %92 = vector.broadcast %91 : vector<1x8xf32> to vector<240x8xf32>
    %93 = vector.extract_strided_slice %89 {offsets = [0, 0], sizes = [240, 24], strides = [1, 1]} : vector<288x24xf32> to vector<240x24xf32>
    %c0_60 = arith.constant 0 : index
    %c0_61 = arith.constant 0 : index
    %c0_62 = arith.constant 0 : index
    %94 = vector.load %arg6[%c0_60, %c0_61, %c0_62] : memref<3x24x8xf32, #tpu.memory_space<vmem>>, vector<1x24x8xf32>
    %95 = vector.shape_cast %94 : vector<1x24x8xf32> to vector<24x8xf32>
    %cst_63 = arith.constant dense<0.000000e+00> : vector<240x8xf32>
    %96 = tpu.matmul %93, %95, %cst_63 {dimension_numbers = #tpu.dot_dimension_numbers<[1], [0], [0], [1], [0, 0, 1, 1], [], []>} : vector<240x24xf32>, vector<24x8xf32>, vector<240x8xf32> -> vector<240x8xf32>
    %97 = arith.addf %92, %96 : vector<240x8xf32>
    %98 = vector.extract_strided_slice %89 {offsets = [24, 0], sizes = [240, 24], strides = [1, 1]} : vector<288x24xf32> to vector<240x24xf32>
    %c1_64 = arith.constant 1 : index
    %c0_65 = arith.constant 0 : index
    %c0_66 = arith.constant 0 : index
    %99 = vector.load %arg6[%c1_64, %c0_65, %c0_66] : memref<3x24x8xf32, #tpu.memory_space<vmem>>, vector<1x24x8xf32>
    %100 = vector.shape_cast %99 : vector<1x24x8xf32> to vector<24x8xf32>
    %cst_67 = arith.constant dense<0.000000e+00> : vector<240x8xf32>
    %101 = tpu.matmul %98, %100, %cst_67 {dimension_numbers = #tpu.dot_dimension_numbers<[1], [0], [0], [1], [0, 0, 1, 1], [], []>} : vector<240x24xf32>, vector<24x8xf32>, vector<240x8xf32> -> vector<240x8xf32>
    %102 = arith.addf %97, %101 : vector<240x8xf32>
    %103 = vector.extract_strided_slice %89 {offsets = [48, 0], sizes = [240, 24], strides = [1, 1]} : vector<288x24xf32> to vector<240x24xf32>
    %c2_68 = arith.constant 2 : index
    %c0_69 = arith.constant 0 : index
    %c0_70 = arith.constant 0 : index
    %104 = vector.load %arg6[%c2_68, %c0_69, %c0_70] : memref<3x24x8xf32, #tpu.memory_space<vmem>>, vector<1x24x8xf32>
    %105 = vector.shape_cast %104 : vector<1x24x8xf32> to vector<24x8xf32>
    %cst_71 = arith.constant dense<0.000000e+00> : vector<240x8xf32>
    %106 = tpu.matmul %103, %105, %cst_71 {dimension_numbers = #tpu.dot_dimension_numbers<[1], [0], [0], [1], [0, 0, 1, 1], [], []>} : vector<240x24xf32>, vector<24x8xf32>, vector<240x8xf32> -> vector<240x8xf32>
    %107 = arith.addf %102, %106 : vector<240x8xf32>
    %cst_72 = arith.constant 0.000000e+00 : f32
    %108 = vector.broadcast %cst_72 : f32 to vector<240x8xf32>
    %109 = arith.maximumf %107, %108 : vector<240x8xf32>
    %110 = vector.extract_strided_slice %50 {offsets = [0, 0], sizes = [240, 1], strides = [1, 1]} : vector<288x1xi1> to vector<240x1xi1>
    %cst_73 = arith.constant 0.000000e+00 : f32
    %111 = vector.shape_cast %110 : vector<240x1xi1> to vector<240x1xi1>
    %112 = vector.broadcast %111 : vector<240x1xi1> to vector<240x8xi1>
    %113 = vector.broadcast %cst_73 : f32 to vector<240x8xf32>
    %114 = arith.select %112, %109, %113 : vector<240x8xi1>, vector<240x8xf32>
    %c8_74 = arith.constant 8 : index
    %c0_75 = arith.constant 0 : index
    %115 = vector.load %arg14[%c8_74, %c0_75] : memref<256x8xf32, #tpu.memory_space<vmem>>, vector<240x8xf32>
    tpu.vector_store %arg14[%c8_74, %c0_75], %114 {strides = array<i32>} : memref<256x8xf32, #tpu.memory_space<vmem>>, vector<240x8xf32>,
    %c0_i32_76 = arith.constant 0 : i32
    %116 = arith.cmpi eq, %arg1, %c0_i32_76 : i32
    %117 = arith.extui %116 : i1 to i32
    %c0_i32_77 = arith.constant 0 : i32
    %118 = arith.cmpi ne, %117, %c0_i32_77 : i32
    scf.if %118 {
      %cst_107 = arith.constant 0.000000e+00 : f32
      %155 = vector.broadcast %cst_107 : f32 to vector<24x8xf32>
      %c8_108 = arith.constant 8 : index
      %c0_109 = arith.constant 0 : index
      %156 = vector.load %arg14[%c8_108, %c0_109] : memref<256x8xf32, #tpu.memory_space<vmem>>, vector<24x8xf32>
      tpu.vector_store %arg14[%c8_108, %c0_109], %155 {strides = array<i32>} : memref<256x8xf32, #tpu.memory_space<vmem>>, vector<24x8xf32>,
    } else {
    }
    %c1_i32_78 = arith.constant 1 : i32
    %119 = arith.cmpi eq, %arg1, %c1_i32_78 : i32
    %120 = arith.extui %119 : i1 to i32
    %c0_i32_79 = arith.constant 0 : i32
    %121 = arith.cmpi ne, %120, %c0_i32_79 : i32
    scf.if %121 {
      %cst_107 = arith.constant 0.000000e+00 : f32
      %155 = vector.broadcast %cst_107 : f32 to vector<24x8xf32>
      %c224 = arith.constant 224 : index
      %c0_108 = arith.constant 0 : index
      %156 = vector.load %arg14[%c224, %c0_108] : memref<256x8xf32, #tpu.memory_space<vmem>>, vector<24x8xf32>
      tpu.vector_store %arg14[%c224, %c0_108], %155 {strides = array<i32>} : memref<256x8xf32, #tpu.memory_space<vmem>>, vector<24x8xf32>,
    } else {
    }
    %c7_80 = arith.constant 7 : index
    %c0_81 = arith.constant 0 : index
    %122 = vector.load %arg14[%c7_80, %c0_81] : memref<256x8xf32, #tpu.memory_space<vmem>>, vector<240x8xf32>
    %c8_82 = arith.constant 8 : index
    %c0_83 = arith.constant 0 : index
    %123 = vector.load %arg14[%c8_82, %c0_83] : memref<256x8xf32, #tpu.memory_space<vmem>>, vector<240x8xf32>
    %c9_84 = arith.constant 9 : index
    %c0_85 = arith.constant 0 : index
    %124 = vector.load %arg14[%c9_84, %c0_85] : memref<256x8xf32, #tpu.memory_space<vmem>>, vector<240x8xf32>
    %125 = tpu.concatenate %122, %123, %124 in 1 : vector<240x8xf32>, vector<240x8xf32>, vector<240x8xf32> -> vector<240x24xf32>
    %c0_86 = arith.constant 0 : index
    %c0_87 = arith.constant 0 : index
    %126 = vector.load %arg9[%c0_86, %c0_87] : memref<1x8xf32, #tpu.memory_space<vmem>>, vector<1x8xf32>
    %127 = vector.shape_cast %126 : vector<1x8xf32> to vector<1x8xf32>
    %128 = vector.broadcast %127 : vector<1x8xf32> to vector<192x8xf32>
    %129 = vector.extract_strided_slice %125 {offsets = [0, 0], sizes = [192, 24], strides = [1, 1]} : vector<240x24xf32> to vector<192x24xf32>
    %c0_88 = arith.constant 0 : index
    %c0_89 = arith.constant 0 : index
    %c0_90 = arith.constant 0 : index
    %130 = vector.load %arg8[%c0_88, %c0_89, %c0_90] : memref<3x24x8xf32, #tpu.memory_space<vmem>>, vector<1x24x8xf32>
    %131 = vector.shape_cast %130 : vector<1x24x8xf32> to vector<24x8xf32>
    %cst_91 = arith.constant dense<0.000000e+00> : vector<192x8xf32>
    %132 = tpu.matmul %129, %131, %cst_91 {dimension_numbers = #tpu.dot_dimension_numbers<[1], [0], [0], [1], [0, 0, 1, 1], [], []>} : vector<192x24xf32>, vector<24x8xf32>, vector<192x8xf32> -> vector<192x8xf32>
    %133 = arith.addf %128, %132 : vector<192x8xf32>
    %134 = vector.extract_strided_slice %125 {offsets = [24, 0], sizes = [192, 24], strides = [1, 1]} : vector<240x24xf32> to vector<192x24xf32>
    %c1_92 = arith.constant 1 : index
    %c0_93 = arith.constant 0 : index
    %c0_94 = arith.constant 0 : index
    %135 = vector.load %arg8[%c1_92, %c0_93, %c0_94] : memref<3x24x8xf32, #tpu.memory_space<vmem>>, vector<1x24x8xf32>
    %136 = vector.shape_cast %135 : vector<1x24x8xf32> to vector<24x8xf32>
    %cst_95 = arith.constant dense<0.000000e+00> : vector<192x8xf32>
    %137 = tpu.matmul %134, %136, %cst_95 {dimension_numbers = #tpu.dot_dimension_numbers<[1], [0], [0], [1], [0, 0, 1, 1], [], []>} : vector<192x24xf32>, vector<24x8xf32>, vector<192x8xf32> -> vector<192x8xf32>
    %138 = arith.addf %133, %137 : vector<192x8xf32>
    %139 = vector.extract_strided_slice %125 {offsets = [48, 0], sizes = [192, 24], strides = [1, 1]} : vector<240x24xf32> to vector<192x24xf32>
    %c2_96 = arith.constant 2 : index
    %c0_97 = arith.constant 0 : index
    %c0_98 = arith.constant 0 : index
    %140 = vector.load %arg8[%c2_96, %c0_97, %c0_98] : memref<3x24x8xf32, #tpu.memory_space<vmem>>, vector<1x24x8xf32>
    %141 = vector.shape_cast %140 : vector<1x24x8xf32> to vector<24x8xf32>
    %cst_99 = arith.constant dense<0.000000e+00> : vector<192x8xf32>
    %142 = tpu.matmul %139, %141, %cst_99 {dimension_numbers = #tpu.dot_dimension_numbers<[1], [0], [0], [1], [0, 0, 1, 1], [], []>} : vector<192x24xf32>, vector<24x8xf32>, vector<192x8xf32> -> vector<192x8xf32>
    %143 = arith.addf %138, %142 : vector<192x8xf32>
    %c0_100 = arith.constant 0 : index
    %c0_101 = arith.constant 0 : index
    %144 = vector.load %arg10[%c0_100, %c0_101] : memref<4x8xf32, #tpu.memory_space<vmem>>, vector<4x8xf32>
    %cst_102 = arith.constant dense<0.000000e+00> : vector<192x8xf32>
    %145 = tpu.matmul %18, %144, %cst_102 {dimension_numbers = #tpu.dot_dimension_numbers<[1], [0], [0], [1], [0, 0, 1, 1], [], []>} : vector<192x4xf32>, vector<4x8xf32>, vector<192x8xf32> -> vector<192x8xf32>
    %146 = arith.addf %143, %145 : vector<192x8xf32>
    %cst_103 = arith.constant 0.000000e+00 : f32
    %147 = vector.broadcast %cst_103 : f32 to vector<192x8xf32>
    %148 = arith.maximumf %146, %147 : vector<192x8xf32>
    %149 = vector.shape_cast %148 : vector<192x8xf32> to vector<8x24x8xf32>
    %150 = vector.extract_strided_slice %149 {offsets = [0, 0, 0], sizes = [8, 16, 8], strides = [1, 1, 1]} : vector<8x24x8xf32> to vector<8x16x8xf32>
    %151 = vector.shape_cast %150 : vector<8x16x8xf32> to vector<128x8xf32>
    %152 = tpu.transpose %151, [1, 0] : vector<128x8xf32> -> vector<8x128xf32>
    %153 = vector.shape_cast %152 : vector<8x128xf32> to vector<1x8x128xf32>
    %c0_104 = arith.constant 0 : index
    %c0_105 = arith.constant 0 : index
    %c0_106 = arith.constant 0 : index
    %154 = vector.load %arg11[%c0_104, %c0_105, %c0_106] : memref<1x8x128xf32, #tpu.memory_space<vmem>>, vector<1x8x128xf32>
    tpu.vector_store %arg11[%c0_104, %c0_105, %c0_106], %153 {strides = array<i32>} : memref<1x8x128xf32, #tpu.memory_space<vmem>>, vector<1x8x128xf32>,
    return
  }
  func.func @transform_0(%arg0: i32, %arg1: i32) -> (i32, i32, i32) {
    %c0_i32 = arith.constant 0 : i32
    %c0_i32_0 = arith.constant 0 : i32
    return %arg0, %c0_i32, %arg1 : i32, i32, i32
  }
  func.func @transform_1(%arg0: i32, %arg1: i32) -> (i32, i32, i32, i32) {
    %c0_i32 = arith.constant 0 : i32
    %c0_i32_0 = arith.constant 0 : i32
    %c0_i32_1 = arith.constant 0 : i32
    return %arg0, %arg1, %c0_i32, %c0_i32_0 : i32, i32, i32, i32
  }
  func.func @transform_2(%arg0: i32, %arg1: i32) -> (i32, i32, i32) {
    %c0_i32 = arith.constant 0 : i32
    %c0_i32_0 = arith.constant 0 : i32
    %c0_i32_1 = arith.constant 0 : i32
    %c0_i32_2 = arith.constant 0 : i32
    return %c0_i32, %c0_i32_0, %c0_i32_1 : i32, i32, i32
  }
  func.func @transform_3(%arg0: i32, %arg1: i32) -> (i32, i32) {
    %c0_i32 = arith.constant 0 : i32
    %c0_i32_0 = arith.constant 0 : i32
    %c0_i32_1 = arith.constant 0 : i32
    return %c0_i32, %c0_i32_0 : i32, i32
  }
  func.func @transform_4(%arg0: i32, %arg1: i32) -> (i32, i32, i32) {
    %c0_i32 = arith.constant 0 : i32
    %c0_i32_0 = arith.constant 0 : i32
    %c0_i32_1 = arith.constant 0 : i32
    %c0_i32_2 = arith.constant 0 : i32
    return %c0_i32, %c0_i32_0, %c0_i32_1 : i32, i32, i32
  }
  func.func @transform_5(%arg0: i32, %arg1: i32) -> (i32, i32) {
    %c0_i32 = arith.constant 0 : i32
    %c0_i32_0 = arith.constant 0 : i32
    %c0_i32_1 = arith.constant 0 : i32
    return %c0_i32, %c0_i32_0 : i32, i32
  }
  func.func @transform_6(%arg0: i32, %arg1: i32) -> (i32, i32, i32) {
    %c0_i32 = arith.constant 0 : i32
    %c0_i32_0 = arith.constant 0 : i32
    %c0_i32_1 = arith.constant 0 : i32
    %c0_i32_2 = arith.constant 0 : i32
    return %c0_i32, %c0_i32_0, %c0_i32_1 : i32, i32, i32
  }
  func.func @transform_7(%arg0: i32, %arg1: i32) -> (i32, i32) {
    %c0_i32 = arith.constant 0 : i32
    %c0_i32_0 = arith.constant 0 : i32
    %c0_i32_1 = arith.constant 0 : i32
    return %c0_i32, %c0_i32_0 : i32, i32
  }
  func.func @transform_8(%arg0: i32, %arg1: i32) -> (i32, i32) {
    %c0_i32 = arith.constant 0 : i32
    %c0_i32_0 = arith.constant 0 : i32
    %c0_i32_1 = arith.constant 0 : i32
    return %c0_i32, %c0_i32_0 : i32, i32
  }
  func.func @transform_9(%arg0: i32, %arg1: i32) -> (i32, i32, i32) {
    %c0_i32 = arith.constant 0 : i32
    %c0_i32_0 = arith.constant 0 : i32
    return %arg0, %c0_i32, %arg1 : i32, i32, i32
  }
}

</mosaic_0001>

<bundles_post_ra>
// kernel: tpu_custom_call.1
= control target key start
LH: loop header
LB: loop body
LE: loop exit
PB: predicated region body
PF: predicated region fallthrough
CT: control target
= control target key end

     0   :  { %14 = vsyncpa [#allocation6], 0  ;;  %s10639_s0 = inlined_call_operand.vmem [shape: f32[2,4,256], index: 0, kind: input, shape index: {}]   ;;  %s10640_s1 = inlined_call_operand.vmem [shape: f32[2,2,4,96], index: 1, kind: input, shape index: {}]   ;;  %s10641_s2 = inlined_call_operand.vmem [shape: f32[3,12,8], index: 2, kind: input, shape index: {}]   ;;  %s10642_s3 = inlined_call_operand.vmem [shape: f32[1,8], index: 3, kind: input, shape index: {}]   ;;  %s10643_s4 = inlined_call_operand.vmem [shape: f32[3,24,8], index: 4, kind: input, shape index: {}]   ;;  %s10644_s5 = inlined_call_operand.vmem [shape: f32[1,8], index: 5, kind: input, shape index: {}]   ;;  %s10645_s6 = inlined_call_operand.vmem [shape: f32[3,24,8], index: 6, kind: input, shape index: {}]   ;;  %s10646_s7 = inlined_call_operand.vmem [shape: f32[1,8], index: 7, kind: input, shape index: {}]   ;;  %s10647_s8 = inlined_call_operand.vmem [shape: f32[4,8], index: 8, kind: input, shape index: {}]   ;;  %s10648_s9 = inlined_call_operand.hbm [shape: f32[2,8,256], index: 9, kind: output, shape index: {}]  }
   0x1   :  { %16 = vsyncpa [#allocation6 + $0x1], 0  ;;  %s7590_s30 = smov 0   ;;  %s7592_s10 = smov 0  }
   0x2   :  { %s7594_s11 = smov 0   ;;  %s7596_s12 = smov 0  }
   0x3   :  { %s7598_s13 = smov 0   ;;  %s7600_s14 = smov 0  }
   0x4   :  { %s7602_s15 = smov 0   ;;  %s7604_s16 = smov 0  }
   0x5 LB: > { %10720 = sst [smem:[#allocation8_spill]] %s7524_s15  ;;  %s5812_s17 = sadd.s32 4294967295, %s7528_s16   ;;  %s7528_s16 = sphi %s7604_s16, %s22_s16   ;;  %s7524_s15 = sphi %s7602_s15, %s11162_s15   ;;  %s7520_s14 = sphi %s7600_s14, %s11167_s14   ;;  %s7516_s13 = sphi %s7598_s13, %s11160_s13   ;;  %s7512_s12 = sphi %s7596_s12, %s11166_s12   ;;  %s7508_s11 = sphi %s7594_s11, %s11165_s11   ;;  %s7504_s10 = sphi %s7592_s10, %s11164_s10   ;;  %s7500_s30 = sphi %s7590_s30, %s11163_s30  }
   0x6   : > { %s5813_s18 = sadd.s32 4294967294, %s7528_s16   ;;  %s31_s19 = sadd.s32 1, %s7520_s14 }
   0x7   : > { %p32_p0 = scmp.ge.s32.totalorder %s31_s19, 2  ;;  %s34_s20 = sadd.s32 1, %s7524_s15 }
   0x8   : > { %p256_p1 = scmp.ne.s32.totalorder %s7508_s11, %s7504_s10  ;;  %p257_p2 = scmp.eq.s32.totalorder %s5812_s17, 3 }
   0x9   : > { %s11169_s19 = smov (%p32_p0, %s31_s19), 0  ;;  %s11171_s20 = smov (!%p32_p0, %s34_s20), %s7524_s15 }
   0xa   : > { %10721 = sst [smem:[#allocation9_spill]] %s11169_s19  ;;  %s242_s21 = ssub.s32 %s7520_s14, %s11169_s19 }
   0xb   : > { %p7641_p3 = por %p257_p2, %p256_p1  ;;  %p36_p4 = scmp.ge.s32.totalorder %s11171_s20, 2 }
   0xc   : > { %p262_p5 = scmp.ne.s32.totalorder %s7504_s10, %s7500_s30  ;;  %p263_p6 = scmp.eq.s32.totalorder %s5813_s18, 3 }
   0xd   : > { %p5816_p7 = scmp.ge.s32.totalorder %s7528_s16, 1  ;;  %s11173_s20 = smov (%p36_p4, %s11171_s20), 0 }
   0xe   : > { %10723 = sst [smem:[#allocation10_spill]] %s11173_s20  ;;  %p7650_p8 = por %p263_p6, %p262_p5 }
   0xf   : > { %p324_p9 = scmp.lt.s32.totalorder %s7528_s16, 5  ;;  %s241_s24 = ssub.s32 %s7524_s15, %s11173_s20 }
  0x10   : > { %s246_s25 = sadd.s32 1, %s7508_s11  ;;  %s243_s26 = sor.u32 %s242_s21, %s241_s24 }
  0x11   : > { %p325_p10 = pnand %p5816_p7, %p324_p9  ;;  %p244_p11 = scmp.eq.s32.totalorder %s243_s26, 0 }
  0x13   : > { %s7659_s27 = scalar_select %p244_p11, %s7508_s11, %s246_s25  }
  0x14   : > { %328 = sbr.rel (%p325_p10) target bundleno = 2094 (0x82e), region = 56 }
  0x1b   : > { %p371_p12 = scmp.lt.s32.totalorder %s7516_s13, 1  ;;  %p373_p13 = scmp.lt.s32.totalorder %s7512_s12, 1  ;;  %vm10652_vm0 = vcmask 31744   ;;  %vm10662_vm1 = vcmask 64512   ;;  %v10653_v0 = vmov 0.0   ;;  %v1705_v6 = vld [vmem:[%s10641_s2] sm:$0xff] }
  0x1c   : > { %391 = vst.msk [vmem:[#allocation3] sm:$0xff] %vm10662_vm1, %v10653_v0  ;;  %392 = vst.msk [vmem:[#allocation3 + $0x128] sm:$0xff] %vm10662_vm1, %v10653_v0  ;;  %s7531_s20 = smov 4   ;;  %v1706_v7 = vld [vmem:[%s10641_s2 + $0x8] sm:$0xf]  ;;  %vm10661_vm2 = vcmask 1043456  }
  0x1d   : > { %393 = vst.msk [vmem:[#allocation4] sm:$0xff] %vm10662_vm1, %v10653_v0  ;;  %394 = vst.msk [vmem:[#allocation4 + $0xf8] sm:$0xff] %vm10662_vm1, %v10653_v0  ;;  %s372_s28 = scalar_select %p371_p12, %s7516_s13, 1  ;;  %v6950_v9 = vpack.c.bf16 %v1706_v7, %v1705_v6  ;;  %vm7532_vm3 = vmmov 1   ;;  %vm1707_vm5 = vcmask 97280  }
  0x1e   : > { %487 = vst.msk [vmem:[#allocation2 + $0x18] sm:$0xff] %vm10652_vm0, %v10653_v0  ;;  %388 = vst.msk [vmem:[#allocation2] sm:$0xff] %vm10652_vm0, %v10653_v0  ;;  %s374_s29 = scalar_select %p373_p13, %s7512_s12, 1 }
  0x1f   : > { %389 = vst.msk [vmem:[#allocation2 + $0x158] sm:$0xff] %vm10652_vm0, %v10653_v0  ;;  %430 = vst.msk [vmem:[#allocation2 + $0x60] sm:$0xff] %vm10652_vm0, %v10653_v0  ;;  %s5818_s17 = sshll.u32 %s372_s28, 1  ;;  %s7533_s15 = smov 8  }
  0x20   : > { %433 = vst.msk [vmem:[#allocation2 + $0x78] sm:$0xff] %vm10652_vm0, %v10653_v0  ;;  %436 = vst.msk [vmem:[#allocation2 + $0x90] sm:$0xff] %vm10652_vm0, %v10653_v0  ;;  %s376_s18 = sadd.s32 %s5818_s17, %s374_s29  ;;  %s368_s29 = sand.u32 1, %s7504_s10  }
  0x21   : > { %439 = vst.msk [vmem:[#allocation2 + $0xa8] sm:$0xff] %vm10652_vm0, %v10653_v0  ;;  %442 = vst.msk [vmem:[#allocation2 + $0xc0] sm:$0xff] %vm10652_vm0, %v10653_v0  ;;  %s5819_s21 = sshll.u32 %s376_s18, 2  ;;  %p5938_p0 = scmp.ne.s32.totalorder %s7512_s12, 0 }
  0x22   : > { %445 = vst.msk [vmem:[#allocation2 + $0xd8] sm:$0xff] %vm10652_vm0, %v10653_v0  ;;  %448 = vst.msk [vmem:[#allocation2 + $0xf0] sm:$0xff] %vm10652_vm0, %v10653_v0  ;;  %s386_s26 = scalar_lea.vmem %s10640_s1, %s5819_s21  ;;  %s378_s28 = scalar_lea.vmem %s10639_s0, %s5819_s21 }
  0x23   : > { %451 = vst.msk [vmem:[#allocation2 + $0x108] sm:$0xff] %vm10652_vm0, %v10653_v0  ;;  %490 = vst.msk [vmem:[#allocation2 + $0x30] sm:$0xff] %vm10652_vm0, %v10653_v0  ;;  %v452_v1 = vld [vmem:[%s386_s26] sm:$0xf]  ;;  %s7727_s26 = sshll.u32 %s368_s29, 3 }
  0x24   : > { %493 = vst.msk [vmem:[#allocation2 + $0x48] sm:$0xff] %vm10652_vm0, %v10653_v0  ;;  %496 = vst.msk [vmem:[#allocation2 + $0x120] sm:$0xff] %vm10652_vm0, %v10653_v0  ;;  %453 = vxpose.xlu0.b32.start.end [1/1] (short) (narrow) %v452_v1, 96  ;;  %v395_v4 = vld [vmem:[%s378_s28] sm:$0xf]  ;;  %s370_s28 = scalar_lea.vmem [#allocation5], %s7727_s26 }
  0x25   : > { %499 = vst.msk [vmem:[#allocation2 + $0x138] sm:$0xff] %vm10652_vm0, %v10653_v0  ;;  %502 = vst.msk [vmem:[#allocation2 + $0x150] sm:$0xff] %vm10652_vm0, %v10653_v0  ;;  %v1196_v2 = vld [vmem:[#allocation2 + $0x18] sm:$0xff] }
  0x26   : > { %1324 = vrot.lane.b32.xlu1 %v1196_v2, %s7531_s20  ;;  %vm7730_vm4 = vmpackc.low %vm10661_vm2, %vm7532_vm3  ;;  %v1205_v44 = vld [vmem:[#allocation2 + $0x60] sm:$0xff] }
  0x27   : > { %6952 = vmatprep.subr.msk.bf16.mxu0 %vm7730_vm4, %v6950_v9 }
  0x28   : > { %6955 = vmatpush3.bf16.msk.msra.mxu0 %vm7730_vm4, %v6950_v9  ;;  %v1217_v59 = vld [vmem:[#allocation2 + $0xc0] sm:$0xff] }
  0x2a   : > { %v1199_v3 = vld [vmem:[#allocation2 + $0x30] sm:$0xff] }
  0x2b   : > { %1330 = vrot.lane.b32.xlu1 %v1199_v3, %s7531_s20  ;;  %v1202_v34 = vld [vmem:[#allocation2 + $0x48] sm:$0xff] }
  0x51   : > { %396 = vxpose.xlu0.b32.start.end [1/1] (short) %v395_v4, 128 }
  0xa4   : > { %v469_v5 = vpop.trf.xlu0 }
  0xa5   : > { %485 = vst.msk [vmem:[#allocation2 + $0x8] sm:$0xff] %vm10652_vm0, %v469_v5  ;;  %v1208_v5 = vld [vmem:[#allocation2 + $0x78] sm:$0xff] }
  0xa8   : > { %v470_v8 = vpop.trf.xlu0 }
  0xa9   : > { %486 = vst.msk [vmem:[#allocation2 + $0x10] sm:$0xff] %vm10652_vm0, %v470_v8 }
  0xac   : > { %v471_v11 = vpop.trf.xlu0  ;;  %v1194_v12 = vld [vmem:[#allocation2 + $0x8] sm:$0xff] }
  0xad   : > { %488 = vst.msk [vmem:[#allocation2 + $0x20] sm:$0xff] %vm10652_vm0, %v471_v11  ;;  %1320 = vrot.lane.b32.xlu1 %v1194_v12, %s7531_s20  ;;  %v1325_v12 = vpop.permute.xlu1 %1324 }
  0xb0   : > { %v472_v13 = vpop.trf.xlu0  ;;  %v1195_v14 = vld [vmem:[#allocation2 + $0x10] sm:$0xff] }
  0xb1   : > { %489 = vst.msk [vmem:[#allocation2 + $0x28] sm:$0xff] %vm10652_vm0, %v472_v13  ;;  %1322 = vrot.lane.b32.xlu1 %v1195_v14, %s7531_s20  ;;  %v1236_v16 = vld [vmem:[#allocation2 + $0x9] sm:$0xff]  ;;  %v1237_v18 = vld [vmem:[#allocation2 + $0x11] sm:$0xff] }
  0xb2   : > { %v1223_v14 = vld [vmem:[#allocation2 + $0xf0] sm:$0xff] }
  0xb4   : > { %v473_v15 = vpop.trf.xlu0  ;;  %v1197_v20 = vld [vmem:[#allocation2 + $0x20] sm:$0xff] }
  0xb5   : > { %491 = vst.msk [vmem:[#allocation2 + $0x38] sm:$0xff] %vm10652_vm0, %v473_v15  ;;  %1488 = vrot.lane.b32.xlu1 %v1236_v16, %s7533_s15  ;;  %v1238_v22 = vld [vmem:[#allocation2 + $0x19] sm:$0xff]  ;;  %v7851_v15 = vpop.permute.xlu1 %1330 }
  0xb8   : > { %v474_v17 = vpop.trf.xlu0  ;;  %v1239_v25 = vld [vmem:[#allocation2 + $0x21] sm:$0xff]  ;;  %v1240_v29 = vld [vmem:[#allocation2 + $0x29] sm:$0xff] }
  0xb9   : > { %492 = vst.msk [vmem:[#allocation2 + $0x40] sm:$0xff] %vm10652_vm0, %v474_v17  ;;  %1490 = vrot.lane.b32.xlu1 %v1237_v18, %s7533_s15  ;;  %v1198_v27 = vld [vmem:[#allocation2 + $0x28] sm:$0xff] }
  0xbc   : > { %v475_v19 = vpop.trf.xlu0  ;;  %v1241_v31 = vld [vmem:[#allocation2 + $0x31] sm:$0xff] }
  0xbd   : > { %494 = vst.msk [vmem:[#allocation2 + $0x110] sm:$0xff] %vm10652_vm0, %v475_v19  ;;  %1326 = vrot.lane.b32.xlu1 %v1197_v20, %s7531_s20  ;;  %v1200_v33 = vld [vmem:[#allocation2 + $0x38] sm:$0xff]  ;;  %v1211_v20 = vld [vmem:[#allocation2 + $0x90] sm:$0xff] }
  0xc0   : > { %v476_v21 = vpop.trf.xlu0  ;;  %v1201_v23 = vld [vmem:[#allocation2 + $0x40] sm:$0xff] }
  0xc1   : > { %495 = vst.msk [vmem:[#allocation2 + $0x118] sm:$0xff] %vm10652_vm0, %v476_v21  ;;  %1492 = vrot.lane.b32.xlu1 %v1238_v22, %s7533_s15  ;;  %1334 = vrot.lane.b32.xlu0 %v1201_v23, %s7531_s20  ;;  %v1242_v63 = vld [vmem:[#allocation2 + $0x39] sm:$0xff]  ;;  %v1243_v3 = vld [vmem:[#allocation2 + $0x41] sm:$0xff] }
  0xc2   : > { %v1152_v23 = vld [vmem:[#allocation2 + $0x7] sm:$0xff] }
  0xc4   : > { %v477_v24 = vpop.trf.xlu0 }
  0xc5   : > { %497 = vst.msk [vmem:[#allocation2 + $0x128] sm:$0xff] %vm10652_vm0, %v477_v24  ;;  %1494 = vrot.lane.b32.xlu1 %v1239_v25, %s7533_s15 }
  0xc8   : > { %v478_v26 = vpop.trf.xlu0 }
  0xc9   : > { %498 = vst.msk [vmem:[#allocation2 + $0x130] sm:$0xff] %vm10652_vm0, %v478_v26  ;;  %1328 = vrot.lane.b32.xlu1 %v1198_v27, %s7531_s20 }
  0xcc   : > { %v479_v28 = vpop.trf.xlu0 }
  0xcd   : > { %500 = vst.msk [vmem:[#allocation2 + $0x140] sm:$0xff] %vm10652_vm0, %v479_v28  ;;  %1496 = vrot.lane.b32.xlu1 %v1240_v29, %s7533_s15  ;;  %v5860_v29 = vld [vmem:[%s10641_s2 + $0x10] sm:$0xff] }
  0xd0   : > { %v480_v30 = vpop.trf.xlu0 }
  0xd1   : > { %501 = vst.msk [vmem:[#allocation2 + $0x148] sm:$0xff] %vm10652_vm0, %v480_v30  ;;  %1498 = vrot.lane.b32.xlu1 %v1241_v31, %s7533_s15  ;;  %v5861_v30 = vld [vmem:[%s10641_s2 + $0x18] sm:$0xf]  ;;  %v1153_v31 = vld [vmem:[#allocation2 + $0xf] sm:$0xff] }
  0xd4   : > { %v7760_v32 = vpop.trf.xlu0 }
  0xd5   : > { %10727 = vst [vmem:[#allocation11_spill] sm:$0xff] %v7760_v32  ;;  %428 = vst.msk [vmem:[#allocation2 + $0x50] sm:$0xff] %vm10652_vm0, %v7760_v32  ;;  %1332 = vrot.lane.b32.xlu1 %v1200_v33, %s7531_s20 }
  0xd8   : > { %v7765_v35 = vpop.trf.xlu0 }
  0xd9   : > { %10728 = vst [vmem:[#allocation12_spill] sm:$0xff] %v7765_v35  ;;  %429 = vst.msk [vmem:[#allocation2 + $0x58] sm:$0xff] %vm10652_vm0, %v7765_v35  ;;  %1336 = vrot.lane.b32.xlu1 %v1202_v34, %s7531_s20  ;;  %v6956_v34 = vpack.c.bf16 %v5861_v30, %v5860_v29  ;;  %v1277_v29 = vld [vmem:[#allocation2 + $0x151] sm:$0xff] }
  0xdb   : > { %6958 = vmatprep.subr.msk.bf16.mxu0 %vm7730_vm4, %v6956_v34 }
  0xdc   : > { %v7770_v36 = vpop.trf.xlu0  ;;  %v1203_v37 = vld [vmem:[#allocation2 + $0x50] sm:$0xff] }
  0xdd   : > { %10729 = vst [vmem:[#allocation13_spill] sm:$0xff] %v7770_v36  ;;  %431 = vst.msk [vmem:[#allocation2 + $0x68] sm:$0xff] %vm10652_vm0, %v7770_v36  ;;  %1338 = vrot.lane.b32.xlu1 %v1203_v37, %s7531_s20  ;;  %v1244_v39 = vld [vmem:[#allocation2 + $0x49] sm:$0xff] }
  0xe0   : > { %v7775_v38 = vpop.trf.xlu0  ;;  %v1245_v41 = vld [vmem:[#allocation2 + $0x51] sm:$0xff]  ;;  %v1246_v47 = vld [vmem:[#allocation2 + $0x59] sm:$0xff] }
  0xe1   : > { %10730 = vst [vmem:[#allocation14_spill] sm:$0xff] %v7775_v38  ;;  %432 = vst.msk [vmem:[#allocation2 + $0x70] sm:$0xff] %vm10652_vm0, %v7775_v38  ;;  %1504 = vrot.lane.b32.xlu1 %v1244_v39, %s7533_s15  ;;  %v1204_v43 = vld [vmem:[#allocation2 + $0x58] sm:$0xff] }
  0xe4   : > { %v7780_v40 = vpop.trf.xlu0  ;;  %v1247_v48 = vld [vmem:[#allocation2 + $0x61] sm:$0xff] }
  0xe5   : > { %10731 = vst [vmem:[#allocation15_spill] sm:$0xff] %v7780_v40  ;;  %434 = vst.msk [vmem:[#allocation2 + $0x80] sm:$0xff] %vm10652_vm0, %v7780_v40  ;;  %1506 = vrot.lane.b32.xlu1 %v1245_v41, %s7533_s15  ;;  %v1206_v51 = vld [vmem:[#allocation2 + $0x68] sm:$0xff] }
  0xe8   : > { %v7785_v42 = vpop.trf.xlu0  ;;  %v1207_v53 = vld [vmem:[#allocation2 + $0x70] sm:$0xff] }
  0xe9   : > { %10732 = vst [vmem:[#allocation16_spill] sm:$0xff] %v7785_v42  ;;  %435 = vst.msk [vmem:[#allocation2 + $0x88] sm:$0xff] %vm10652_vm0, %v7785_v42  ;;  %1340 = vrot.lane.b32.xlu1 %v1204_v43, %s7531_s20  ;;  %v1248_v56 = vld [vmem:[#allocation2 + $0x69] sm:$0xff]  ;;  %v1249_v60 = vld [vmem:[#allocation2 + $0x71] sm:$0xff] }
  0xea   : > { %v1227_v43 = vld [vmem:[#allocation2 + $0x110] sm:$0xff] }
  0xec   : > { %v7790_v45 = vpop.trf.xlu0  ;;  %v1209_v8 = vld [vmem:[#allocation2 + $0x80] sm:$0xff] }
  0xed   : > { %10733 = vst [vmem:[#allocation17_spill] sm:$0xff] %v7790_v45  ;;  %437 = vst.msk [vmem:[#allocation2 + $0x98] sm:$0xff] %vm10652_vm0, %v7790_v45  ;;  %1342 = vrot.lane.b32.xlu1 %v1205_v44, %s7531_s20  ;;  %v1250_v13 = vld [vmem:[#allocation2 + $0x79] sm:$0xff] }
  0xf0   : > { %v7795_v46 = vpop.trf.xlu0  ;;  %v1251_v16 = vld [vmem:[#allocation2 + $0x81] sm:$0xff]  ;;  %v1252_v28 = vld [vmem:[#allocation2 + $0x89] sm:$0xff] }
  0xf1   : > { %10734 = vst [vmem:[#allocation18_spill] sm:$0xff] %v7795_v46  ;;  %438 = vst.msk [vmem:[#allocation2 + $0xa0] sm:$0xff] %vm10652_vm0, %v7795_v46  ;;  %1508 = vrot.lane.b32.xlu1 %v1246_v47, %s7533_s15  ;;  %v1210_v19 = vld [vmem:[#allocation2 + $0x88] sm:$0xff]  ;;  %v1154_v47 = vld [vmem:[#allocation2 + $0x17] sm:$0xff] }
  0xf4   : > { %v7800_v49 = vpop.trf.xlu0  ;;  %v1253_v33 = vld [vmem:[#allocation2 + $0x91] sm:$0xff] }
  0xf5   : > { %10735 = vst [vmem:[#allocation19_spill] sm:$0xff] %v7800_v49  ;;  %440 = vst.msk [vmem:[#allocation2 + $0xb0] sm:$0xff] %vm10652_vm0, %v7800_v49  ;;  %1510 = vrot.lane.b32.xlu1 %v1247_v48, %s7533_s15  ;;  %v1212_v48 = vld [vmem:[#allocation2 + $0x98] sm:$0xff] }
  0xf8   : > { %v7805_v50 = vpop.trf.xlu0  ;;  %v1255_v52 = vld [vmem:[#allocation2 + $0xa1] sm:$0xff] }
  0xf9   : > { %10736 = vst [vmem:[#allocation20_spill] sm:$0xff] %v7805_v50  ;;  %441 = vst.msk [vmem:[#allocation2 + $0xb8] sm:$0xff] %vm10652_vm0, %v7805_v50  ;;  %1344 = vrot.lane.b32.xlu1 %v1206_v51, %s7531_s20  ;;  %1526 = vrot.lane.b32.xlu0 %v1255_v52, %s7533_s15  ;;  %v1269_v51 = vld [vmem:[#allocation2 + $0x111] sm:$0xff]  ;;  %v1213_v52 = vld [vmem:[#allocation2 + $0xa0] sm:$0xff] }
  0xfc   : > { %v1215_v54 = vld [vmem:[#allocation2 + $0xb0] sm:$0xff]  ;;  %v7811_v55 = vpop.trf.xlu0 }
  0xfd   : > { %10737 = vst [vmem:[#allocation21_spill] sm:$0xff] %v7811_v55  ;;  %1346 = vrot.lane.b32.xlu1 %v1207_v53, %s7531_s20  ;;  %1362 = vrot.lane.b32.xlu0 %v1215_v54, %s7531_s20  ;;  %443 = vst.msk [vmem:[#allocation2 + $0xc8] sm:$0xff] %vm10652_vm0, %v7811_v55  ;;  %v1616_v53 = vsel %vm10652_vm0, %v1154_v47, %v1325_v12 }
 0x100   : > { %v1257_v57 = vld [vmem:[#allocation2 + $0xb1] sm:$0xff]  ;;  %v7817_v58 = vpop.trf.xlu0 }
 0x101   : > { %10738 = vst [vmem:[#allocation22_spill] sm:$0xff] %v7817_v58  ;;  %1512 = vrot.lane.b32.xlu1 %v1248_v56, %s7533_s15  ;;  %1530 = vrot.lane.b32.xlu0 %v1257_v57, %s7533_s15  ;;  %444 = vst.msk [vmem:[#allocation2 + $0xd0] sm:$0xff] %vm10652_vm0, %v7817_v58  ;;  %v1229_v56 = vld [vmem:[#allocation2 + $0x120] sm:$0xff] }
 0x104   : > { %v7823_v61 = vpop.trf.xlu0  ;;  %v1259_v62 = vld [vmem:[#allocation2 + $0xc1] sm:$0xff] }
 0x105   : > { %10739 = vst [vmem:[#allocation23_spill] sm:$0xff] %v7823_v61  ;;  %1514 = vrot.lane.b32.xlu1 %v1249_v60, %s7533_s15  ;;  %1366 = vrot.lane.b32.xlu0 %v1217_v59, %s7531_s20  ;;  %446 = vst.msk [vmem:[#allocation2 + $0xe0] sm:$0xff] %vm10652_vm0, %v7823_v61  ;;  %v1155_v59 = vld [vmem:[#allocation2 + $0x1f] sm:$0xff] }
 0x108   : > { %v7829_v1 = vpop.trf.xlu0  ;;  %v1219_v2 = vld [vmem:[#allocation2 + $0xd0] sm:$0xff] }
 0x109   : > { %10740 = vst [vmem:[#allocation24_spill] sm:$0xff] %v7829_v1  ;;  %1500 = vrot.lane.b32.xlu1 %v1242_v63, %s7533_s15  ;;  %1534 = vrot.lane.b32.xlu0 %v1259_v62, %s7533_s15  ;;  %447 = vst.msk [vmem:[#allocation2 + $0xe8] sm:$0xff] %vm10652_vm0, %v7829_v1  ;;  %v1261_v6 = vld [vmem:[#allocation2 + $0xd1] sm:$0xff]  ;;  %v1260_v30 = vld [vmem:[#allocation2 + $0xc9] sm:$0xff] }
 0x10c   : > { %v7835_v4 = vpop.trf.xlu0  ;;  %v1221_v9 = vld [vmem:[#allocation2 + $0xe0] sm:$0xff] }
 0x10d   : > { %10741 = vst [vmem:[#allocation25_spill] sm:$0xff] %v7835_v4  ;;  %1502 = vrot.lane.b32.xlu1 %v1243_v3, %s7533_s15  ;;  %1370 = vrot.lane.b32.xlu0 %v1219_v2, %s7531_s20  ;;  %449 = vst.msk [vmem:[#allocation2 + $0xf8] sm:$0xff] %vm10652_vm0, %v7835_v4  ;;  %v1254_v2 = vld [vmem:[#allocation2 + $0x99] sm:$0xff]  ;;  %v1271_v3 = vld [vmem:[#allocation2 + $0x121] sm:$0xff] }
 0x110   : > { %v7841_v7 = vpop.trf.xlu0  ;;  %v1263_v11 = vld [vmem:[#allocation2 + $0xe1] sm:$0xff] }
 0x111   : > { %10742 = vst [vmem:[#allocation26_spill] sm:$0xff] %v7841_v7  ;;  %1348 = vrot.lane.b32.xlu1 %v1208_v5, %s7531_s20  ;;  %1538 = vrot.lane.b32.xlu0 %v1261_v6, %s7533_s15  ;;  %450 = vst.msk [vmem:[#allocation2 + $0x100] sm:$0xff] %vm10652_vm0, %v7841_v7  ;;  %v1214_v5 = vld [vmem:[#allocation2 + $0xa8] sm:$0xff] }
 0x114   : > { %v1265_v17 = vld [vmem:[#allocation2 + $0xf1] sm:$0xff] }
 0x115   : > { %1350 = vrot.lane.b32.xlu1 %v1209_v8, %s7531_s20  ;;  %1374 = vrot.lane.b32.xlu0 %v1221_v9, %s7531_s20  ;;  %v1272_v8 = vld [vmem:[#allocation2 + $0x129] sm:$0xff] }
 0x116   : > { %v1156_v9 = vld [vmem:[#allocation2 + $0x27] sm:$0xff] }
 0x118   : > { %v1225_v21 = vld [vmem:[#allocation2 + $0x100] sm:$0xff] }
 0x119   : > { %1516 = vrot.lane.b32.xlu1 %v1250_v13, %s7533_s15  ;;  %1542 = vrot.lane.b32.xlu0 %v1263_v11, %s7533_s15  ;;  %v1267_v26 = vld [vmem:[#allocation2 + $0x101] sm:$0xff]  ;;  %v1232_v13 = vld [vmem:[#allocation2 + $0x138] sm:$0xff] }
 0x11d   : > { %1518 = vrot.lane.b32.xlu1 %v1251_v16, %s7533_s15  ;;  %1378 = vrot.lane.b32.xlu0 %v1223_v14, %s7531_s20  ;;  %v1157_v14 = vld [vmem:[#allocation2 + $0x2f] sm:$0xff] }
 0x11f   : > { %v1321_v18 = vpop.permute.xlu1 %1320 }
 0x120   : > { %v1614_v24 = vsel %vm10652_vm0, %v1152_v23, %v1321_v18  ;;  %v1619_v18 = vsel %vm10652_vm0, %v1157_v14, %v7851_v15  ;;  %v1230_v14 = vld [vmem:[#allocation2 + $0x128] sm:$0xff] }
 0x121   : > { %1352 = vrot.lane.b32.xlu1 %v1210_v19, %s7531_s20  ;;  %1546 = vrot.lane.b32.xlu0 %v1265_v17, %s7533_s15  ;;  %v1256_v17 = vld [vmem:[#allocation2 + $0xa9] sm:$0xff] }
 0x123   : > { %v1323_v22 = vpop.permute.xlu1 %1322 }
 0x124   : > { %v1615_v37 = vsel %vm10652_vm0, %v1153_v31, %v1323_v22  ;;  %v1274_v22 = vld [vmem:[#allocation2 + $0x139] sm:$0xff] }
 0x125   : > { %1354 = vrot.lane.b32.xlu1 %v1211_v20, %s7531_s20  ;;  %1382 = vrot.lane.b32.xlu0 %v1225_v21, %s7531_s20  ;;  %v1216_v21 = vld [vmem:[#allocation2 + $0xb8] sm:$0xff] }
 0x126   : > { %v1220_v31 = vld [vmem:[#allocation2 + $0xd8] sm:$0xff] }
 0x127   : > { %v1489_v25 = vpop.permute.xlu1 %1488 }
 0x128   : > { %v1656_v27 = vsel %vm10662_vm1, %v1614_v24, %v1489_v25  ;;  %v1258_v24 = vld [vmem:[#allocation2 + $0xb9] sm:$0xff]  ;;  %v1275_v25 = vld [vmem:[#allocation2 + $0x141] sm:$0xff] }
 0x129   : > { %6463 = vmatprep.mubr.msk.f32.mxu0 %vm1707_vm5, %v1656_v27  ;;  %1520 = vrot.lane.b32.xlu1 %v1252_v28, %s7533_s15  ;;  %v1218_v27 = vld [vmem:[#allocation2 + $0xc8] sm:$0xff] }
 0x12a   : > { %1550 = vrot.lane.b32.xlu0 %v1267_v26, %s7533_s15  ;;  %v1235_v26 = vld [vmem:[#allocation2 + $0x150] sm:$0xff] }
 0x12b   : > { %v1491_v39 = vpop.permute.xlu1 %1490 }
 0x12c   : > { %v1657_v41 = vsel %vm10662_vm1, %v1615_v37, %v1491_v39  ;;  %v1262_v37 = vld [vmem:[#allocation2 + $0xd9] sm:$0xff] }
 0x12d   : > { %6464 = vmatmul.mubr.msk.f32.vlgmr.msra.gmra.mrb[0].mxu0 %vm1707_vm5, %v1657_v41  ;;  %1522 = vrot.lane.b32.xlu1 %v1253_v33, %s7533_s15  ;;  %v1222_v41 = vld [vmem:[#allocation2 + $0xe8] sm:$0xff] }
 0x12e   : > { %1386 = vrot.lane.b32.xlu0 %v1227_v43, %s7531_s20  ;;  %6961 = vmatpush3.bf16.msk.msra.mxu0 %vm7730_vm4, %v6956_v34 }
 0x12f   : > { %v1327_v44 = vpop.permute.xlu1 %1326 }
 0x130   : > { %v1617_v60 = vsel %vm10652_vm0, %v1155_v59, %v1327_v44  ;;  %v1264_v44 = vld [vmem:[#allocation2 + $0xe9] sm:$0xff]  ;;  %v5899_v59 = vld [vmem:[%s10641_s2 + $0x20] sm:$0xff] }
 0x131   : > { %1356 = vrot.lane.b32.xlu1 %v1212_v48, %s7531_s20  ;;  %v1224_v48 = vld [vmem:[#allocation2 + $0xf8] sm:$0xff] }
 0x132   : > { %1554 = vrot.lane.b32.xlu0 %v1269_v51, %s7533_s15 }
 0x133   : > { %v1493_v54 = vpop.permute.xlu1 %1492 }
 0x134   : > { %v1658_v57 = vsel %vm10662_vm1, %v1616_v53, %v1493_v54  ;;  %v1226_v53 = vld [vmem:[#allocation2 + $0x108] sm:$0xff] }
 0x135   : > { %6466 = vmatprep.mubr.msk.f32.mxu0 %vm1707_vm5, %v1658_v57  ;;  %1358 = vrot.lane.b32.xlu1 %v1213_v52, %s7531_s20  ;;  %v1266_v52 = vld [vmem:[#allocation2 + $0xf9] sm:$0xff]  ;;  %v1268_v57 = vld [vmem:[#allocation2 + $0x109] sm:$0xff] }
 0x136   : > { %1390 = vrot.lane.b32.xlu0 %v1229_v56, %s7531_s20 }
 0x137   : > { %v1495_v62 = vpop.permute.xlu1 %1494 }
 0x138   : > { %v7888_v63 = vsel %vm10662_vm1, %v1617_v60, %v1495_v62  ;;  %v5900_v60 = vld [vmem:[%s10641_s2 + $0x28] sm:$0xf] }
 0x139   : > { %6467 = vmatmul.mubr.msk.f32.gmra.mrb[2].mxu0 %vm1707_vm5, %v7888_v63  ;;  %1524 = vrot.lane.b32.xlu1 %v1254_v2, %s7533_s15  ;;  %v7933_v62 = vpack.c.bf16 %v5900_v60, %v5899_v59  ;;  %v1166_v59 = vld [vmem:[#allocation2 + $0x77] sm:$0xff] }
 0x13a   : > { %1558 = vrot.lane.b32.xlu0 %v1271_v3, %s7533_s15  ;;  %v1228_v3 = vld [vmem:[#allocation2 + $0x118] sm:$0xff] }
 0x13b   : > { %v1329_v6 = vpop.permute.xlu1 %1328  ;;  %6964 = vmatprep.subr.msk.bf16.mxu0 %vm7730_vm4, %v7933_v62 }
 0x13c   : > { %v1618_v11 = vsel %vm10652_vm0, %v1156_v9, %v1329_v6  ;;  %v1270_v6 = vld [vmem:[#allocation2 + $0x119] sm:$0xff] }
 0x13d   : > { %1360 = vrot.lane.b32.xlu1 %v1214_v5, %s7531_s20 }
 0x13e   : > { %1560 = vrot.lane.b32.xlu0 %v1272_v8, %s7533_s15  ;;  %v1158_v8 = vld [vmem:[#allocation2 + $0x37] sm:$0xff] }
 0x13f   : > { %v1497_v12 = vpop.permute.xlu1 %1496 }
 0x140   : > { %v7898_v16 = vsel %vm10662_vm1, %v1618_v11, %v1497_v12  ;;  %v1335_v12 = vpop.permute.xlu0 %1334 }
 0x141   : > { %6469 = vmatprep.mubr.msk.f32.mxu0 %vm1707_vm5, %v7898_v16  ;;  %1528 = vrot.lane.b32.xlu1 %v1256_v17, %s7533_s15  ;;  %v1159_v17 = vld [vmem:[#allocation2 + $0x3f] sm:$0xff] }
 0x142   : > { %1396 = vrot.lane.b32.xlu0 %v1232_v13, %s7531_s20 }
 0x143   : > { %v1499_v19 = vpop.permute.xlu1 %1498 }
 0x144   : > { %v7907_v20 = vsel %vm10662_vm1, %v1619_v18, %v1499_v19  ;;  %v1621_v18 = vsel %vm10652_vm0, %v1159_v17, %v1335_v12  ;;  %v1160_v19 = vld [vmem:[#allocation2 + $0x47] sm:$0xff] }
 0x145   : > { %6470 = vmatmul.mubr.msk.f32.gmra.mrb[4].mxu0 %vm1707_vm5, %v7907_v20  ;;  %1364 = vrot.lane.b32.xlu1 %v1216_v21, %s7531_s20 }
 0x146   : > { %1564 = vrot.lane.b32.xlu0 %v1274_v22, %s7533_s15 }
 0x147   : > { %v1333_v23 = vpop.permute.xlu1 %1332 }
 0x148   : > { %v1620_v9 = vsel %vm10652_vm0, %v1158_v8, %v1333_v23 }
 0x149   : > { %1532 = vrot.lane.b32.xlu1 %v1258_v24, %s7533_s15  ;;  %v1231_v24 = vld [vmem:[#allocation2 + $0x130] sm:$0xff] }
 0x14a   : > { %1566 = vrot.lane.b32.xlu0 %v1275_v25, %s7533_s15 }
 0x14b   : > { %v1337_v15 = vpop.permute.xlu1 %1336 }
 0x14c   : > { %v1622_v22 = vsel %vm10652_vm0, %v1160_v19, %v1337_v15 }
 0x14d   : > { %1368 = vrot.lane.b32.xlu1 %v1218_v27, %s7531_s20 }
 0x14e   : > { %1402 = vrot.lane.b32.xlu0 %v1235_v26, %s7531_s20  ;;  %v1161_v26 = vld [vmem:[#allocation2 + $0x4f] sm:$0xff] }
 0x14f   : > { %v1339_v28 = vpop.permute.xlu1 %1338 }
 0x150   : > { %v1623_v27 = vsel %vm10652_vm0, %v1161_v26, %v1339_v28  ;;  %v1169_v26 = vld [vmem:[#allocation2 + $0x8f] sm:$0xff] }
 0x151   : > { %1536 = vrot.lane.b32.xlu1 %v1260_v30, %s7533_s15 }
 0x152   : > { %1570 = vrot.lane.b32.xlu0 %v1277_v29, %s7533_s15  ;;  %v1162_v29 = vld [vmem:[#allocation2 + $0x57] sm:$0xff] }
 0x153   : > { %v1505_v33 = vpop.permute.xlu1 %1504 }
 0x154   : > { %v7953_v25 = vsel %vm10662_vm1, %v1622_v22, %v1505_v33  ;;  %v1273_v33 = vld [vmem:[#allocation2 + $0x131] sm:$0xff] }
 0x155   : > { %1372 = vrot.lane.b32.xlu1 %v1220_v31, %s7531_s20 }
 0x157   : > { %v1507_v34 = vpop.permute.xlu1 %1506 }
 0x158   : > { %v7962_v30 = vsel %vm10662_vm1, %v1623_v27, %v1507_v34 }
 0x159   : > { %1540 = vrot.lane.b32.xlu1 %v1262_v37, %s7533_s15 }
 0x15b   : > { %v1341_v39 = vpop.permute.xlu1 %1340 }
 0x15c   : > { %v1624_v31 = vsel %vm10652_vm0, %v1162_v29, %v1341_v39 }
 0x15d   : > { %1376 = vrot.lane.b32.xlu1 %v1222_v41, %s7531_s20  ;;  %v1163_v41 = vld [vmem:[#allocation2 + $0x5f] sm:$0xff] }
 0x15f   : > { %v1343_v43 = vpop.permute.xlu1 %1342 }
 0x160   : > { %v1625_v28 = vsel %vm10652_vm0, %v1163_v41, %v1343_v43 }
 0x161   : > { %1544 = vrot.lane.b32.xlu1 %v1264_v44, %s7533_s15  ;;  %v1164_v44 = vld [vmem:[#allocation2 + $0x67] sm:$0xff] }
 0x163   : > { %v1509_v47 = vpop.permute.xlu1 %1508 }
 0x164   : > { %v7966_v37 = vsel %vm10662_vm1, %v1624_v31, %v1509_v47  ;;  %v1233_v47 = vld [vmem:[#allocation2 + $0x140] sm:$0xff] }
 0x165   : > { %1380 = vrot.lane.b32.xlu1 %v1224_v48, %s7531_s20 }
 0x167   : > { %v1511_v51 = vpop.permute.xlu1 %1510 }
 0x168   : > { %v7975_v48 = vsel %vm10662_vm1, %v1625_v28, %v1511_v51 }
 0x169   : > { %1548 = vrot.lane.b32.xlu1 %v1266_v52, %s7533_s15 }
 0x16b   : > { %v1345_v54 = vpop.permute.xlu1 %1344 }
 0x16c   : > { %v1626_v39 = vsel %vm10652_vm0, %v1164_v44, %v1345_v54  ;;  %v1171_v44 = vld [vmem:[#allocation2 + $0x9f] sm:$0xff] }
 0x16d   : > { %1384 = vrot.lane.b32.xlu1 %v1226_v53, %s7531_s20  ;;  %v1527_v53 = vpop.permute.xlu0 %1526 }
 0x16f   : > { %v1347_v56 = vpop.permute.xlu1 %1346 }
 0x171   : > { %1552 = vrot.lane.b32.xlu1 %v1268_v57, %s7533_s15  ;;  %v1165_v57 = vld [vmem:[#allocation2 + $0x6f] sm:$0xff] }
 0x172   : > { %v1627_v43 = vsel %vm10652_vm0, %v1165_v57, %v1347_v56 }
 0x173   : > { %v1513_v2 = vpop.permute.xlu1 %1512 }
 0x174   : > { %v7979_v52 = vsel %vm10662_vm1, %v1626_v39, %v1513_v2 }
 0x175   : > { %1388 = vrot.lane.b32.xlu1 %v1228_v3, %s7531_s20  ;;  %v1234_v3 = vld [vmem:[#allocation2 + $0x148] sm:$0xff] }
 0x177   : > { %v1515_v5 = vpop.permute.xlu1 %1514 }
 0x178   : > { %v7989_v60 = vsel %vm10662_vm1, %v1627_v43, %v1515_v5 }
 0x179   : > { %1556 = vrot.lane.b32.xlu1 %v1270_v6, %s7533_s15  ;;  %v1167_v6 = vld [vmem:[#allocation2 + $0x7f] sm:$0xff] }
 0x17b   : > { %v1501_v11 = vpop.permute.xlu1 %1500 }
 0x17c   : > { %v7942_v13 = vsel %vm10662_vm1, %v1620_v9, %v1501_v11  ;;  %v1363_v9 = vpop.permute.xlu0 %1362  ;;  %v1276_v11 = vld [vmem:[#allocation2 + $0x149] sm:$0xff] }
 0x17d   : > { %6472 = vmatprep.mubr.msk.f32.mxu0 %vm1707_vm5, %v7942_v13  ;;  %1392 = vrot.lane.b32.xlu1 %v1230_v14, %s7531_s20 }
 0x17f   : > { %v1503_v21 = vpop.permute.xlu1 %1502 }
 0x180   : > { %v7950_v23 = vsel %vm10662_vm1, %v1621_v18, %v1503_v21  ;;  %v1531_v14 = vpop.permute.xlu0 %1530  ;;  %v1168_v18 = vld [vmem:[#allocation2 + $0x87] sm:$0xff] }
 0x181   : > { %1394 = vrot.lane.b32.xlu1 %v1231_v24, %s7531_s20  ;;  %6473 = vmatmul.mubr.msk.f32.gmra.mrb[6].mxu0 %vm1707_vm5, %v7950_v23 }
 0x182   : > { %6475 = vmatprep.mubr.msk.f32.mxu0 %vm1707_vm5, %v7953_v25 }
 0x183   : > { %v1349_v15 = vpop.permute.xlu1 %1348 }
 0x184   : > { %v1628_v51 = vsel %vm10652_vm0, %v1166_v59, %v1349_v15  ;;  %v1367_v22 = vpop.permute.xlu0 %1366 }
 0x185   : > { %1562 = vrot.lane.b32.xlu1 %v1273_v33, %s7533_s15  ;;  %6476 = vmatmul.mubr.msk.f32.gmra.mrb[8].mxu0 %vm1707_vm5, %v7962_v30 }
 0x186   : > { %6478 = vmatprep.mubr.msk.f32.mxu0 %vm1707_vm5, %v7966_v37 }
 0x187   : > { %v1351_v34 = vpop.permute.xlu1 %1350 }
 0x188   : > { %v1629_v56 = vsel %vm10652_vm0, %v1167_v6, %v1351_v34  ;;  %v1535_v31 = vpop.permute.xlu0 %1534  ;;  %v1170_v34 = vld [vmem:[#allocation2 + $0x97] sm:$0xff]  ;;  %v1173_v6 = vld [vmem:[#allocation2 + $0xaf] sm:$0xff] }
 0x189   : > { %1398 = vrot.lane.b32.xlu1 %v1233_v47, %s7531_s20  ;;  %6479 = vmatmul.mubr.msk.f32.gmra.mrb[10].mxu0 %vm1707_vm5, %v7975_v48 }
 0x18a   : > { %6481 = vmatprep.mubr.msk.f32.mxu0 %vm1707_vm5, %v7979_v52 }
 0x18b   : > { %v1517_v54 = vpop.permute.xlu1 %1516 }
 0x18c   : > { %v7992_v2 = vsel %vm10662_vm1, %v1628_v51, %v1517_v54  ;;  %v1371_v28 = vpop.permute.xlu0 %1370 }
 0x18d   : > { %1400 = vrot.lane.b32.xlu1 %v1234_v3, %s7531_s20  ;;  %6482 = vmatmul.mubr.msk.f32.gmra.mrb[12].mxu0 %vm1707_vm5, %v7989_v60  ;;  %v1172_v3 = vld [vmem:[#allocation2 + $0xa7] sm:$0xff] }
 0x18e   : > { %6484 = vmatprep.mubr.msk.f32.mxu0 %vm1707_vm5, %v7992_v2 }
 0x18f   : > { %v1519_v8 = vpop.permute.xlu1 %1518 }
 0x190   : > { %v8001_v5 = vsel %vm10662_vm1, %v1629_v56, %v1519_v8  ;;  %v1539_v51 = vpop.permute.xlu0 %1538 }
 0x191   : > { %1568 = vrot.lane.b32.xlu1 %v1276_v11, %s7533_s15  ;;  %6485 = vmatmul.mubr.msk.f32.gmra.mrb[14].mxu0 %vm1707_vm5, %v8001_v5  ;;  %v1635_v11 = vsel %vm10652_vm0, %v1173_v6, %v1363_v9 }
 0x193   : > { %v1353_v12 = vpop.permute.xlu1 %1352 }
 0x194   : > { %v1630_v19 = vsel %vm10652_vm0, %v1168_v18, %v1353_v12  ;;  %v1375_v12 = vpop.permute.xlu0 %1374  ;;  %v8036_v18 = vsel %vm10662_vm1, %v1635_v11, %v1531_v14 }
 0x197   : > { %v1355_v17 = vpop.permute.xlu1 %1354 }
 0x198   : > { %v1631_v27 = vsel %vm10652_vm0, %v1169_v26, %v1355_v17  ;;  %v1175_v26 = vld [vmem:[#allocation2 + $0xbf] sm:$0xff] }
 0x19b   : > { %v1521_v21 = vpop.permute.xlu1 %1520 }
 0x19c   : > { %v8008_v24 = vsel %vm10662_vm1, %v1630_v19, %v1521_v21  ;;  %v1543_v19 = vpop.permute.xlu0 %1542  ;;  %v1174_v21 = vld [vmem:[#allocation2 + $0xb7] sm:$0xff] }
 0x19d   : > { %6487 = vmatprep.mubr.msk.f32.mxu0 %vm1707_vm5, %v8008_v24 }
 0x19f   : > { %v1523_v29 = vpop.permute.xlu1 %1522 }
 0x1a0   : > { %v8014_v15 = vsel %vm10662_vm1, %v1631_v27, %v1523_v29  ;;  %v1637_v29 = vsel %vm10652_vm0, %v1175_v26, %v1367_v22 }
 0x1a1   : > { %6488 = vmatmul.mubr.msk.f32.gmra.mrb[16].mxu0 %vm1707_vm5, %v8014_v15  ;;  %v8048_v14 = vsel %vm10662_vm1, %v1637_v29, %v1535_v31  ;;  %v1180_v29 = vld [vmem:[#allocation2 + $0xe7] sm:$0xff] }
 0x1a3   : > { %v1357_v33 = vpop.permute.xlu1 %1356 }
 0x1a4   : > { %v1632_v47 = vsel %vm10652_vm0, %v1170_v34, %v1357_v33  ;;  %v1176_v34 = vld [vmem:[#allocation2 + $0xc7] sm:$0xff] }
 0x1a7   : > { %v1359_v41 = vpop.permute.xlu1 %1358 }
 0x1a8   : > { %v1633_v39 = vsel %vm10652_vm0, %v1171_v44, %v1359_v41  ;;  %v1379_v44 = vpop.permute.xlu0 %1378 }
 0x1a9   : > { %v8026_v43 = vsel %vm10662_vm1, %v1633_v39, %v1527_v53  ;;  %v1177_v39 = vld [vmem:[#allocation2 + $0xcf] sm:$0xff] }
 0x1aa   : > { %v1639_v22 = vsel %vm10652_vm0, %v1177_v39, %v1371_v28 }
 0x1ab   : > { %v1525_v57 = vpop.permute.xlu1 %1524  ;;  %v8060_v31 = vsel %vm10662_vm1, %v1639_v22, %v1539_v51 }
 0x1ac   : > { %v8021_v59 = vsel %vm10662_vm1, %v1632_v47, %v1525_v57 }
 0x1ad   : > { %6490 = vmatprep.mubr.msk.f32.mxu0 %vm1707_vm5, %v8021_v59 }
 0x1ae   : > { %6491 = vmatmul.mubr.msk.f32.gmra.mrb[18].mxu0 %vm1707_vm5, %v8026_v43 }
 0x1af   : > { %v1361_v54 = vpop.permute.xlu1 %1360 }
 0x1b0   : > { %v1634_v56 = vsel %vm10652_vm0, %v1172_v3, %v1361_v54  ;;  %v1547_v3 = vpop.permute.xlu0 %1546 }
 0x1b3   : > { %v1529_v8 = vpop.permute.xlu1 %1528 }
 0x1b4   : > { %v8033_v17 = vsel %vm10662_vm1, %v1634_v56, %v1529_v8  ;;  %v1178_v56 = vld [vmem:[#allocation2 + $0xd7] sm:$0xff]  ;;  %v1179_v8 = vld [vmem:[#allocation2 + $0xdf] sm:$0xff] }
 0x1b5   : > { %6493 = vmatprep.mubr.msk.f32.mxu0 %vm1707_vm5, %v8033_v17  ;;  %v1641_v28 = vsel %vm10652_vm0, %v1179_v8, %v1375_v12 }
 0x1b6   : > { %6494 = vmatmul.mubr.msk.f32.gmra.mrb[20].mxu0 %vm1707_vm5, %v8036_v18  ;;  %v8072_v51 = vsel %vm10662_vm1, %v1641_v28, %v1543_v19 }
 0x1b7   : > { %v1365_v53 = vpop.permute.xlu1 %1364 }
 0x1b8   : > { %v1636_v27 = vsel %vm10652_vm0, %v1174_v21, %v1365_v53  ;;  %v1383_v21 = vpop.permute.xlu0 %1382 }
 0x1bb   : > { %v1533_v9 = vpop.permute.xlu1 %1532 }
 0x1bc   : > { %v8045_v33 = vsel %vm10662_vm1, %v1636_v27, %v1533_v9  ;;  %v1551_v9 = vpop.permute.xlu0 %1550 }
 0x1bd   : > { %6496 = vmatprep.mubr.msk.f32.mxu0 %vm1707_vm5, %v8045_v33 }
 0x1be   : > { %6497 = vmatmul.mubr.msk.f32.gmra.mrb[22].mxu0 %vm1707_vm5, %v8048_v14 }
 0x1bf   : > { %v1369_v41 = vpop.permute.xlu1 %1368 }
 0x1c0   : > { %v1638_v47 = vsel %vm10652_vm0, %v1176_v34, %v1369_v41  ;;  %v1181_v41 = vld [vmem:[#allocation2 + $0xef] sm:$0xff]  ;;  %v1387_v22 = vpop.permute.xlu0 %1386 }
 0x1c1   : > { %v1643_v39 = vsel %vm10652_vm0, %v1181_v41, %v1379_v44  ;;  %v1185_v41 = vld [vmem:[#allocation2 + $0x10f] sm:$0xff] }
 0x1c2   : > { %v8084_v19 = vsel %vm10662_vm1, %v1643_v39, %v1547_v3 }
 0x1c3   : > { %v1537_v57 = vpop.permute.xlu1 %1536 }
 0x1c4   : > { %v8057_v54 = vsel %vm10662_vm1, %v1638_v47, %v1537_v57  ;;  %v1555_v28 = vpop.permute.xlu0 %1554 }
 0x1c5   : > { %6499 = vmatprep.mubr.msk.f32.mxu0 %vm1707_vm5, %v8057_v54 }
 0x1c6   : > { %6500 = vmatmul.mubr.msk.f32.gmra.mrb[24].mxu0 %vm1707_vm5, %v8060_v31 }
 0x1c7   : > { %v1373_v6 = vpop.permute.xlu1 %1372 }
 0x1c8   : > { %v1640_v11 = vsel %vm10652_vm0, %v1178_v56, %v1373_v6  ;;  %v1182_v6 = vld [vmem:[#allocation2 + $0xf7] sm:$0xff]  ;;  %v1183_v56 = vld [vmem:[#allocation2 + $0xff] sm:$0xff]  ;;  %v1391_v39 = vpop.permute.xlu0 %1390 }
 0x1c9   : > { %v1645_v44 = vsel %vm10652_vm0, %v1183_v56, %v1383_v21  ;;  %v1647_v21 = vsel %vm10652_vm0, %v1185_v41, %v1387_v22 }
 0x1ca   : > { %v8096_v3 = vsel %vm10662_vm1, %v1645_v44, %v1551_v9  ;;  %v8108_v9 = vsel %vm10662_vm1, %v1647_v21, %v1555_v28 }
 0x1cb   : > { %v1541_v53 = vpop.permute.xlu1 %1540 }
 0x1cc   : > { %v8069_v26 = vsel %vm10662_vm1, %v1640_v11, %v1541_v53  ;;  %v1559_v56 = vpop.permute.xlu0 %1558 }
 0x1cd   : > { %6502 = vmatprep.mubr.msk.f32.mxu0 %vm1707_vm5, %v8069_v26 }
 0x1ce   : > { %6503 = vmatmul.mubr.msk.f32.gmra.mrb[26].mxu0 %vm1707_vm5, %v8072_v51 }
 0x1cf   : > { %v1377_v27 = vpop.permute.xlu1 %1376 }
 0x1d0   : > { %v1642_v34 = vsel %vm10652_vm0, %v1180_v29, %v1377_v27  ;;  %v1184_v29 = vld [vmem:[#allocation2 + $0x107] sm:$0xff] }
 0x1d3   : > { %v1545_v12 = vpop.permute.xlu1 %1544 }
 0x1d4   : > { %v8081_v47 = vsel %vm10662_vm1, %v1642_v34, %v1545_v12 }
 0x1d5   : > { %6505 = vmatprep.mubr.msk.f32.mxu0 %vm1707_vm5, %v8081_v47 }
 0x1d6   : > { %6506 = vmatmul.mubr.msk.f32.gmra.mrb[28].mxu0 %vm1707_vm5, %v8084_v19 }
 0x1d7   : > { %v1381_v57 = vpop.permute.xlu1 %1380 }
 0x1d8   : > { %v1644_v8 = vsel %vm10652_vm0, %v1182_v6, %v1381_v57 }
 0x1db   : > { %v1549_v11 = vpop.permute.xlu1 %1548 }
 0x1dc   : > { %v8093_v53 = vsel %vm10662_vm1, %v1644_v8, %v1549_v11  ;;  %v1186_v8 = vld [vmem:[#allocation2 + $0x117] sm:$0xff]  ;;  %v1187_v11 = vld [vmem:[#allocation2 + $0x11f] sm:$0xff] }
 0x1dd   : > { %6508 = vmatprep.mubr.msk.f32.mxu0 %vm1707_vm5, %v8093_v53 }
 0x1de   : > { %6509 = vmatmul.mubr.msk.f32.gmra.mrb[30].mxu0 %vm1707_vm5, %v8096_v3 }
 0x1df   : > { %v1385_v27 = vpop.permute.xlu1 %1384 }
 0x1e0   : > { %v1646_v34 = vsel %vm10652_vm0, %v1184_v29, %v1385_v27  ;;  %v1649_v27 = vsel %vm10652_vm0, %v1187_v11, %v1391_v39 }
 0x1e1   : > { %v8120_v28 = vsel %vm10662_vm1, %v1649_v27, %v1559_v56 }
 0x1e3   : > { %v1553_v12 = vpop.permute.xlu1 %1552 }
 0x1e4   : > { %v8105_v57 = vsel %vm10662_vm1, %v1646_v34, %v1553_v12  ;;  %v1189_v12 = vld [vmem:[#allocation2 + $0x12f] sm:$0xff] }
 0x1e5   : > { %6511 = vmatprep.mubr.msk.f32.mxu0 %vm1707_vm5, %v8105_v57 }
 0x1e6   : > { %6512 = vmatmul.mubr.msk.f32.gmra.mrb[32].mxu0 %vm1707_vm5, %v8108_v9 }
 0x1e7   : > { %v1389_v6 = vpop.permute.xlu1 %1388 }
 0x1e8   : > { %v1648_v44 = vsel %vm10652_vm0, %v1186_v8, %v1389_v6  ;;  %v1190_v8 = vld [vmem:[#allocation2 + $0x137] sm:$0xff] }
 0x1eb   : > { %v1557_v22 = vpop.permute.xlu1 %1556 }
 0x1ec   : > { %v8117_v29 = vsel %vm10662_vm1, %v1648_v44, %v1557_v22 }
 0x1ed   : > { %6514 = vmatprep.mubr.msk.f32.mxu0 %vm1707_vm5, %v8117_v29 }
 0x1ee   : > { %6515 = vmatmul.mubr.msk.f32.gmra.mrb[34].mxu0 %vm1707_vm5, %v8120_v28 }
 0x1ef   : > { %6521 = vmatprep.mubr.msk.f32.mxu0 %vm1707_vm5, %v7888_v63  ;;  %v1393_v10 = vpop.permute.xlu1 %1392  ;;  %v1561_v63 = vpop.permute.xlu0 %1560 }
 0x1f2   : > { %6522 = vmatmul.mubr.msk.f32.vlgmr.msra.gmra.mrb[0].mxu0 %vm1707_vm5, %v7898_v16 }
 0x1f3   : > { %6967 = vmatpush3.bf16.msk.msra.mxu0 %vm7730_vm4, %v7933_v62  ;;  %6524 = vmatprep.mubr.msk.f32.mxu0 %vm1707_vm5, %v7907_v20  ;;  %v1395_v16 = vpop.permute.xlu1 %1394  ;;  %v1397_v20 = vpop.permute.xlu0 %1396  ;;  %v1188_v62 = vld [vmem:[#allocation2 + $0x127] sm:$0xff] }
 0x1f4   : > { %v1650_v41 = vsel %vm10652_vm0, %v1188_v62, %v1393_v10  ;;  %v1651_v21 = vsel %vm10652_vm0, %v1189_v12, %v1395_v16  ;;  %v1652_v11 = vsel %vm10652_vm0, %v1190_v8, %v1397_v20 }
 0x1f5   : > { %v1692_v39 = vsel %vm10662_vm1, %v1650_v41, %v1561_v63 }
 0x1f6   : > { %6525 = vmatmul.mubr.msk.f32.gmra.mrb[2].mxu0 %vm1707_vm5, %v7942_v13 }
 0x1f7   : > { %6527 = vmatprep.mubr.msk.f32.mxu0 %vm1707_vm5, %v7950_v23  ;;  %v1563_v34 = vpop.permute.xlu1 %1562  ;;  %v1565_v6 = vpop.permute.xlu0 %1564 }
 0x1f8   : > { %v1693_v56 = vsel %vm10662_vm1, %v1651_v21, %v1563_v34  ;;  %v1694_v44 = vsel %vm10662_vm1, %v1652_v11, %v1565_v6 }
 0x1fa   : > { %6528 = vmatmul.mubr.msk.f32.gmra.mrb[4].mxu0 %vm1707_vm5, %v7953_v25 }
 0x1fb   : > { %6530 = vmatprep.mubr.msk.f32.mxu0 %vm1707_vm5, %v7962_v30 }
 0x1fe   : > { %6531 = vmatmul.mubr.msk.f32.gmra.mrb[6].mxu0 %vm1707_vm5, %v7966_v37 }
 0x1ff   : > { %6533 = vmatprep.mubr.msk.f32.mxu0 %vm1707_vm5, %v7975_v48 }
 0x202   : > { %6534 = vmatmul.mubr.msk.f32.gmra.mrb[8].mxu0 %vm1707_vm5, %v7979_v52 }
 0x203   : > { %6536 = vmatprep.mubr.msk.f32.mxu0 %vm1707_vm5, %v7989_v60 }
 0x206   : > { %6537 = vmatmul.mubr.msk.f32.gmra.mrb[10].mxu0 %vm1707_vm5, %v7992_v2 }
 0x207   : > { %6539 = vmatprep.mubr.msk.f32.mxu0 %vm1707_vm5, %v8001_v5 }
 0x20a   : > { %6540 = vmatmul.mubr.msk.f32.gmra.mrb[12].mxu0 %vm1707_vm5, %v8008_v24 }
 0x20b   : > { %6542 = vmatprep.mubr.msk.f32.mxu0 %vm1707_vm5, %v8014_v15 }
 0x20e   : > { %6543 = vmatmul.mubr.msk.f32.gmra.mrb[14].mxu0 %vm1707_vm5, %v8021_v59 }
 0x20f   : > { %6545 = vmatprep.mubr.msk.f32.mxu0 %vm1707_vm5, %v8026_v43 }
 0x212   : > { %6546 = vmatmul.mubr.msk.f32.gmra.mrb[16].mxu0 %vm1707_vm5, %v8033_v17 }
 0x213   : > { %6548 = vmatprep.mubr.msk.f32.mxu0 %vm1707_vm5, %v8036_v18 }
 0x216   : > { %6549 = vmatmul.mubr.msk.f32.gmra.mrb[18].mxu0 %vm1707_vm5, %v8045_v33 }
 0x217   : > { %6551 = vmatprep.mubr.msk.f32.mxu0 %vm1707_vm5, %v8048_v14 }
 0x21a   : > { %6552 = vmatmul.mubr.msk.f32.gmra.mrb[20].mxu0 %vm1707_vm5, %v8057_v54 }
 0x21b   : > { %6554 = vmatprep.mubr.msk.f32.mxu0 %vm1707_vm5, %v8060_v31 }
 0x21e   : > { %6555 = vmatmul.mubr.msk.f32.gmra.mrb[22].mxu0 %vm1707_vm5, %v8069_v26 }
 0x21f   : > { %6557 = vmatprep.mubr.msk.f32.mxu0 %vm1707_vm5, %v8072_v51 }
 0x222   : > { %6558 = vmatmul.mubr.msk.f32.gmra.mrb[24].mxu0 %vm1707_vm5, %v8081_v47 }
 0x223   : > { %6560 = vmatprep.mubr.msk.f32.mxu0 %vm1707_vm5, %v8084_v19 }
 0x226   : > { %6561 = vmatmul.mubr.msk.f32.gmra.mrb[26].mxu0 %vm1707_vm5, %v8093_v53 }
 0x227   : > { %6563 = vmatprep.mubr.msk.f32.mxu0 %vm1707_vm5, %v8096_v3 }
 0x22a   : > { %6564 = vmatmul.mubr.msk.f32.gmra.mrb[28].mxu0 %vm1707_vm5, %v8105_v57 }
 0x22b   : > { %6566 = vmatprep.mubr.msk.f32.mxu0 %vm1707_vm5, %v8108_v9 }
 0x22e   : > { %6567 = vmatmul.mubr.msk.f32.gmra.mrb[30].mxu0 %vm1707_vm5, %v8117_v29 }
 0x22f   : > { %6569 = vmatprep.mubr.msk.f32.mxu0 %vm1707_vm5, %v8120_v28 }
 0x232   : > { %6570 = vmatmul.mubr.msk.f32.gmra.mrb[32].mxu0 %vm1707_vm5, %v1692_v39 }
 0x233   : > { %6572 = vmatprep.mubr.msk.f32.mxu0 %vm1707_vm5, %v1693_v56 }
 0x236   : > { %6573 = vmatmul.mubr.msk.f32.gmra.mrb[34].mxu0 %vm1707_vm5, %v1694_v44 }
 0x237   : > { %6579 = vmatprep.mubr.msk.f32.mxu0 %vm1707_vm5, %v7942_v13  ;;  %v1399_v13 = vpop.permute.xlu1 %1398 }
 0x23a   : > { %6580 = vmatmul.mubr.msk.f32.vlgmr.msra.gmra.mrb[0].mxu0 %vm1707_vm5, %v7950_v23  ;;  %v1567_v23 = vpop.permute.xlu0 %1566 }
 0x23b   : > { %6582 = vmatprep.mubr.msk.f32.mxu0 %vm1707_vm5, %v7953_v25  ;;  %v1401_v25 = vpop.permute.xlu1 %1400 }
 0x23e   : > { %6583 = vmatmul.mubr.msk.f32.gmra.mrb[2].mxu0 %vm1707_vm5, %v7962_v30  ;;  %v1403_v30 = vpop.permute.xlu0 %1402 }
 0x23f   : > { %6585 = vmatprep.mubr.msk.f32.mxu0 %vm1707_vm5, %v7966_v37  ;;  %v1191_v37 = vld [vmem:[#allocation2 + $0x13f] sm:$0xff] }
 0x242   : > { %6586 = vmatmul.mubr.msk.f32.gmra.mrb[4].mxu0 %vm1707_vm5, %v7975_v48  ;;  %v1653_v48 = vsel %vm10652_vm0, %v1191_v37, %v1399_v13 }
 0x243   : > { %6588 = vmatprep.mubr.msk.f32.mxu0 %vm1707_vm5, %v7979_v52  ;;  %v1569_v52 = vpop.permute.xlu1 %1568 }
 0x246   : > { %6589 = vmatmul.mubr.msk.f32.gmra.mrb[6].mxu0 %vm1707_vm5, %v7989_v60  ;;  %v1192_v60 = vld [vmem:[#allocation2 + $0x147] sm:$0xff] }
 0x247   : > { %6591 = vmatprep.mubr.msk.f32.mxu0 %vm1707_vm5, %v7992_v2  ;;  %v1654_v2 = vsel %vm10652_vm0, %v1192_v60, %v1401_v25 }
 0x24a   : > { %6592 = vmatmul.mubr.msk.f32.gmra.mrb[8].mxu0 %vm1707_vm5, %v8001_v5  ;;  %v1695_v5 = vsel %vm10662_vm1, %v1653_v48, %v1567_v23 }
 0x24b   : > { %6594 = vmatprep.mubr.msk.f32.mxu0 %vm1707_vm5, %v8008_v24  ;;  %v1571_v24 = vpop.permute.xlu0 %1570 }
 0x24e   : > { %6595 = vmatmul.mubr.msk.f32.gmra.mrb[10].mxu0 %vm1707_vm5, %v8014_v15  ;;  %v1696_v15 = vsel %vm10662_vm1, %v1654_v2, %v1569_v52 }
 0x24f   : > { %6597 = vmatprep.mubr.msk.f32.mxu0 %vm1707_vm5, %v8021_v59  ;;  %v1193_v59 = vld [vmem:[#allocation2 + $0x14f] sm:$0xff] }
 0x252   : > { %6598 = vmatmul.mubr.msk.f32.gmra.mrb[12].mxu0 %vm1707_vm5, %v8026_v43  ;;  %v1655_v43 = vsel %vm10652_vm0, %v1193_v59, %v1403_v30 }
 0x253   : > { %6600 = vmatprep.mubr.msk.f32.mxu0 %vm1707_vm5, %v8033_v17  ;;  %v1697_v17 = vsel %vm10662_vm1, %v1655_v43, %v1571_v24 }
 0x256   : > { %6601 = vmatmul.mubr.msk.f32.gmra.mrb[14].mxu0 %vm1707_vm5, %v8036_v18  ;;  %v503_v18 = vlaneseq }
 0x257   : > { %6603 = vmatprep.mubr.msk.f32.mxu0 %vm1707_vm5, %v8045_v33 }
 0x258   : > { %v8276_v33 = vshrl.u32 %v503_v18, 7 }
 0x25a   : > { %6604 = vmatmul.mubr.msk.f32.gmra.mrb[16].mxu0 %vm1707_vm5, %v8048_v14  ;;  %v505_v14 = vadd.s32 8, %v8276_v33  ;;  %v509_v22 = vadd.s32 40, %v8276_v33  ;;  %v508_v63 = vadd.s32 32, %v8276_v33  ;;  %v511_v20 = vadd.s32 56, %v8276_v33 }
 0x25b   : > { %6606 = vmatprep.mubr.msk.f32.mxu0 %vm1707_vm5, %v8057_v54  ;;  %v507_v54 = vadd.s32 24, %v8276_v33  ;;  %v510_v34 = vadd.s32 48, %v8276_v33  ;;  %v8330_v60 = vadd.s32 72, %v8276_v33  ;;  %v8341_v59 = vadd.s32 64, %v8276_v33 }
 0x25c   : > { %v8351_v18 = vadd.s32 80, %v8276_v33  ;;  %v8527_v4 = vadd.s32 144, %v8276_v33  ;;  %v8660_v36 = vadd.s32 184, %v8276_v33 }
 0x25d   : > { %v8313_v13 = vmul.u32.u64.low 2863311531, %v510_v34  ;;  %v8314_v23 = vmul.u32.u64.high 2863311531, %v510_v34, %v8313_v13 }
 0x25e   : > { %6607 = vmatmul.mubr.msk.f32.gmra.mrb[18].mxu0 %vm1707_vm5, %v8060_v31 }
 0x25f   : > { %6609 = vmatprep.mubr.msk.f32.mxu0 %vm1707_vm5, %v8069_v26  ;;  %v8280_v31 = vmul.u32.u64.low 2863311531, %v505_v14  ;;  %v8281_v26 = vmul.u32.u64.high 2863311531, %v505_v14, %v8280_v31 }
 0x261   : > { %v557_v27 = vshrl.u32 %v8281_v26, 4 }
 0x262   : > { %6610 = vmatmul.mubr.msk.f32.gmra.mrb[20].mxu0 %vm1707_vm5, %v8072_v51  ;;  %v506_v51 = vadd.s32 16, %v8276_v33 }
 0x263   : > { %6612 = vmatprep.mubr.msk.f32.mxu0 %vm1707_vm5, %v8081_v47  ;;  %v558_v62 = vmul.u32 24, %v557_v27  ;;  %v8386_v27 = vadd.s32 104, %v8276_v33 }
 0x265   : > { %v8311_v11 = vsub.s32 %v505_v14, %v558_v62  ;;  %v612_v14 = vshrl.u32 %v8314_v23, 4 }
 0x266   : > { %6613 = vmatmul.mubr.msk.f32.gmra.mrb[22].mxu0 %vm1707_vm5, %v8084_v19  ;;  %v8285_v47 = vmul.u32.u64.low 2863311531, %v8276_v33  ;;  %v8286_v19 = vmul.u32.u64.high 2863311531, %v8276_v33, %v8285_v47 }
 0x267   : > { %6615 = vmatprep.mubr.msk.f32.mxu0 %vm1707_vm5, %v8093_v53  ;;  %vm937_vm6 = vcmp.ne.s32.totalorder %v8311_v11, 0  ;;  %vm973_vm7 = vcmp.lt.s32.totalorder %v8311_v11, 0  ;;  %v8325_v48 = vadd.s32 24, %v8311_v11 }
 0x268   : > { %vm8363_vm13 = vmand %vm973_vm7, %vm937_vm6 }
 0x26a   : > { %6616 = vmatmul.mubr.msk.f32.gmra.mrb[24].mxu0 %vm1707_vm5, %v8096_v3  ;;  %v8288_v53 = vmul.u32.u64.low 2863311531, %v507_v54  ;;  %v8289_v3 = vmul.u32.u64.high 2863311531, %v507_v54, %v8288_v53 }
 0x26b   : > { %6618 = vmatprep.mubr.msk.f32.mxu0 %vm1707_vm5, %v8105_v57  ;;  %v10795_v53 = vmov 0 }
 0x26c   : > { %v579_v16 = vshrl.u32 %v8289_v3, 4 }
 0x26e   : > { %6619 = vmatmul.mubr.msk.f32.gmra.mrb[26].mxu0 %vm1707_vm5, %v8108_v9  ;;  %v8291_v57 = vmul.u32.u64.low 2863311531, %v506_v51  ;;  %v8292_v9 = vmul.u32.u64.high 2863311531, %v506_v51, %v8291_v57  ;;  %v580_v6 = vmul.u32 24, %v579_v16 }
 0x26f   : > { %6621 = vmatprep.mubr.msk.f32.mxu0 %vm1707_vm5, %v8117_v29  ;;  %v546_v29 = vshrl.u32 %v8286_v19, 4 }
 0x270   : > { %v568_v41 = vshrl.u32 %v8292_v9, 4  ;;  %v8320_v37 = vsub.s32 %v507_v54, %v580_v6  ;;  %v8356_v54 = vmul.u32.u64.low 2863311531, %v8330_v60  ;;  %v8357_v31 = vmul.u32.u64.high 2863311531, %v8330_v60, %v8356_v54 }
 0x271   : > { %v547_v12 = vmul.u32 24, %v546_v29  ;;  %v8382_v57 = vmul.u32.u64.low 2863311531, %v8341_v59  ;;  %v8383_v9 = vmul.u32.u64.high 2863311531, %v8341_v59, %v8382_v57  ;;  %v8459_v54 = vadd.s32 112, %v8276_v33 }
 0x272   : > { %6622 = vmatmul.mubr.msk.f32.gmra.mrb[28].mxu0 %vm1707_vm5, %v8120_v28  ;;  %v8297_v28 = vmul.u32.u64.low 2863311531, %v509_v22  ;;  %v8298_v10 = vmul.u32.u64.high 2863311531, %v509_v22, %v8297_v28  ;;  %vm939_vm10 = vcmp.ne.s32.totalorder %v8320_v37, 0  ;;  %vm975_vm11 = vcmp.lt.s32.totalorder %v8320_v37, 0 }
 0x273   : > { %6624 = vmatprep.mubr.msk.f32.mxu0 %vm1707_vm5, %v1692_v39  ;;  %v8305_v21 = vmul.u32.u64.low 2863311531, %v508_v63  ;;  %v8306_v39 = vmul.u32.u64.high 2863311531, %v508_v63, %v8305_v21  ;;  %v8317_v25 = vsub.s32 %v8276_v33, %v547_v12  ;;  %v8345_v43 = vadd.s32 24, %v8320_v37  ;;  %vm8392_vm3 = vmand %vm975_vm11, %vm939_vm10 }
 0x274   : > { %v601_v30 = vshrl.u32 %v8298_v10, 4  ;;  %v8401_v10 = vmul.u32.u64.low 2863311531, %v8351_v18  ;;  %v8402_v16 = vmul.u32.u64.high 2863311531, %v8351_v18, %v8401_v10  ;;  %v8411_v12 = vadd.s32 96, %v8276_v33 }
 0x275   : > { %vm936_vm8 = vcmp.ne.s32.totalorder %v8317_v25, 0  ;;  %vm972_vm9 = vcmp.lt.s32.totalorder %v8317_v25, 0  ;;  %v8336_v24 = vadd.s32 24, %v8317_v25 }
 0x276   : > { %6625 = vmatmul.mubr.msk.f32.gmra.mrb[30].mxu0 %vm1707_vm5, %v1693_v56  ;;  %v8308_v56 = vmul.u32.u64.low 2863311531, %v511_v20  ;;  %v8309_v8 = vmul.u32.u64.high 2863311531, %v511_v20, %v8308_v56  ;;  %v602_v2 = vmul.u32 24, %v601_v30  ;;  %vm8377_vm15 = vmand %vm972_vm9, %vm936_vm8  ;;  %v645_v30 = vshrl.u32 %v8357_v31, 4 }
 0x277   : > { %6627 = vmatprep.mubr.msk.f32.mxu0 %vm1707_vm5, %v1694_v44  ;;  %v569_v44 = vmul.u32 24, %v568_v41  ;;  %v613_v41 = vmul.u32 24, %v612_v14  ;;  %v8451_v14 = vadd.s32 120, %v8276_v33 }
 0x278   : > { %v8371_v47 = vsub.s32 %v509_v22, %v602_v2  ;;  %v646_v57 = vmul.u32 24, %v645_v30 }
 0x279   : > { %v8327_v52 = vsub.s32 %v506_v51, %v569_v44  ;;  %v8438_v23 = vsub.s32 %v510_v34, %v613_v41  ;;  %v634_v34 = vshrl.u32 %v8383_v9, 4  ;;  %v10753_v41 = vmov 0 }
 0x27a   : > { %6628 = vmatmul.mubr.msk.f32.gmra.mrb[32].mxu0 %vm1707_vm5, %v1695_v5  ;;  %v590_v5 = vshrl.u32 %v8306_v39, 4  ;;  %vm977_vm6 = vcmp.lt.s32.totalorder %v8371_v47, 0  ;;  %v10803_v9 = vmov 0 }
 0x27b   : > { %6630 = vmatprep.mubr.msk.f32.mxu0 %vm1707_vm5, %v1696_v15  ;;  %v623_v15 = vshrl.u32 %v8309_v8, 4  ;;  %vm938_vm12 = vcmp.ne.s32.totalorder %v8327_v52, 0  ;;  %vm974_vm14 = vcmp.lt.s32.totalorder %v8327_v52, 0  ;;  %v8369_v51 = vadd.s32 24, %v8327_v52 }
 0x27c   : > { %v591_v19 = vmul.u32 24, %v590_v5  ;;  %vm8406_vm4 = vmand %vm974_vm14, %vm938_vm12  ;;  %v8424_v56 = vmul.u32.u64.low 2863311531, %v8386_v27  ;;  %v8425_v8 = vmul.u32.u64.high 2863311531, %v8386_v27, %v8424_v56  ;;  %vm942_vm11 = vcmp.ne.s32.totalorder %v8438_v23, 0 }
 0x27d   : > { %v624_v3 = vmul.u32 24, %v623_v15  ;;  %v8442_v2 = vmul.u32.u64.low 2863311531, %v8411_v12  ;;  %v8443_v5 = vmul.u32.u64.high 2863311531, %v8411_v12, %v8442_v2  ;;  %v8447_v15 = vadd.s32 24, %v8371_v47 }
 0x27e   : > { %6631 = vmatmul.mubr.msk.f32.gmra.mrb[34].mxu0 %vm1707_vm5, %v1697_v17  ;;  %v8348_v17 = vadd.s32 88, %v8276_v33  ;;  %v8413_v21 = vsub.s32 %v508_v63, %v591_v19  ;;  %vm941_vm5 = vcmp.ne.s32.totalorder %v8371_v47, 0  ;;  %v656_v19 = vshrl.u32 %v8402_v16, 4 }
 0x27f   : > { %v8436_v13 = vsub.s32 %v511_v20, %v624_v3  ;;  %vm8476_vm12 = vmand %vm977_vm6, %vm941_vm5  ;;  %vm978_vm14 = vcmp.lt.s32.totalorder %v8438_v23, 0  ;;  %v8486_v16 = vadd.s32 128, %v8276_v33  ;;  %v635_v56 = vmul.u32 24, %v634_v34 }
 0x280   : > { %v8397_v29 = vmul.u32.u64.low 2863311531, %v8348_v17  ;;  %v8398_v28 = vmul.u32.u64.high 2863311531, %v8348_v17, %v8397_v29  ;;  %vm940_vm7 = vcmp.ne.s32.totalorder %v8413_v21, 0  ;;  %vm976_vm8 = vcmp.lt.s32.totalorder %v8413_v21, 0  ;;  %vm8517_vm6 = vmand %vm978_vm14, %vm942_vm11 }
 0x281   : > { %v8455_v20 = vadd.s32 24, %v8413_v21  ;;  %vm943_vm9 = vcmp.ne.s32.totalorder %v8436_v13, 0  ;;  %vm979_vm10 = vcmp.lt.s32.totalorder %v8436_v13, 0  ;;  %v8466_v3 = vadd.s32 24, %v8436_v13  ;;  %vm8492_vm0 = vmand %vm976_vm8, %vm940_vm7 }
 0x282   : > { %v667_v31 = vshrl.u32 %v8398_v28, 4  ;;  %v8470_v29 = vadd.s32 136, %v8276_v33  ;;  %v8482_v28 = vmul.u32.u64.low 2863311531, %v8451_v14  ;;  %v8483_v10 = vmul.u32.u64.high 2863311531, %v8451_v14, %v8482_v28  ;;  %vm8505_vm5 = vmand %vm979_vm10, %vm943_vm9 }
 0x283   : > { %v10754_v41 = vsel %vm8492_vm0, 4294967295, %v10753_v41  ;;  %v689_v30 = vshrl.u32 %v8425_v8, 4  ;;  %v8498_v2 = vmul.u32.u64.low 2863311531, %v8459_v54  ;;  %v8499_v0 = vmul.u32.u64.high 2863311531, %v8459_v54, %v8498_v2 }
 0x284   : > { %v10755_v28 = vmov 0  ;;  %v8510_v44 = vadd.s32 24, %v8438_v23  ;;  %v668_v63 = vmul.u32 24, %v667_v31  ;;  %v657_v6 = vmul.u32 24, %v656_v19 }
 0x285   : > { %v10756_v28 = vsel %vm8505_vm5, 4294967295, %v10755_v28  ;;  %v8513_v34 = vadd.s32 152, %v8276_v33  ;;  %v10757_v8 = vmov 0  ;;  %v678_v2 = vshrl.u32 %v8443_v5, 4 }
 0x286   : > { %v10758_v8 = vsel %vm8517_vm6, 4294967295, %v10757_v8  ;;  %v8523_v39 = vmul.u32.u64.low 2863311531, %v8470_v29  ;;  %v8524_v7 = vmul.u32.u64.high 2863311531, %v8470_v29, %v8523_v39  ;;  %v8534_v19 = vsub.s32 %v8330_v60, %v646_v57 }
 0x287   : > { %v8537_v1 = vmul.u32.u64.low 2863311531, %v8486_v16  ;;  %v8538_v61 = vmul.u32.u64.high 2863311531, %v8486_v16, %v8537_v1  ;;  %v8549_v58 = vsub.s32 %v8341_v59, %v635_v56  ;;  %v690_v31 = vmul.u32 24, %v689_v30 }
 0x288   : > { %v8556_v1 = vsub.s32 %v8348_v17, %v668_v63  ;;  %v8559_v57 = vmul.u32.u64.low 2863311531, %v8513_v34  ;;  %v8560_v39 = vmul.u32.u64.high 2863311531, %v8513_v34, %v8559_v57  ;;  %v8563_v55 = vsub.s32 %v8351_v18, %v657_v6 }
 0x289   : > { %v679_v5 = vmul.u32 24, %v678_v2  ;;  %v8566_v59 = vmul.u32.u64.low 2863311531, %v8527_v4  ;;  %v8567_v56 = vmul.u32.u64.high 2863311531, %v8527_v4, %v8566_v59  ;;  %vm945_vm7 = vcmp.ne.s32.totalorder %v8534_v19, 0 }
 0x28a   : > { %vm981_vm8 = vcmp.lt.s32.totalorder %v8534_v19, 0  ;;  %v8572_v30 = vadd.s32 24, %v8534_v19  ;;  %v711_v17 = vshrl.u32 %v8483_v10, 4  ;;  %vm944_vm9 = vcmp.ne.s32.totalorder %v8549_v58, 0 }
 0x28b   : > { %vm980_vm10 = vcmp.lt.s32.totalorder %v8549_v58, 0  ;;  %v8578_v18 = vsub.s32 %v8386_v27, %v690_v31  ;;  %v700_v6 = vshrl.u32 %v8499_v0, 4  ;;  %v8582_v63 = vadd.s32 24, %v8549_v58  ;;  %vm8601_vm1 = vmand %vm981_vm8, %vm945_vm7 }
 0x28c   : > { %vm947_vm11 = vcmp.ne.s32.totalorder %v8556_v1, 0  ;;  %v8587_v2 = vadd.s32 168, %v8276_v33  ;;  %v8590_v10 = vadd.s32 24, %v8556_v1  ;;  %v8594_v27 = vsub.s32 %v8411_v12, %v679_v5  ;;  %vm8614_vm2 = vmand %vm980_vm10, %vm944_vm9 }
 0x28d   : > { %v733_v0 = vshrl.u32 %v8524_v7, 4  ;;  %vm982_vm14 = vcmp.lt.s32.totalorder %v8563_v55, 0  ;;  %v8607_v57 = vadd.s32 24, %v8563_v55  ;;  %v712_v59 = vmul.u32 24, %v711_v17 }
 0x28e   : > { %10759 = vst [vmem:[#allocation27_spill] sm:$0xff] %v8594_v27  ;;  %v722_v60 = vshrl.u32 %v8538_v61, 4  ;;  %vm949_vm7 = vcmp.ne.s32.totalorder %v8578_v18, 0  ;;  %vm985_vm8 = vcmp.lt.s32.totalorder %v8578_v18, 0  ;;  %v701_v12 = vmul.u32 24, %v700_v6 }
 0x28f   : > { %v8621_v5 = vadd.s32 160, %v8276_v33  ;;  %vm10764_vm6 = vcmp.lt.s32.totalorder %v8556_v1, 0  ;;  %v10765_v61 = vmov 0  ;;  %v8632_v17 = vadd.s32 24, %v8578_v18  ;;  %vm8652_vm0 = vmand %vm985_vm8, %vm949_vm7 }
 0x290   : > { %vm8627_vm5 = vmand %vm10764_vm6, %vm947_vm11  ;;  %v755_v50 = vshrl.u32 %v8560_v39, 4  ;;  %v8636_v49 = vmul.u32.u64.low 2863311531, %v8587_v2  ;;  %v8637_v46 = vmul.u32.u64.high 2863311531, %v8587_v2, %v8636_v49  ;;  %vm10767_vm9 = vcmp.ne.s32.totalorder %v8563_v55, 0 }
 0x291   : > { %v10766_v61 = vsel %vm8627_vm5, 4294967295, %v10765_v61  ;;  %vm8641_vm10 = vmand %vm982_vm14, %vm10767_vm9  ;;  %v10768_v6 = vmov 0  ;;  %vm948_vm6 = vcmp.ne.s32.totalorder %v8594_v27, 0  ;;  %vm984_vm11 = vcmp.lt.s32.totalorder %v8594_v27, 0 }
 0x292   : > { %v10769_v6 = vsel %vm8641_vm10, 4294967295, %v10768_v6  ;;  %v734_v45 = vmul.u32 24, %v733_v0  ;;  %v744_v42 = vshrl.u32 %v8567_v56, 4  ;;  %v10770_v49 = vmov 0  ;;  %vm8686_vm14 = vmand %vm984_vm11, %vm948_vm6 }
 0x293   : > { %v10771_v49 = vsel %vm8652_vm0, 4294967295, %v10770_v49  ;;  %v8657_v40 = vsub.s32 %v8451_v14, %v712_v59  ;;  %v723_v38 = vmul.u32 24, %v722_v60  ;;  %v8663_v0 = vadd.s32 24, %v8594_v27 }
 0x294   : > { %v8666_v56 = vsub.s32 %v8459_v54, %v701_v12  ;;  %v8669_v35 = vmul.u32.u64.low 2863311531, %v8621_v5  ;;  %v8670_v39 = vmul.u32.u64.high 2863311531, %v8621_v5, %v8669_v35  ;;  %v10774_v59 = vmov 0 }
 0x295   : > { %10772 = vst [vmem:[#allocation28_spill] sm:$0xff] %v8657_v40  ;;  %10773 = vst [vmem:[#allocation29_spill] sm:$0xff] %v8663_v0  ;;  %v10775_v59 = vsel %vm8686_vm14, 4294967295, %v10774_v59  ;;  %v756_v35 = vmul.u32 24, %v755_v50  ;;  %v10777_v12 = vsel %vm8363_vm13, %v8325_v48, %v8311_v11  ;;  %v10778_v14 = vmov 0 }
 0x296   : > { %10776 = vst [vmem:[#allocation30_spill] sm:$0xff] %v10775_v59  ;;  %vm8695_vm7 = vcmp.lt.s32.totalorder %v10777_v12, 16  ;;  %v8704_v60 = vsub.s32 %v8470_v29, %v734_v45  ;;  %v745_v32 = vmul.u32 24, %v744_v42  ;;  %v8707_v50 = vadd.s32 176, %v8276_v33 }
 0x297   : > { %v10779_v14 = vsel %vm8695_vm7, 4294967295, %v10778_v14  ;;  %v10781_v11 = vsel %vm8377_vm15, %v8336_v24, %v8317_v25  ;;  %v10782_v48 = vmov 0  ;;  %vm951_vm8 = vcmp.ne.s32.totalorder %v8657_v40, 0 }
 0x298   : > { %10780 = vst [vmem:[#allocation31_spill] sm:$0xff] %v10779_v14  ;;  %vm8714_vm13 = vcmp.lt.s32.totalorder %v10781_v11, 16  ;;  %v8720_v26 = vsub.s32 %v8486_v16, %v723_v38  ;;  %v8723_v45 = vmul.u32.u64.low 2863311531, %v8660_v36  ;;  %v8724_v42 = vmul.u32.u64.high 2863311531, %v8660_v36, %v8723_v45  ;;  %v8746_v16 = vld [vmem:[%s10642_s3] ss:$0 sm:$0xff] }
 0x299   : > { %v10783_v48 = vsel %vm8714_vm13, 4294967295, %v10782_v48  ;;  %v8732_v25 = vadd.s32 24, %v8657_v40  ;;  %v8737_v38 = vadd.s32 24, %v8666_v56  ;;  %v8740_v24 = vsub.s32 %v8513_v34, %v756_v35 }
 0x29a   : > { %v777_v29 = vshrl.u32 %v8637_v46, 4  ;;  %v10784_v12 = vsel %vm8392_vm3, %v8345_v43, %v8320_v37  ;;  %v10785_v11 = vmov 0  ;;  %v8759_v34 = vsub.s32 %v8527_v4, %v745_v32 }
 0x29b   : > { %vm8753_vm11 = vcmp.lt.s32.totalorder %v10784_v12, 16  ;;  %v8762_v46 = vmul.u32.u64.low 2863311531, %v8707_v50  ;;  %v8763_v35 = vmul.u32.u64.high 2863311531, %v8707_v50, %v8762_v46  ;;  %v10787_v22 = vsel %vm8406_vm4, %v8369_v51, %v8327_v52 }
 0x29c   : > { %v10786_v11 = vsel %vm8753_vm11, 4294967295, %v10785_v11  ;;  %vm8770_vm9 = vcmp.lt.s32.totalorder %v10787_v22, 16  ;;  %v10788_v37 = vmov 0  ;;  %v8776_v43 = vadd.s32 24, %v8704_v60 }
 0x29d   : > { %v10789_v37 = vsel %vm8770_vm9, 4294967295, %v10788_v37  ;;  %v8780_v32 = vadd.s32 200, %v8276_v33  ;;  %v8784_v62 = vadd.s32 24, %v8720_v26  ;;  %v766_v52 = vshrl.u32 %v8670_v39, 4 }
 0x29e   : > { %v8788_v51 = vadd.s32 192, %v8276_v33  ;;  %vm10791_vm4 = vcmp.lt.s32.totalorder %v8657_v40, 0  ;;  %v10792_v46 = vmov 0  ;;  %v778_v22 = vmul.u32 24, %v777_v29 }
 0x29f   : > { %10790 = vst [vmem:[#allocation32_spill] sm:$0xff] %v8780_v32  ;;  %vm8795_vm6 = vmand %vm10791_vm4, %vm951_vm8  ;;  %vm10797_vm8 = vcmp.ne.s32.totalorder %v8666_v56, 0  ;;  %vm10798_vm4 = vcmp.lt.s32.totalorder %v8666_v56, 0  ;;  %v8820_v29 = vadd.s32 24, %v8740_v24  ;;  %vm10811_vm15 = vcmp.lt.s32.totalorder %v8720_v26, 0 }
 0x2a0   : > { %v10793_v46 = vsel %vm8795_vm6, 4294967295, %v10792_v46  ;;  %vm8815_vm0 = vmand %vm10798_vm4, %vm10797_vm8  ;;  %vm10806_vm8 = vcmp.ne.s32.totalorder %v8704_v60, 0  ;;  %vm10807_vm4 = vcmp.lt.s32.totalorder %v8704_v60, 0  ;;  %v10821_v14 = vmov 0 }
 0x2a1   : > { %vm8837_vm5 = vmand %vm10807_vm4, %vm10806_vm8  ;;  %v8855_v0 = vmul.u32.u64.low 2863311531, %v8788_v51  ;;  %v8856_v59 = vmul.u32.u64.high 2863311531, %v8788_v51, %v8855_v0  ;;  %vm10815_vm8 = vcmp.lt.s32.totalorder %v8740_v24, 0  ;;  %v8890_v40 = vadd.s32 24, %v8759_v34 }
 0x2a2   : > { %v8874_v0 = vsub.s32 %v8587_v2, %v778_v22  ;;  %v788_v2 = vshrl.u32 %v8763_v35, 4  ;;  %v10838_v31 = vsel %vm8614_vm2, %v8582_v63, %v8549_v58  ;;  %v10842_v58 = vmov 0 }
 0x30d   : > { %v6581_v4 = vpop.f32.mrb[0].mxu0 }
 0x30e   : > { %v6996_v45 = vadd.f32 %v6581_v4, %v8746_v16  ;;  %v2478_v12 = vpop.f32.mrb[1].mxu0  ;;  %v10794_v4 = vsel %vm8476_vm12, %v8447_v15, %v8371_v47  ;;  %vm10801_vm12 = vnez %v10754_v41 }
 0x30f   : > { %v6997_v39 = vadd.f32 %v8746_v16, %v2478_v12  ;;  %vm8807_vm14 = vcmp.lt.s32.totalorder %v10794_v4, 16  ;;  %v10802_v15 = vsel %vm10801_vm12, %v8455_v20, %v8413_v21  ;;  %v799_v4 = vshrl.u32 %v8724_v42, 4 }
 0x310   : > { %v10796_v53 = vsel %vm8807_vm14, 4294967295, %v10795_v53  ;;  %v2694_v47 = vmax.f32 %v6996_v45, 0.0  ;;  %vm8829_vm10 = vcmp.lt.s32.totalorder %v10802_v15, 16  ;;  %vm10810_vm12 = vcmp.ne.s32.totalorder %v8720_v26, 0 }
 0x311   : > { %v10804_v9 = vsel %vm8829_vm10, 4294967295, %v10803_v9  ;;  %v8843_v45 = vmul.u32.u64.low 2863311531, %v8780_v32  ;;  %v8844_v41 = vmul.u32.u64.high 2863311531, %v8780_v32, %v8843_v45  ;;  %v2693_v27 = vmax.f32 %v6997_v39, 0.0  ;;  %v6584_v21 = vpop.f32.mrb[2].mxu0  ;;  %vm8850_vm3 = vmand %vm10811_vm15, %vm10810_vm12 }
 0x312   : > { %10805 = vst [vmem:[#allocation33_spill] sm:$0xff] %v10804_v9  ;;  %v767_v15 = vmul.u32 24, %v766_v52  ;;  %v2802_v42 = vsel %vm8695_vm7, %v2694_v47, 0.0  ;;  %v6998_v45 = vadd.f32 %v6584_v21, %v8746_v16  ;;  %v2488_v39 = vpop.f32.mrb[3].mxu0  ;;  %vm10814_vm15 = vcmp.ne.s32.totalorder %v8740_v24, 0 }
 0x313   : > { %vm8869_vm4 = vmand %vm10815_vm8, %vm10814_vm15  ;;  %v10816_v52 = vmov 0  ;;  %vm10818_vm12 = vcmask 64512   ;;  %v2801_v47 = vsel %vm8714_vm13, %v2693_v27, 0.0  ;;  %v6999_v21 = vadd.f32 %v8746_v16, %v2488_v39 }
 0x314   : > { %v10817_v52 = vsel %vm8869_vm4, 4294967295, %v10816_v52  ;;  %2838 = vst.msk [vmem:[#allocation3 + $0x10] sm:$0xff] %vm10818_vm12, %v2802_v42  ;;  %vm10819_vm7 = vnez %v10756_v28  ;;  %vm10824_vm15 = vmmov %vm10818_vm12  ;;  %v2696_v22 = vmax.f32 %v6998_v45, 0.0  ;;  %vm10825_vm8 = vnez %v10758_v8 }
 0x315   : > { %v10820_v32 = vsel %vm10819_vm7, %v8466_v3, %v8436_v13  ;;  %2837 = vst.msk [vmem:[#allocation3 + $0x8] sm:$0xff] %vm10824_vm15, %v2801_v47  ;;  %v10826_v28 = vsel %vm10825_vm8, %v8510_v44, %v8438_v23  ;;  %v10827_v27 = vmov 0  ;;  %v1094_v13 = vsel %vm8815_vm0, %v8737_v38, %v8666_v56  ;;  %v6587_v35 = vpop.f32.mrb[4].mxu0 }
 0x316   : > { %vm8885_vm6 = vcmp.lt.s32.totalorder %v10820_v32, 16  ;;  %vm8899_vm12 = vcmp.lt.s32.totalorder %v10826_v28, 16  ;;  %v1097_v3 = vsel %vm8837_vm5, %v8776_v43, %v8704_v60  ;;  %vm10830_vm7 = vcmp.ne.s32.totalorder %v8759_v34, 0  ;;  %v2498_v28 = vpop.f32.mrb[5].mxu0 }
 0x317   : > { %v10822_v14 = vsel %vm8885_vm6, 4294967295, %v10821_v14  ;;  %v10828_v27 = vsel %vm8899_vm12, 4294967295, %v10827_v27  ;;  %vm10831_vm15 = vcmp.lt.s32.totalorder %v8759_v34, 0  ;;  %v10832_v44 = vmov 0 }
 0x318   : > { %10823 = vst [vmem:[#allocation34_spill] sm:$0xff] %v10822_v14  ;;  %10829 = vst [vmem:[#allocation35_spill] sm:$0xff] %v10828_v27  ;;  %v2695_v23 = vmax.f32 %v6999_v21, 0.0  ;;  %v8928_v42 = vsub.s32 %v8621_v5, %v767_v15  ;;  %v800_v45 = vmul.u32 24, %v799_v4  ;;  %v2804_v39 = vsel %vm8753_vm11, %v2696_v22, 0.0 }
 0x319   : > { %vm8919_vm8 = vmand %vm10831_vm15, %vm10830_vm7  ;;  %v7000_v47 = vadd.f32 %v6587_v35, %v8746_v16  ;;  %vm957_vm7 = vcmp.ne.s32.totalorder %v8874_v0, 0  ;;  %vm10834_vm13 = vcmask 64512   ;;  %v7001_v32 = vadd.f32 %v8746_v16, %v2498_v28 }
 0x31a   : > { %v10833_v44 = vsel %vm8919_vm8, 4294967295, %v10832_v44  ;;  %2840 = vst.msk [vmem:[#allocation3 + $0x20] sm:$0xff] %vm10834_vm13, %v2804_v39  ;;  %v2803_v21 = vsel %vm8770_vm9, %v2695_v23, 0.0  ;;  %v10835_v5 = vsel %vm8601_vm1, %v8572_v30, %v8534_v19  ;;  %v789_v22 = vmul.u32 24, %v788_v2 }
 0x31b   : > { %vm8944_vm11 = vcmp.lt.s32.totalorder %v10835_v5, 16  ;;  %2839 = vst.msk [vmem:[#allocation3 + $0x18] sm:$0xff] %vm10834_vm13, %v2803_v21  ;;  %v2698_v23 = vmax.f32 %v7000_v47, 0.0  ;;  %vm8958_vm15 = vcmp.lt.s32.totalorder %v10838_v31, 16  ;;  %v10839_v19 = vmov 0  ;;  %v6590_v47 = vpop.f32.mrb[6].mxu0 }
 0x31c   : > { %v10840_v19 = vsel %vm8958_vm15, 4294967295, %v10839_v19  ;;  %v8963_v30 = vadd.s32 24, %v8874_v0  ;;  %v8966_v35 = vadd.s32 216, %v8276_v33  ;;  %v8969_v2 = vadd.s32 208, %v8276_v33  ;;  %v2508_v5 = vpop.f32.mrb[7].mxu0 }
 0x31d   : > { %v2697_v39 = vmax.f32 %v7001_v32, 0.0  ;;  %vm10841_vm1 = vcmp.lt.s32.totalorder %v8874_v0, 0  ;;  %v8980_v63 = vsub.s32 %v8660_v36, %v800_v45  ;;  %v821_v7 = vshrl.u32 %v8844_v41, 4 }
 0x31e   : > { %vm8975_vm2 = vmand %vm10841_vm1, %vm957_vm7  ;;  %v810_v28 = vshrl.u32 %v8856_v59, 4  ;;  %v2806_v21 = vsel %vm8807_vm14, %v2698_v23, 0.0  ;;  %v7002_v32 = vadd.f32 %v6590_v47, %v8746_v16  ;;  %v7003_v45 = vadd.f32 %v8746_v16, %v2508_v5 }
 0x31f   : > { %v10843_v58 = vsel %vm8975_vm2, 4294967295, %v10842_v58  ;;  %vm10844_vm1 = vmmov %vm10834_vm13  ;;  %v2805_v36 = vsel %vm8829_vm10, %v2697_v39, 0.0  ;;  %vm10845_vm9 = vnez %v10766_v61  ;;  %v10847_v41 = vmov 0 }
 0x320   : > { %2842 = vst.msk [vmem:[#allocation3 + $0x30] sm:$0xff] %vm10844_vm1, %v2806_v21  ;;  %v10846_v59 = vsel %vm10845_vm9, %v8590_v10, %v8556_v1  ;;  %v9003_v23 = vadd.s32 24, %v8928_v42  ;;  %v9006_v31 = vsub.s32 %v8707_v50, %v789_v22  ;;  %2841 = vst.msk [vmem:[#allocation3 + $0x28] sm:$0xff] %vm10844_vm1, %v2805_v36  ;;  %v2700_v39 = vmax.f32 %v7002_v32, 0.0  ;;  %v6593_v21 = vpop.f32.mrb[8].mxu0 }
 0x321   : > { %vm8998_vm14 = vcmp.lt.s32.totalorder %v10846_v59, 16  ;;  %vm10849_vm7 = vnez %v10769_v6  ;;  %v10851_v1 = vmov 0  ;;  %v2699_v47 = vmax.f32 %v7003_v45, 0.0  ;;  %v2518_v5 = vpop.f32.mrb[9].mxu0  ;;  %vm10857_vm2 = vmmov %vm10844_vm1 }
 0x322   : > { %v10848_v41 = vsel %vm8998_vm14, 4294967295, %v10847_v41  ;;  %v10850_v61 = vsel %vm10849_vm7, %v8607_v57, %v8563_v55  ;;  %v9023_v50 = vmul.u32.u64.low 2863311531, %v8966_v35  ;;  %v9024_v22 = vmul.u32.u64.high 2863311531, %v8966_v35, %v9023_v50 }
 0x323   : > { %vm9014_vm13 = vcmp.lt.s32.totalorder %v10850_v61, 16  ;;  %v822_v6 = vmul.u32 24, %v821_v7  ;;  %v811_v32 = vmul.u32 24, %v810_v28  ;;  %v2808_v55 = vsel %vm8885_vm6, %v2700_v39, 0.0  ;;  %v10858_v61 = vld [vmem:[#allocation30_spill] sm:$0xff]  ;;  %v10860_v50 = vld [vmem:[#allocation29_spill] sm:$0xff] }
 0x324   : > { %v10852_v1 = vsel %vm9014_vm13, 4294967295, %v10851_v1  ;;  %v7004_v57 = vadd.f32 %v6593_v21, %v8746_v16  ;;  %v9032_v36 = vadd.s32 232, %v8276_v33  ;;  %2844 = vst.msk [vmem:[#allocation3 + $0x40] sm:$0xff] %vm10844_vm1, %v2808_v55  ;;  %v2807_v45 = vsel %vm8899_vm12, %v2699_v47, 0.0  ;;  %v10861_v47 = vld [vmem:[#allocation27_spill] sm:$0xff] }
 0x325   : > { %v7005_v59 = vadd.f32 %v8746_v16, %v2518_v5  ;;  %vm10853_vm9 = vnez %v10771_v49  ;;  %v10855_v28 = vmov 0  ;;  %vm958_vm7 = vcmp.ne.s32.totalorder %v9006_v31, 0  ;;  %2843 = vst.msk [vmem:[#allocation3 + $0x38] sm:$0xff] %vm10857_vm2, %v2807_v45  ;;  %v6596_v45 = vpop.f32.mrb[10].mxu0 }
 0x326   : > { %v10854_v7 = vsel %vm10853_vm9, %v8632_v17, %v8578_v18  ;;  %v2702_v39 = vmax.f32 %v7004_v57, 0.0  ;;  %vm10859_vm1 = vnez %v10858_v61  ;;  %v10863_v49 = vmov 0  ;;  %v2528_v10 = vpop.f32.mrb[11].mxu0 }
 0x327   : > { %vm9043_vm6 = vcmp.lt.s32.totalorder %v10854_v7, 16  ;;  %v10862_v21 = vsel %vm10859_vm1, %v10860_v50, %v10861_v47  ;;  %vm10865_vm9 = vcmp.ne.s32.totalorder %v8928_v42, 0  ;;  %vm10866_vm8 = vcmp.lt.s32.totalorder %v8928_v42, 0  ;;  %v10873_v50 = vld [vmem:[#allocation32_spill] sm:$0xff] }
 0x328   : > { %v10856_v28 = vsel %vm9043_vm6, 4294967295, %v10855_v28  ;;  %vm9055_vm12 = vcmp.lt.s32.totalorder %v10862_v21, 16  ;;  %vm9063_vm4 = vmand %vm10866_vm8, %vm10865_vm9  ;;  %v9068_v17 = vadd.s32 24, %v8980_v63  ;;  %v2701_v5 = vmax.f32 %v7005_v59, 0.0 }
 0x329   : > { %v10864_v49 = vsel %vm9055_vm12, 4294967295, %v10863_v49  ;;  %v9071_v55 = vmul.u32.u64.low 2863311531, %v8969_v2  ;;  %v9072_v57 = vmul.u32.u64.high 2863311531, %v8969_v2, %v9071_v55  ;;  %vm10869_vm2 = vcmp.ne.s32.totalorder %v8980_v63, 0 }
 0x32a   : > { %vm10870_vm1 = vcmp.lt.s32.totalorder %v8980_v63, 0  ;;  %v9083_v61 = vadd.s32 24, %v9006_v31  ;;  %v9086_v47 = vsub.s32 %v10873_v50, %v822_v6  ;;  %v9089_v21 = vsub.s32 %v8788_v51, %v811_v32 }
 0x32b   : > { %vm9078_vm10 = vmand %vm10870_vm1, %vm10869_vm2  ;;  %v2810_v59 = vsel %vm8944_vm11, %v2702_v39, 0.0  ;;  %v7006_v55 = vadd.f32 %v6596_v45, %v8746_v16  ;;  %vm10874_vm8 = vcmp.lt.s32.totalorder %v9006_v31, 0  ;;  %vm10877_vm2 = vcmask 64512   ;;  %v10879_v39 = vld [vmem:[#allocation28_spill] sm:$0xff] }
 0x32c   : > { %vm9098_vm9 = vmand %vm10874_vm8, %vm958_vm7  ;;  %v9103_v6 = vmul.u32.u64.low 2863311531, %v9032_v36  ;;  %v9104_v50 = vmul.u32.u64.high 2863311531, %v9032_v36, %v9103_v6  ;;  %2846 = vst.msk [vmem:[#allocation3 + $0x50] sm:$0xff] %vm10877_vm2, %v2810_v59  ;;  %v2809_v51 = vsel %vm8958_vm15, %v2701_v5, 0.0  ;;  %v7007_v32 = vadd.f32 %v8746_v16, %v2528_v10 }
 0x32d   : > { %vm10878_vm1 = vnez %v10793_v46  ;;  %v9124_v59 = vadd.s32 224, %v8276_v33  ;;  %vm10883_vm8 = vmmov %vm10877_vm2  ;;  %v2704_v10 = vmax.f32 %v7006_v55, 0.0  ;;  %vm9132_vm2 = vcmp.lt.s32.totalorder %v1094_v13, 16 }
 0x32e   : > { %v10880_v45 = vsel %vm10878_vm1, %v8732_v25, %v10879_v39  ;;  %2845 = vst.msk [vmem:[#allocation3 + $0x48] sm:$0xff] %vm10883_vm8, %v2809_v51  ;;  %v843_v5 = vshrl.u32 %v9024_v22, 4  ;;  %v9142_v39 = vadd.s32 248, %v8276_v33  ;;  %v2703_v55 = vmax.f32 %v7007_v32, 0.0  ;;  %v6599_v51 = vpop.f32.mrb[12].mxu0  ;;  %vm10886_vm15 = vmmov %vm10883_vm8 }
 0x32f   : > { %vm9115_vm7 = vcmp.lt.s32.totalorder %v10880_v45, 16  ;;  %vm961_vm0 = vcmp.ne.s32.totalorder %v9086_v47, 0  ;;  %v2812_v54 = vsel %vm8998_vm14, %v2704_v10, 0.0  ;;  %v7008_v38 = vadd.f32 %v6599_v51, %v8746_v16  ;;  %v2538_v13 = vpop.f32.mrb[13].mxu0 }
 0x330   : > { %v9154_v22 = vadd.s32 24, %v9086_v47  ;;  %2848 = vst.msk [vmem:[#allocation3 + $0x60] sm:$0xff] %vm10886_vm15, %v2812_v54  ;;  %v2811_v32 = vsel %vm9014_vm13, %v2703_v55, 0.0  ;;  %v7009_v45 = vadd.f32 %v8746_v16, %v2538_v13  ;;  %vm9166_vm1 = vcmp.lt.s32.totalorder %v1097_v3, 16  ;;  %v6602_v13 = vpop.f32.mrb[14].mxu0 }
 0x331   : > { %v10887_v10 = vmov 0  ;;  %v9171_v51 = vmul.u32.u64.low 2863311531, %v9124_v59  ;;  %v9172_v56 = vmul.u32.u64.high 2863311531, %v9124_v59, %v9171_v51  ;;  %2847 = vst.msk [vmem:[#allocation3 + $0x58] sm:$0xff] %vm10883_vm8, %v2811_v32  ;;  %v2706_v54 = vmax.f32 %v7008_v38, 0.0  ;;  %v2548_v32 = vpop.f32.mrb[15].mxu0 }
 0x332   : > { %v10888_v10 = vsel %vm9166_vm1, 4294967295, %v10887_v10  ;;  %v10889_v55 = vsel %vm8850_vm3, %v8784_v62, %v8720_v26  ;;  %v10890_v12 = vmov 0  ;;  %v844_v60 = vmul.u32 24, %v843_v5 }
 0x333   : > { %vm9180_vm15 = vcmp.lt.s32.totalorder %v10889_v55, 16  ;;  %v832_v43 = vshrl.u32 %v9072_v57, 4  ;;  %v2705_v3 = vmax.f32 %v7009_v45, 0.0  ;;  %vm10892_vm8 = vcmp.lt.s32.totalorder %v9086_v47, 0 }
 0x334   : > { %v10891_v12 = vsel %vm9180_vm15, 4294967295, %v10890_v12  ;;  %vm9190_vm13 = vmand %vm10892_vm8, %vm961_vm0  ;;  %v9195_v26 = vmul.u32.u64.low 2863311531, %v9142_v39  ;;  %v9196_v62 = vmul.u32.u64.high 2863311531, %v9142_v39, %v9195_v26  ;;  %v9199_v38 = vadd.s32 240, %v8276_v33 }
 0x335   : > { %v2814_v57 = vsel %vm9043_vm6, %v2706_v54, 0.0  ;;  %v7010_v5 = vadd.f32 %v6602_v13, %v8746_v16  ;;  %v9205_v45 = vadd.s32 24, %v9089_v21  ;;  %v865_v51 = vshrl.u32 %v9104_v50, 4 }
 0x336   : > { %vm10895_vm3 = vcmask 64512   ;;  %v2813_v55 = vsel %vm9055_vm12, %v2705_v3, 0.0  ;;  %v7011_v26 = vadd.f32 %v8746_v16, %v2548_v32  ;;  %vm10896_vm0 = vnez %v10817_v52 }
 0x337   : > { %2850 = vst.msk [vmem:[#allocation3 + $0x70] sm:$0xff] %vm10895_vm3, %v2814_v57  ;;  %v10897_v54 = vsel %vm10896_vm0, %v8820_v29, %v8740_v24  ;;  %v10898_v13 = vmov 0  ;;  %vm10900_vm5 = vcmp.ne.s32.totalorder %v9089_v21, 0  ;;  %vm10901_vm6 = vcmp.lt.s32.totalorder %v9089_v21, 0  ;;  %2849 = vst.msk [vmem:[#allocation3 + $0x68] sm:$0xff] %vm10895_vm3, %v2813_v55 }
 0x338   : > { %vm9217_vm8 = vcmp.lt.s32.totalorder %v10897_v54, 16  ;;  %vm9225_vm14 = vmand %vm10901_vm6, %vm10900_vm5  ;;  %v9230_v3 = vadd.s32 264, %v8276_v33  ;;  %v9233_v52 = vadd.s32 256, %v8276_v33  ;;  %v2708_v24 = vmax.f32 %v7010_v5, 0.0  ;;  %v6605_v5 = vpop.f32.mrb[16].mxu0 }
 0x339   : > { %v10899_v13 = vsel %vm9217_vm8, 4294967295, %v10898_v13  ;;  %vm10904_vm0 = vnez %v10833_v44  ;;  %v10906_v57 = vmov 0  ;;  %v1105_v32 = vsel %vm9190_vm13, %v9154_v22, %v9086_v47  ;;  %v2558_v20 = vpop.f32.mrb[17].mxu0  ;;  %vm10908_vm6 = vmmov %vm10895_vm3 }
 0x33a   : > { %v10905_v29 = vsel %vm10904_vm0, %v8890_v40, %v8759_v34  ;;  %v9250_v54 = vsub.s32 %v8966_v35, %v844_v60  ;;  %v833_v46 = vmul.u32 24, %v832_v43  ;;  %v2707_v55 = vmax.f32 %v7011_v26, 0.0 }
 0x33b   : > { %vm9241_vm12 = vcmp.lt.s32.totalorder %v10905_v29, 16  ;;  %v9253_v44 = vmul.u32.u64.low 2863311531, %v9199_v38  ;;  %v9254_v6 = vmul.u32.u64.high 2863311531, %v9199_v38, %v9253_v44  ;;  %v9257_v40 = vadd.s32 280, %v8276_v33 }
 0x33c   : > { %v10907_v57 = vsel %vm9241_vm12, 4294967295, %v10906_v57  ;;  %v2816_v34 = vsel %vm9115_vm7, %v2708_v24, 0.0  ;;  %v7012_v29 = vadd.f32 %v6605_v5, %v8746_v16  ;;  %v1104_v35 = vsel %vm9225_vm14, %v9205_v45, %v9089_v21  ;;  %vm10913_vm14 = vmmov %vm10895_vm3 }
 0x33d   : > { %v866_v47 = vmul.u32 24, %v865_v51  ;;  %2852 = vst.msk [vmem:[#allocation3 + $0x80] sm:$0xff] %vm10908_vm6, %v2816_v34  ;;  %v2815_v22 = vsel %vm9132_vm2, %v2707_v55, 0.0  ;;  %v7013_v60 = vadd.f32 %v8746_v16, %v2558_v20  ;;  %vm10909_vm13 = vnez %v10843_v58  ;;  %v6608_v55 = vpop.f32.mrb[18].mxu0 }
 0x33e   : > { %v10910_v43 = vsel %vm10909_vm13, %v8963_v30, %v8874_v0  ;;  %v10911_v26 = vmov 0  ;;  %v9280_v50 = vmul.u32.u64.low 2863311531, %v9230_v3  ;;  %v9281_v21 = vmul.u32.u64.high 2863311531, %v9230_v3, %v9280_v50  ;;  %2851 = vst.msk [vmem:[#allocation3 + $0x78] sm:$0xff] %vm10913_vm14, %v2815_v22  ;;  %v2568_v44 = vpop.f32.mrb[19].mxu0 }
 0x33f   : > { %vm9275_vm5 = vcmp.lt.s32.totalorder %v10910_v43, 16  ;;  %v2710_v45 = vmax.f32 %v7012_v29, 0.0  ;;  %v10914_v51 = vsel %vm9063_vm4, %v9003_v23, %v8928_v42  ;;  %v10915_v58 = vmov 0  ;;  %vm10917_vm4 = vmmov %vm10908_vm6 }
 0x340   : > { %v10912_v26 = vsel %vm9275_vm5, 4294967295, %v10911_v26  ;;  %vm9289_vm3 = vcmp.lt.s32.totalorder %v10914_v51, 16  ;;  %vm963_vm0 = vcmp.ne.s32.totalorder %v9250_v54, 0  ;;  %v9295_v0 = vsub.s32 %v8969_v2, %v833_v46  ;;  %vm10921_vm14 = vmmov %vm10917_vm4 }
 0x341   : > { %v10916_v58 = vsel %vm9289_vm3, 4294967295, %v10915_v58  ;;  %v854_v30 = vshrl.u32 %v9172_v56, 4  ;;  %v2709_v24 = vmax.f32 %v7013_v60, 0.0  ;;  %v9300_v18 = vadd.s32 24, %v9250_v54 }
 0x342   : > { %v887_v42 = vshrl.u32 %v9196_v62, 4  ;;  %v2818_v23 = vsel %vm9166_vm1, %v2710_v45, 0.0  ;;  %v7014_v5 = vadd.f32 %v6608_v55, %v8746_v16  ;;  %v7015_v34 = vadd.f32 %v8746_v16, %v2568_v44 }
 0x343   : > { %v9307_v2 = vmul.u32.u64.low 2863311531, %v9233_v52  ;;  %v9308_v46 = vmul.u32.u64.high 2863311531, %v9233_v52, %v9307_v2  ;;  %2854 = vst.msk [vmem:[#allocation3 + $0x90] sm:$0xff] %vm10917_vm4, %v2818_v23  ;;  %v2817_v56 = vsel %vm9180_vm15, %v2709_v24, 0.0  ;;  %v10918_v62 = vsel %vm9078_vm10, %v9068_v17, %v8980_v63 }
 0x344   : > { %vm9319_vm13 = vcmp.lt.s32.totalorder %v10918_v62, 16  ;;  %v10919_v29 = vmov 0  ;;  %v9324_v20 = vsub.s32 %v9032_v36, %v866_v47  ;;  %v9327_v22 = vadd.s32 272, %v8276_v33  ;;  %2853 = vst.msk [vmem:[#allocation3 + $0x88] sm:$0xff] %vm10921_vm14, %v2817_v56  ;;  %v6611_v33 = vpop.f32.mrb[20].mxu0 }
 0x345   : > { %v10920_v29 = vsel %vm9319_vm13, 4294967295, %v10919_v29  ;;  %v2712_v60 = vmax.f32 %v7014_v5, 0.0  ;;  %v10922_v7 = vsel %vm9098_vm9, %v9083_v61, %v9006_v31  ;;  %v10923_v63 = vmov 0  ;;  %v2578_v45 = vpop.f32.mrb[21].mxu0  ;;  %vm10928_vm9 = vmmov %vm10908_vm6 }
 0x346   : > { %vm9335_vm4 = vcmp.lt.s32.totalorder %v10922_v7, 16  ;;  %vm962_vm10 = vcmp.ne.s32.totalorder %v9295_v0, 0  ;;  %v855_v36 = vmul.u32 24, %v854_v30  ;;  %v2711_v17 = vmax.f32 %v7015_v34, 0.0  ;;  %v6614_v62 = vpop.f32.mrb[22].mxu0 }
 0x347   : > { %v10924_v63 = vsel %vm9335_vm4, 4294967295, %v10923_v63  ;;  %vm10925_vm14 = vcmp.lt.s32.totalorder %v9250_v54, 0  ;;  %v1070_v31 = vadd.s32 24, %v9295_v0  ;;  %v888_v61 = vmul.u32 24, %v887_v42 }
 0x348   : > { %vm9345_vm15 = vmand %vm10925_vm14, %vm963_vm0  ;;  %v876_v47 = vshrl.u32 %v9254_v6, 4  ;;  %v2820_v43 = vsel %vm9217_vm8, %v2712_v60, 0.0  ;;  %v7016_v50 = vadd.f32 %v6611_v33, %v8746_v16  ;;  %v2819_v24 = vsel %vm9241_vm12, %v2711_v17, 0.0  ;;  %v2588_v17 = vpop.f32.mrb[23].mxu0 }
 0x349   : > { %v9355_v51 = vmul.u32.u64.low 2863311531, %v9257_v40  ;;  %v9356_v30 = vmul.u32.u64.high 2863311531, %v9257_v40, %v9355_v51  ;;  %2856 = vst.msk [vmem:[#allocation3 + $0xa0] sm:$0xff] %vm10928_vm9, %v2820_v43  ;;  %v7017_v55 = vadd.f32 %v8746_v16, %v2578_v45  ;;  %vm9362_vm0 = vcmp.lt.s32.totalorder %v1105_v32, 16  ;;  %vm10931_vm14 = vmmov %vm10908_vm6 }
 0x34a   : > { %v10929_v42 = vmov 0  ;;  %v9367_v6 = vmul.u32.u64.low 2863311531, %v9327_v22  ;;  %v9368_v23 = vmul.u32.u64.high 2863311531, %v9327_v22, %v9367_v6  ;;  %2855 = vst.msk [vmem:[#allocation3 + $0x98] sm:$0xff] %vm10931_vm14, %v2819_v24  ;;  %v2714_v5 = vmax.f32 %v7016_v50, 0.0 }
 0x34b   : > { %v10930_v42 = vsel %vm9362_vm0, 4294967295, %v10929_v42  ;;  %vm9371_vm6 = vcmp.lt.s32.totalorder %v1104_v35, 16  ;;  %v10932_v44 = vmov 0  ;;  %v1107_v2 = vsel %vm9345_vm15, %v9300_v18, %v9250_v54 }
 0x34c   : > { %v10933_v44 = vsel %vm9371_vm6, 4294967295, %v10932_v44  ;;  %vm10934_vm9 = vcmp.lt.s32.totalorder %v9295_v0, 0  ;;  %v9388_v56 = vsub.s32 %v9124_v59, %v855_v36  ;;  %v909_v35 = vshrl.u32 %v9281_v21, 4 }
 0x34d   : > { %vm9383_vm12 = vmand %vm10934_vm9, %vm962_vm10  ;;  %v2713_v34 = vmax.f32 %v7017_v55, 0.0  ;;  %v9393_v60 = vsub.s32 %v9142_v39, %v888_v61  ;;  %v877_v54 = vmul.u32 24, %v876_v47  ;;  %v2822_v18 = vsel %vm9275_vm5, %v2714_v5, 0.0  ;;  %v6617_v47 = vpop.f32.mrb[24].mxu0 }
 0x34e   : > { %v7018_v7 = vadd.f32 %v6614_v62, %v8746_v16  ;;  %v898_v59 = vshrl.u32 %v9308_v46, 4  ;;  %vm10937_vm10 = vmmov %vm10931_vm14  ;;  %v7019_v36 = vadd.f32 %v8746_v16, %v2588_v17  ;;  %v1106_v39 = vsel %vm9383_vm12, %v1070_v31, %v9295_v0  ;;  %v2598_v50 = vpop.f32.mrb[25].mxu0 }
 0x34f   : > { %2858 = vst.msk [vmem:[#allocation3 + $0xb0] sm:$0xff] %vm10937_vm10, %v2822_v18  ;;  %v2821_v21 = vsel %vm9289_vm3, %v2713_v34, 0.0  ;;  %v1073_v33 = vadd.s32 24, %v9324_v20  ;;  %vm10938_vm9 = vmmov %vm10937_vm10  ;;  %vm964_vm15 = vcmp.ne.s32.totalorder %v9388_v56, 0  ;;  %v910_v46 = vmul.u32 24, %v909_v35  ;;  %v6620_v62 = vpop.f32.mrb[26].mxu0 }
 0x350   : > { %2857 = vst.msk [vmem:[#allocation3 + $0xa8] sm:$0xff] %vm10938_vm9, %v2821_v21  ;;  %v2716_v15 = vmax.f32 %v7018_v7, 0.0  ;;  %v2715_v61 = vmax.f32 %v7019_v36, 0.0  ;;  %v9414_v43 = vsub.s32 %v9199_v38, %v877_v54  ;;  %v7020_v31 = vadd.f32 %v6617_v47, %v8746_v16  ;;  %vm10943_vm3 = vmmov %vm10937_vm10  ;;  %v2608_v21 = vpop.f32.mrb[27].mxu0 }
 0x351   : > { %vm10939_vm12 = vcmp.ne.s32.totalorder %v9324_v20, 0  ;;  %vm10940_vm9 = vcmp.lt.s32.totalorder %v9324_v20, 0  ;;  %v899_v51 = vmul.u32 24, %v898_v59  ;;  %v931_v24 = vshrl.u32 %v9356_v30, 4 }
 0x352   : > { %v2824_v0 = vsel %vm9319_vm13, %v2716_v15, 0.0  ;;  %vm9423_vm14 = vmand %vm10940_vm9, %vm10939_vm12  ;;  %v2823_v38 = vsel %vm9335_vm4, %v2715_v61, 0.0  ;;  %v7021_v55 = vadd.f32 %v8746_v16, %v2598_v50  ;;  %vm9432_vm10 = vcmp.lt.s32.totalorder %v1107_v2, 16 }
 0x353   : > { %2860 = vst.msk [vmem:[#allocation3 + $0xc0] sm:$0xff] %vm10943_vm3, %v2824_v0  ;;  %v10944_v6 = vmov 0  ;;  %v920_v5 = vshrl.u32 %v9368_v23, 4  ;;  %vm10946_vm12 = vmmov %vm10943_vm3  ;;  %v2718_v32 = vmax.f32 %v7020_v31, 0.0  ;;  %vm9438_vm9 = vcmp.lt.s32.totalorder %v1106_v39, 16  ;;  %v6623_v0 = vpop.f32.mrb[28].mxu0 }
 0x354   : > { %v10945_v6 = vsel %vm9432_vm10, 4294967295, %v10944_v6  ;;  %2859 = vst.msk [vmem:[#allocation3 + $0xb8] sm:$0xff] %vm10946_vm12, %v2823_v38  ;;  %v10947_v35 = vmov 0  ;;  %vm10949_vm3 = vcmp.lt.s32.totalorder %v9388_v56, 0  ;;  %v1072_v2 = vadd.s32 24, %v9388_v56 }
 0x355   : > { %v10948_v35 = vsel %vm9438_vm9, 4294967295, %v10947_v35  ;;  %vm9446_vm4 = vmand %vm10949_vm3, %vm964_vm15  ;;  %v1075_v34 = vadd.s32 24, %v9393_v60  ;;  %v2717_v23 = vmax.f32 %v7021_v55, 0.0  ;;  %v1109_v54 = vsel %vm9423_vm14, %v1073_v33, %v9324_v20 }
 0x356   : > { %vm10952_vm12 = vcmp.ne.s32.totalorder %v9393_v60, 0  ;;  %vm10953_vm13 = vcmp.lt.s32.totalorder %v9393_v60, 0  ;;  %vm966_vm15 = vcmp.ne.s32.totalorder %v9414_v43, 0  ;;  %v9465_v7 = vsub.s32 %v9230_v3, %v910_v46 }
 0x357   : > { %vm9459_vm5 = vmand %vm10953_vm13, %vm10952_vm12  ;;  %v2826_v17 = vsel %vm9362_vm0, %v2718_v32, 0.0  ;;  %v7022_v59 = vadd.f32 %v6620_v62, %v8746_v16  ;;  %v9471_v20 = vsub.s32 %v9233_v52, %v899_v51  ;;  %v932_v36 = vmul.u32 24, %v931_v24  ;;  %v2618_v51 = vpop.f32.mrb[29].mxu0 }
 0x358   : > { %vm10956_vm14 = vcmask 64512   ;;  %v2825_v39 = vsel %vm9371_vm6, %v2717_v23, 0.0  ;;  %v7023_v33 = vadd.f32 %v8746_v16, %v2608_v21  ;;  %vm1002_vm13 = vcmp.lt.s32.totalorder %v9414_v43, 0 }
 0x359   : > { %2862 = vst.msk [vmem:[#allocation3 + $0xd0] sm:$0xff] %vm10956_vm14, %v2826_v17  ;;  %v921_v3 = vmul.u32 24, %v920_v5  ;;  %vm10957_vm3 = vmmov %vm10956_vm14  ;;  %v2720_v15 = vmax.f32 %v7022_v59, 0.0  ;;  %vm9479_vm12 = vcmp.lt.s32.totalorder %v1109_v54, 16  ;;  %v10958_v46 = vmov 0 }
 0x35a   : > { %2861 = vst.msk [vmem:[#allocation3 + $0xc8] sm:$0xff] %vm10957_vm3, %v2825_v39  ;;  %v10959_v46 = vsel %vm9479_vm12, 4294967295, %v10958_v46  ;;  %v1108_v52 = vsel %vm9446_vm4, %v1072_v2, %v9388_v56  ;;  %v1111_v61 = vsel %vm9459_vm5, %v1075_v34, %v9393_v60  ;;  %v2719_v47 = vmax.f32 %v7023_v33, 0.0  ;;  %vm9499_vm4 = vmand %vm1002_vm13, %vm966_vm15  ;;  %v6626_v34 = vpop.f32.mrb[30].mxu0 }
 0x35b   : > { %v1074_v31 = vadd.s32 24, %v9414_v43  ;;  %v2828_v50 = vsel %vm9432_vm10, %v2720_v15, 0.0  ;;  %v7024_v45 = vadd.f32 %v6623_v0, %v8746_v16  ;;  %vm968_vm5 = vcmp.ne.s32.totalorder %v9471_v20, 0  ;;  %vm10962_vm14 = vmmov %vm10957_vm3  ;;  %v2628_v17 = vpop.f32.mrb[31].mxu0 }
 0x35c   : > { %v933_v60 = vsub.s32 %v9257_v40, %v932_v36  ;;  %2864 = vst.msk [vmem:[#allocation3 + $0xe0] sm:$0xff] %vm10962_vm14, %v2828_v50  ;;  %v2827_v24 = vsel %vm9438_vm9, %v2719_v47, 0.0  ;;  %v7025_v38 = vadd.f32 %v8746_v16, %v2618_v51  ;;  %v922_v55 = vsub.s32 %v9327_v22, %v921_v3  ;;  %vm10963_vm10 = vmmov %vm10957_vm3  ;;  %v6629_v15 = vpop.f32.mrb[32].mxu0 }
 0x35d   : > { %2863 = vst.msk [vmem:[#allocation3 + $0xd8] sm:$0xff] %vm10963_vm10, %v2827_v24  ;;  %v2722_v5 = vmax.f32 %v7024_v45, 0.0  ;;  %vm9512_vm15 = vcmp.lt.s32.totalorder %v1108_v52, 16  ;;  %v10964_v32 = vmov 0  ;;  %v1077_v40 = vadd.s32 24, %v9465_v7  ;;  %v2638_v50 = vpop.f32.mrb[33].mxu0 }
 0x35e   : > { %v10965_v32 = vsel %vm9512_vm15, 4294967295, %v10964_v32  ;;  %v2721_v30 = vmax.f32 %v7025_v38, 0.0  ;;  %vm9517_vm13 = vcmp.lt.s32.totalorder %v1111_v61, 16  ;;  %v1110_v23 = vsel %vm9499_vm4, %v1074_v31, %v9414_v43  ;;  %v6632_v38 = vpop.f32.mrb[34].mxu0 }
 0x35f   : > { %10966 = vst [vmem:[#allocation30_spill] sm:$0xff] %v10965_v32  ;;  %vm10969_vm14 = vcmp.ne.s32.totalorder %v9465_v7, 0  ;;  %vm10970_vm10 = vcmp.lt.s32.totalorder %v9465_v7, 0  ;;  %v1076_v62 = vadd.s32 24, %v9471_v20  ;;  %v2830_v54 = vsel %vm9479_vm12, %v2722_v5, 0.0  ;;  %v2648_v2 = vpop.f32.mrb[35].mxu0 }
 0x360   : > { %vm9528_vm3 = vmand %vm10970_vm10, %vm10969_vm14  ;;  %v7026_v18 = vadd.f32 %v6626_v34, %v8746_v16  ;;  %vm10973_vm4 = vcmp.lt.s32.totalorder %v9471_v20, 0  ;;  %vm971_vm14 = vcmp.ne.s32.totalorder %v933_v60, 0  ;;  %vm1007_vm10 = vcmp.lt.s32.totalorder %v933_v60, 0 }
 0x361   : > { %vm9540_vm9 = vmand %vm10973_vm4, %vm968_vm5  ;;  %vm10976_vm6 = vcmask 64512   ;;  %v2829_v59 = vsel %vm9512_vm15, %v2721_v30, 0.0  ;;  %v7027_v21 = vadd.f32 %v8746_v16, %v2628_v17  ;;  %vm970_vm12 = vcmp.ne.s32.totalorder %v922_v55, 0 }
 0x362   : > { %2866 = vst.msk [vmem:[#allocation3 + $0xf0] sm:$0xff] %vm10976_vm6, %v2830_v54  ;;  %vm1006_vm0 = vcmp.lt.s32.totalorder %v922_v55, 0  ;;  %vm10977_vm8 = vmmov %vm10976_vm6  ;;  %v2724_v36 = vmax.f32 %v7026_v18, 0.0  ;;  %vm1146_vm1 = vcmp.lt.s32.totalorder %v1110_v23, 16  ;;  %v1113_v39 = vsel %vm9528_vm3, %v1077_v40, %v9465_v7 }
 0x363   : > { %2865 = vst.msk [vmem:[#allocation3 + $0xe8] sm:$0xff] %vm10977_vm8, %v2829_v59  ;;  %v1079_v33 = vadd.s32 24, %v933_v60  ;;  %v2723_v3 = vmax.f32 %v7027_v21, 0.0  ;;  %v1112_v52 = vsel %vm9540_vm9, %v1076_v62, %v9471_v20  ;;  %vm9556_vm6 = vmand %vm1007_vm10, %vm971_vm14  ;;  %v1078_v47 = vadd.s32 24, %v922_v55 }
 0x364   : > { %v2832_v0 = vsel %vm9517_vm13, %v2724_v36, 0.0  ;;  %v7028_v31 = vadd.f32 %v6629_v15, %v8746_v16  ;;  %vm9564_vm8 = vmand %vm1006_vm0, %vm970_vm12  ;;  %vm10982_vm3 = vcmask 64512   ;;  %vm1149_vm9 = vcmp.lt.s32.totalorder %v1113_v39, 16 }
 0x365   : > { %2868 = vst.msk [vmem:[#allocation3 + $0x100] sm:$0xff] %vm10982_vm3, %v2832_v0  ;;  %v2831_v20 = vsel %vm1146_vm1, %v2723_v3, 0.0  ;;  %v7029_v45 = vadd.f32 %v8746_v16, %v2638_v50  ;;  %vm10983_vm5 = vmmov %vm10982_vm3  ;;  %vm1148_vm4 = vcmp.lt.s32.totalorder %v1112_v52, 16  ;;  %v1115_v56 = vsel %vm9556_vm6, %v1079_v33, %v933_v60 }
 0x366   : > { %2867 = vst.msk [vmem:[#allocation3 + $0xf8] sm:$0xff] %vm10983_vm5, %v2831_v20  ;;  %v2726_v51 = vmax.f32 %v7028_v31, 0.0  ;;  %v1114_v5 = vsel %vm9564_vm8, %v1078_v47, %v922_v55  ;;  %v7030_v30 = vadd.f32 %v6632_v38, %v8746_v16  ;;  %vm10984_vm1 = vmmov %vm10982_vm3  ;;  %vm1151_vm0 = vcmp.lt.s32.totalorder %v1115_v56, 16  ;;  %2876 = sbr.rel (%p5938_p0) target bundleno = 883 (0x373), region = 60 }
 0x367   : > { %v2725_v24 = vmax.f32 %v7029_v45, 0.0  ;;  %v7031_v23 = vadd.f32 %v8746_v16, %v2648_v2  ;;  %vm10985_vm12 = vmmov %vm10984_vm1  ;;  %vm1150_vm13 = vcmp.lt.s32.totalorder %v1114_v5, 16  ;;  %v7534_v54 = vmov (!%p5938_p0), 0.0  }
 0x368   : > { %v2834_v40 = vsel %vm1149_vm9, %v2726_v51, 0.0  ;;  %v2728_v22 = vmax.f32 %v7030_v30, 0.0  ;;  %vm10986_vm14 = vmmov %vm10984_vm1  ;;  %vm10988_vm6 = vcmask (!%p5938_p0), 64512  }
 0x369   : > { %2870 = vst.msk [vmem:[#allocation3 + $0x110] sm:$0xff] %vm10984_vm1, %v2834_v40  ;;  %v2833_v34 = vsel %vm1148_vm4, %v2725_v24, 0.0  ;;  %v2727_v60 = vmax.f32 %v7031_v23, 0.0  ;;  %vm10987_vm10 = vmmov %vm10984_vm1 }
 0x36a   : > { %2869 = vst.msk [vmem:[#allocation3 + $0x108] sm:$0xff] %vm10985_vm12, %v2833_v34  ;;  %v2836_v62 = vsel %vm1151_vm0, %v2728_v22, 0.0  ;;  %vm10989_vm8 = vmmov (!%p5938_p0), %vm10988_vm6 }
 0x36b   : > { %2872 = vst.msk [vmem:[#allocation3 + $0x120] sm:$0xff] %vm10986_vm14, %v2836_v62  ;;  %v2835_v55 = vsel %vm1150_vm13, %v2727_v60, 0.0  ;;  %vm10990_vm3 = vmmov (!%p5938_p0), %vm10988_vm6 }
 0x36c   : > { %2871 = vst.msk [vmem:[#allocation3 + $0x118] sm:$0xff] %vm10987_vm10, %v2835_v55  ;;  %vm10991_vm9 = vmmov (!%p5938_p0), %vm10990_vm3 }
 0x36d   : > { %2877 = vst.msk [vmem:[#allocation3 + $0x8] sm:$0xff] %vm10988_vm6, %v7534_v54  ;;  %vm10992_vm5 = vmmov %vm10990_vm3 }
 0x36e   : > { %2878 = vst.msk [vmem:[#allocation3 + $0x10] sm:$0xff] %vm10989_vm8, %v7534_v54  ;;  %vm10993_vm4 = vmmov %vm10990_vm3 }
 0x36f   : > { %2879 = vst.msk [vmem:[#allocation3 + $0x18] sm:$0xff] %vm10990_vm3, %v7534_v54 }
 0x370   : > { %2880 = vst.msk [vmem:[#allocation3 + $0x20] sm:$0xff] %vm10991_vm9, %v7534_v54 }
 0x371   : > { %2881 = vst.msk [vmem:[#allocation3 + $0x28] sm:$0xff] %vm10992_vm5, %v7534_v54 }
 0x372   : > { %2882 = vst.msk [vmem:[#allocation3 + $0x30] sm:$0xff] %vm10993_vm4, %v7534_v54 }
 0x373 PF: > { %p5939_p1 = scmp.ne.s32.totalorder %s7512_s12, 1 }
 0x374   : > { %v7535_v16 = vmov (!%p5939_p1), 0.0   ;;  %vm10994_vm1 = vcmask (!%p5939_p1), 64512  }
 0x375   : > { %2886 = sbr.rel (%p5939_p1) target bundleno = 892 (0x37c), region = 64  ;;  %2887 = vst.msk [vmem:[#allocation3 + $0xf8] sm:$0xff] (!%p5939_p1), %vm10994_vm1, %v7535_v16  ;;  %vm10995_vm0 = vmmov (!%p5939_p1), %vm10994_vm1 }
 0x376   : > { %2888 = vst.msk [vmem:[#allocation3 + $0x100] sm:$0xff] (!%p5939_p1), %vm10995_vm0, %v7535_v16  ;;  %vm10996_vm12 = vmmov (!%p5939_p1), %vm10995_vm0 }
 0x377   : > { %2889 = vst.msk [vmem:[#allocation3 + $0x108] sm:$0xff] (!%p5939_p1), %vm10996_vm12, %v7535_v16  ;;  %vm10997_vm13 = vmmov (!%p5939_p1), %vm10995_vm0 }
 0x378   : > { %2890 = vst.msk [vmem:[#allocation3 + $0x110] sm:$0xff] (!%p5939_p1), %vm10997_vm13, %v7535_v16  ;;  %vm10998_vm14 = vmmov (!%p5939_p1), %vm10995_vm0 }
 0x379   : > { %2891 = vst.msk [vmem:[#allocation3 + $0x118] sm:$0xff] (!%p5939_p1), %vm10998_vm14, %v7535_v16  ;;  %vm10999_vm10 = vmmov (!%p5939_p1), %vm10995_vm0 }
 0x37a   : > { %2892 = vst.msk [vmem:[#allocation3 + $0x120] sm:$0xff] (!%p5939_p1), %vm10999_vm10, %v7535_v16 }
 0x37c PF: > { %v2976_v18 = vld [vmem:[#allocation3 + $0x61] sm:$0xff]  ;;  %s7536_s17 = smov 16   ;;  %v2977_v43 = vld [vmem:[#allocation3 + $0x69] sm:$0xff]  ;;  %v2943_v21 = vld [vmem:[#allocation3 + $0x78] sm:$0xff]  ;;  %vm3325_vm6 = vcmask 130048   ;;  %vm3372_vm8 = vcmask 195584  }
 0x37d   : > { %v2940_v17 = vld [vmem:[#allocation3 + $0x60] sm:$0xff]  ;;  %3203 = vrot.lane.b32.xlu1 %v2976_v18, %s7536_s17  ;;  %v2941_v59 = vld [vmem:[#allocation3 + $0x68] sm:$0xff]  ;;  %v2942_v36 = vld [vmem:[#allocation3 + $0x70] sm:$0xff]  ;;  %vm11000_vm3 = vcmask 64512  }
 0x37e   : > { %3059 = vrot.lane.b32.xlu0 %v2940_v17, %s7533_s15  ;;  %v2979_v39 = vld [vmem:[#allocation3 + $0x79] sm:$0xff]  ;;  %v2978_v33 = vld [vmem:[#allocation3 + $0x71] sm:$0xff]  ;;  %v2945_v3 = vld [vmem:[#allocation3 + $0x88] sm:$0xff] }
 0x37f   : > { %v2944_v15 = vld [vmem:[#allocation3 + $0x80] sm:$0xff]  ;;  %v2981_v52 = vld [vmem:[#allocation3 + $0x89] sm:$0xff]  ;;  %v5971_v47 = vld [vmem:[%s10643_s4 + $0x18] sm:$0xff] }
 0x380   : > { %v2980_v61 = vld [vmem:[#allocation3 + $0x81] sm:$0xff]  ;;  %v2947_v50 = vld [vmem:[#allocation3 + $0x98] sm:$0xff]  ;;  %v2946_v7 = vld [vmem:[#allocation3 + $0x90] sm:$0xff] }
 0x381   : > { %3205 = vrot.lane.b32.xlu1 %v2977_v43, %s7536_s17  ;;  %v5972_v0 = vld [vmem:[%s10643_s4 + $0x20] sm:$0xff]  ;;  %v9624_v20 = vld [vmem:[%s10643_s4 + $0x28] sm:$0xff]  ;;  %v2982_v51 = vld [vmem:[#allocation3 + $0x91] sm:$0xff] }
 0x382   : > { %3061 = vrot.lane.b32.xlu0 %v2941_v59, %s7533_s15  ;;  %v9618_v31 = vpack.c.bf16 %v5972_v0, %v5971_v47  ;;  %v2983_v45 = vld [vmem:[#allocation3 + $0x99] sm:$0xff]  ;;  %v2949_v56 = vld [vmem:[#allocation3 + $0xa8] sm:$0xff]  ;;  %v2950_v30 = vld [vmem:[#allocation3 + $0xb0] sm:$0xff] }
 0x383   : > { %v2948_v24 = vld [vmem:[#allocation3 + $0xa0] sm:$0xff]  ;;  %v2985_v38 = vld [vmem:[#allocation3 + $0xa9] sm:$0xff]  ;;  %v2951_v40 = vld [vmem:[#allocation3 + $0xb8] sm:$0xff] }
 0x384   : > { %6992 = vmatprep.subr.bf16.mxu1 %v9618_v31  ;;  %v2984_v5 = vld [vmem:[#allocation3 + $0xa1] sm:$0xff]  ;;  %v2987_v2 = vld [vmem:[#allocation3 + $0xb9] sm:$0xff]  ;;  %v2986_v34 = vld [vmem:[#allocation3 + $0xb1] sm:$0xff] }
 0x385   : > { %3065 = vrot.lane.b32.xlu1 %v2943_v21, %s7533_s15  ;;  %6994 = vmatpush3.bf16.msra.mxu1 %v9618_v31  ;;  %v3369_v23 = vld [vmem:[%s10643_s4] sm:$0xff]  ;;  %v3370_v22 = vld [vmem:[%s10643_s4 + $0x8] sm:$0xff]  ;;  %v3371_v54 = vld [vmem:[%s10643_s4 + $0x10] sm:$0xff] }
 0x386   : > { %3063 = vrot.lane.b32.xlu0 %v2942_v36, %s7533_s15  ;;  %6993 = vmatprep.subr.mxu1 %v9624_v20  ;;  %v2953_v60 = vld [vmem:[#allocation3 + $0xc8] sm:$0xff]  ;;  %v2952_v62 = vld [vmem:[#allocation3 + $0xc0] sm:$0xff]  ;;  %v6968_v55 = vpack.c.bf16 %v3370_v22, %v3369_v23  ;;  %v2930_v43 = vld [vmem:[#allocation3 + $0x10] sm:$0xff] }
 0x387   : > { %v2988_v16 = vld [vmem:[#allocation3 + $0xc1] sm:$0xff]  ;;  %v2989_v17 = vld [vmem:[#allocation3 + $0xc9] sm:$0xff]  ;;  %v2966_v36 = vld [vmem:[#allocation3 + $0x11] sm:$0xff] }
 0x388   : > { %6969 = vmatprep.subr.bf16.mxu0 %v6968_v55  ;;  %v2929_v18 = vld [vmem:[#allocation3 + $0x8] sm:$0xff]  ;;  %v2954_v21 = vld [vmem:[#allocation3 + $0xd0] sm:$0xff]  ;;  %v6005_v47 = vld [vmem:[%s10643_s4 + $0x38] sm:$0xff] }
 0x389   : > { %3209 = vrot.lane.b32.xlu1 %v2979_v39, %s7536_s17  ;;  %6995 = vmatpush3.msra.mxu1 %v9624_v20  ;;  %v2965_v59 = vld [vmem:[#allocation3 + $0x9] sm:$0xff]  ;;  %v2955_v39 = vld [vmem:[#allocation3 + $0xd8] sm:$0xff]  ;;  %vm11001_vm9 = vmmov %vm11000_vm3 }
 0x38a   : > { %3207 = vrot.lane.b32.xlu0 %v2978_v33, %s7536_s17  ;;  %6971 = vmatpush3.bf16.msra.mxu0 %v6968_v55  ;;  %v2990_v33 = vld [vmem:[#allocation3 + $0xd1] sm:$0xff]  ;;  %v2971_v55 = vld [vmem:[#allocation3 + $0x39] sm:$0xff]  ;;  %vm11002_vm5 = vmmov %vm11000_vm3 }
 0x38b   : > { %6637 = vmatprep.subr.mxu0 %v3371_v54  ;;  %v2994_v23 = vld [vmem:[#allocation3 + $0xf1] sm:$0xff]  ;;  %vm11003_vm4 = vmmov %vm11000_vm3 }
 0x38c   : > { %v2935_v22 = vld [vmem:[#allocation3 + $0x38] sm:$0xff]  ;;  %vm11004_vm1 = vmmov %vm11000_vm3  ;;  %v2902_v9 = vld [vmem:[#allocation3 + $0x4f] sm:$0xff] }
 0x38d   : > { %3069 = vrot.lane.b32.xlu1 %v2945_v3, %s7533_s15  ;;  %v2931_v3 = vld [vmem:[#allocation3 + $0x18] sm:$0xff]  ;;  %vm11005_vm0 = vmmov %vm11004_vm1 }
 0x38e   : > { %3067 = vrot.lane.b32.xlu0 %v2944_v15, %s7533_s15  ;;  %6638 = vmatpush3.msra.mxu0 %v3371_v54  ;;  %v2991_v15 = vld [vmem:[#allocation3 + $0xd9] sm:$0xff]  ;;  %vm11006_vm12 = vmmov %vm11005_vm0 }
 0x38f   : > { %6973 = vmatprep.subr.bf16.mxu0 %v9618_v31  ;;  %v2960_v54 = vld [vmem:[#allocation3 + $0x100] sm:$0xff]  ;;  %vm11007_vm13 = vmmov %vm11005_vm0 }
 0x390   : > { %vm11008_vm14 = vmmov %vm11005_vm0 }
 0x391   : > { %3213 = vrot.lane.b32.xlu1 %v2981_v52, %s7536_s17  ;;  %v2932_v52 = vld [vmem:[#allocation3 + $0x20] sm:$0xff]  ;;  %vm11009_vm10 = vmmov %vm11005_vm0 }
 0x392   : > { %3211 = vrot.lane.b32.xlu0 %v2980_v61, %s7536_s17  ;;  %v6004_v61 = vld [vmem:[%s10643_s4 + $0x30] sm:$0xff] }
 0x393   : > { %v9671_v0 = vpack.c.bf16 %v6005_v47, %v6004_v61 }
 0x395   : > { %3073 = vrot.lane.b32.xlu1 %v2947_v50, %s7533_s15  ;;  %v2967_v50 = vld [vmem:[#allocation3 + $0x19] sm:$0xff]  ;;  %6977 = vmatprep.subr.bf16.mxu1 %v9671_v0 }
 0x396   : > { %3071 = vrot.lane.b32.xlu0 %v2946_v7, %s7533_s15  ;;  %v2956_v7 = vld [vmem:[#allocation3 + $0xe0] sm:$0xff] }
 0x399   : > { %3217 = vrot.lane.b32.xlu1 %v2983_v45, %s7536_s17  ;;  %v2968_v45 = vld [vmem:[#allocation3 + $0x21] sm:$0xff] }
 0x39a   : > { %3215 = vrot.lane.b32.xlu0 %v2982_v51, %s7536_s17  ;;  %v2957_v51 = vld [vmem:[#allocation3 + $0xe8] sm:$0xff] }
 0x39d   : > { %3077 = vrot.lane.b32.xlu1 %v2949_v56, %s7533_s15  ;;  %v2992_v56 = vld [vmem:[#allocation3 + $0xe1] sm:$0xff] }
 0x39e   : > { %3075 = vrot.lane.b32.xlu0 %v2948_v24, %s7533_s15  ;;  %v2933_v24 = vld [vmem:[#allocation3 + $0x28] sm:$0xff] }
 0x3a1   : > { %3221 = vrot.lane.b32.xlu1 %v2985_v38, %s7536_s17  ;;  %v2993_v38 = vld [vmem:[#allocation3 + $0xe9] sm:$0xff] }
 0x3a2   : > { %3219 = vrot.lane.b32.xlu0 %v2984_v5, %s7536_s17  ;;  %v2934_v5 = vld [vmem:[#allocation3 + $0x30] sm:$0xff] }
 0x3a5   : > { %3081 = vrot.lane.b32.xlu1 %v2951_v40, %s7533_s15  ;;  %v2969_v40 = vld [vmem:[#allocation3 + $0x29] sm:$0xff] }
 0x3a6   : > { %3079 = vrot.lane.b32.xlu0 %v2950_v30, %s7533_s15  ;;  %v2958_v30 = vld [vmem:[#allocation3 + $0xf0] sm:$0xff] }
 0x3a9   : > { %3225 = vrot.lane.b32.xlu1 %v2987_v2, %s7536_s17  ;;  %v2970_v2 = vld [vmem:[#allocation3 + $0x31] sm:$0xff] }
 0x3aa   : > { %3223 = vrot.lane.b32.xlu0 %v2986_v34, %s7536_s17  ;;  %v2959_v34 = vld [vmem:[#allocation3 + $0xf8] sm:$0xff] }
 0x3ad   : > { %3085 = vrot.lane.b32.xlu1 %v2953_v60, %s7533_s15  ;;  %v2995_v60 = vld [vmem:[#allocation3 + $0xf9] sm:$0xff] }
 0x3ae   : > { %3083 = vrot.lane.b32.xlu0 %v2952_v62, %s7533_s15  ;;  %v2936_v62 = vld [vmem:[#allocation3 + $0x40] sm:$0xff] }
 0x3b1   : > { %3037 = vrot.lane.b32.xlu1 %v2929_v18, %s7533_s15  ;;  %v2961_v18 = vld [vmem:[#allocation3 + $0x108] sm:$0xff] }
 0x3b2   : > { %3227 = vrot.lane.b32.xlu0 %v2988_v16, %s7536_s17  ;;  %v2972_v16 = vld [vmem:[#allocation3 + $0x41] sm:$0xff] }
 0x3b5   : > { %3039 = vrot.lane.b32.xlu1 %v2930_v43, %s7533_s15  ;;  %v2996_v43 = vld [vmem:[#allocation3 + $0x101] sm:$0xff] }
 0x3b6   : > { %3229 = vrot.lane.b32.xlu0 %v2989_v17, %s7536_s17  ;;  %v2904_v17 = vld [vmem:[#allocation3 + $0x5f] sm:$0xff] }
 0x3b9   : > { %3087 = vrot.lane.b32.xlu1 %v2954_v21, %s7533_s15 }
 0x3ba   : > { %3181 = vrot.lane.b32.xlu0 %v2965_v59, %s7536_s17  ;;  %v2937_v59 = vld [vmem:[#allocation3 + $0x48] sm:$0xff] }
 0x3bd   : > { %3089 = vrot.lane.b32.xlu1 %v2955_v39, %s7533_s15 }
 0x3be   : > { %3183 = vrot.lane.b32.xlu0 %v2966_v36, %s7536_s17 }
 0x3c1   : > { %3041 = vrot.lane.b32.xlu1 %v2931_v3, %s7533_s15  ;;  %v2905_v3 = vld [vmem:[#allocation3 + $0x67] sm:$0xff] }
 0x3c2   : > { %3231 = vrot.lane.b32.xlu0 %v2990_v33, %s7536_s17 }
 0x3c5   : > { %3043 = vrot.lane.b32.xlu1 %v2932_v52, %s7533_s15  ;;  %v2938_v52 = vld [vmem:[#allocation3 + $0x50] sm:$0xff] }
 0x3c6   : > { %3233 = vrot.lane.b32.xlu0 %v2991_v15, %s7536_s17  ;;  %v2997_v15 = vld [vmem:[#allocation3 + $0x109] sm:$0xff] }
 0x3c9   : > { %3091 = vrot.lane.b32.xlu1 %v2956_v7, %s7533_s15 }
 0x3ca   : > { %3185 = vrot.lane.b32.xlu0 %v2967_v50, %s7536_s17 }
 0x3cd   : > { %3093 = vrot.lane.b32.xlu1 %v2957_v51, %s7533_s15  ;;  %v2973_v51 = vld [vmem:[#allocation3 + $0x49] sm:$0xff] }
 0x3ce   : > { %3187 = vrot.lane.b32.xlu0 %v2968_v45, %s7536_s17  ;;  %v6006_v45 = vld [vmem:[%s10643_s4 + $0x40] sm:$0xff] }
 0x3d1   : > { %3045 = vrot.lane.b32.xlu1 %v2933_v24, %s7533_s15 }
 0x3d2   : > { %3235 = vrot.lane.b32.xlu0 %v2992_v56, %s7536_s17  ;;  %v2974_v56 = vld [vmem:[#allocation3 + $0x51] sm:$0xff] }
 0x3d5   : > { %3047 = vrot.lane.b32.xlu1 %v2934_v5, %s7533_s15  ;;  %v2907_v5 = vld [vmem:[#allocation3 + $0x77] sm:$0xff] }
 0x3d6   : > { %3237 = vrot.lane.b32.xlu0 %v2993_v38, %s7536_s17 }
 0x3d9   : > { %3095 = vrot.lane.b32.xlu1 %v2958_v30, %s7533_s15  ;;  %v2939_v30 = vld [vmem:[#allocation3 + $0x58] sm:$0xff] }
 0x3da   : > { %3189 = vrot.lane.b32.xlu0 %v2969_v40, %s7536_s17  ;;  %v2906_v40 = vld [vmem:[#allocation3 + $0x6f] sm:$0xff] }
 0x3dd   : > { %3097 = vrot.lane.b32.xlu1 %v2959_v34, %s7533_s15 }
 0x3de   : > { %3191 = vrot.lane.b32.xlu0 %v2970_v2, %s7536_s17 }
 0x3e1   : > { %3049 = vrot.lane.b32.xlu1 %v2935_v22, %s7533_s15 }
 0x3e2   : > { %3239 = vrot.lane.b32.xlu0 %v2994_v23, %s7536_s17 }
 0x3e5   : > { %3051 = vrot.lane.b32.xlu1 %v2936_v62, %s7533_s15 }
 0x3e6   : > { %3241 = vrot.lane.b32.xlu0 %v2995_v60, %s7536_s17  ;;  %v2975_v60 = vld [vmem:[#allocation3 + $0x59] sm:$0xff] }
 0x3e9   : > { %3099 = vrot.lane.b32.xlu1 %v2960_v54, %s7533_s15 }
 0x3ea   : > { %3193 = vrot.lane.b32.xlu0 %v2971_v55, %s7536_s17  ;;  %v2962_v55 = vld [vmem:[#allocation3 + $0x110] sm:$0xff] }
 0x3ed   : > { %3101 = vrot.lane.b32.xlu1 %v2961_v18, %s7533_s15  ;;  %v2998_v18 = vld [vmem:[#allocation3 + $0x111] sm:$0xff] }
 0x3ee   : > { %3195 = vrot.lane.b32.xlu0 %v2972_v16, %s7536_s17 }
 0x3ef   : > { %v3204_v21 = vpop.permute.xlu1 %3203 }
 0x3f0   : > { %v3060_v36 = vpop.permute.xlu0 %3059 }
 0x3f1   : > { %v3300_v39 = vsel %vm11000_vm3, %v2904_v17, %v3060_v36  ;;  %3053 = vrot.lane.b32.xlu1 %v2937_v59, %s7533_s15  ;;  %v2909_v17 = vld [vmem:[#allocation3 + $0x87] sm:$0xff]  ;;  %v2963_v59 = vld [vmem:[#allocation3 + $0x118] sm:$0xff]  ;;  %vm11010_vm3 = vmmov %vm11005_vm0 }
 0x3f2   : > { %3243 = vrot.lane.b32.xlu0 %v2996_v43, %s7536_s17  ;;  %v9698_v33 = vsel %vm3325_vm6, %v3300_v39, %v3204_v21  ;;  %v2908_v43 = vld [vmem:[#allocation3 + $0x7f] sm:$0xff] }
 0x3f3   : > { %6702 = vmatprep.mubr.msk.f32.mxu1 %vm3372_vm8, %v9698_v33  ;;  %v3206_v61 = vpop.permute.xlu1 %3205 }
 0x3f4   : > { %v3062_v47 = vpop.permute.xlu0 %3061 }
 0x3f5   : > { %v3301_v50 = vsel %vm11001_vm9, %v2905_v3, %v3062_v47  ;;  %3055 = vrot.lane.b32.xlu1 %v2938_v52, %s7533_s15  ;;  %v2999_v47 = vld [vmem:[#allocation3 + $0x119] sm:$0xff]  ;;  %vm11011_vm9 = vmmov %vm11005_vm0 }
 0x3f6   : > { %v9704_v7 = vsel %vm3325_vm6, %v3301_v50, %v3206_v61  ;;  %3245 = vrot.lane.b32.xlu0 %v2997_v15, %s7536_s17  ;;  %v2964_v15 = vld [vmem:[#allocation3 + $0x120] sm:$0xff] }
 0x3f7   : > { %6703 = vmatmul.mubr.msk.f32.vlgmr.msra.gmra.mrb[0].mxu1 %vm3372_vm8, %v9704_v7  ;;  %v3066_v24 = vpop.permute.xlu1 %3065 }
 0x3f8   : > { %v3064_v38 = vpop.permute.xlu0 %3063  ;;  %6979 = vmatpush3.bf16.msra.mxu1 %v9671_v0  ;;  %v3303_v2 = vsel %vm11002_vm5, %v2907_v5, %v3066_v24  ;;  %v2910_v24 = vld [vmem:[#allocation3 + $0x8f] sm:$0xff]  ;;  %vm11012_vm5 = vmmov %vm11005_vm0 }
 0x3f9   : > { %6739 = vmatprep.subr.mxu1 %v6006_v45  ;;  %3199 = vrot.lane.b32.xlu1 %v2974_v56, %s7536_s17  ;;  %v3302_v34 = vsel %vm11003_vm4, %v2906_v40, %v3064_v38  ;;  %v2911_v56 = vld [vmem:[#allocation3 + $0x97] sm:$0xff]  ;;  %vm11013_vm4 = vmmov %vm11005_vm0 }
 0x3fa   : > { %3197 = vrot.lane.b32.xlu0 %v2973_v51, %s7536_s17  ;;  %v3000_v51 = vld [vmem:[#allocation3 + $0x121] sm:$0xff] }
 0x3fb   : > { %v3210_v23 = vpop.permute.xlu1 %3209 }
 0x3fc   : > { %v3208_v22 = vpop.permute.xlu0 %3207  ;;  %6740 = vmatpush3.msra.mxu1 %v6006_v45  ;;  %v9719_v62 = vsel %vm3325_vm6, %v3303_v2, %v3210_v23 }
 0x3fd   : > { %v9722_v0 = vsel %vm3325_vm6, %v3302_v34, %v3208_v22  ;;  %3201 = vrot.lane.b32.xlu1 %v2975_v60, %s7536_s17  ;;  %v2913_v60 = vld [vmem:[#allocation3 + $0xa7] sm:$0xff] }
 0x3fe   : > { %3057 = vrot.lane.b32.xlu0 %v2939_v30, %s7533_s15  ;;  %6705 = vmatprep.mubr.msk.f32.mxu1 %vm3372_vm8, %v9722_v0 }
 0x3ff   : > { %6706 = vmatmul.mubr.msk.f32.gmra.mrb[2].mxu1 %vm3372_vm8, %v9719_v62  ;;  %v3070_v54 = vpop.permute.xlu1 %3069 }
 0x400   : > { %v3068_v16 = vpop.permute.xlu0 %3067  ;;  %v3305_v21 = vsel %vm11004_vm1, %v2909_v17, %v3070_v54  ;;  %vm11014_vm1 = vmmov %vm11005_vm0 }
 0x401   : > { %3247 = vrot.lane.b32.xlu1 %v2998_v18, %s7536_s17  ;;  %v3304_v36 = vsel %vm11005_vm0, %v2908_v43, %v3068_v16 }
 0x402   : > { %3103 = vrot.lane.b32.xlu0 %v2962_v55, %s7533_s15  ;;  %v2912_v55 = vld [vmem:[#allocation3 + $0x9f] sm:$0xff] }
 0x403   : > { %v3214_v39 = vpop.permute.xlu1 %3213 }
 0x404   : > { %v3212_v3 = vpop.permute.xlu0 %3211  ;;  %v9735_v52 = vsel %vm3325_vm6, %v3305_v21, %v3214_v39  ;;  %v2915_v39 = vld [vmem:[#allocation3 + $0xb7] sm:$0xff] }
 0x405   : > { %v9738_v61 = vsel %vm3325_vm6, %v3304_v36, %v3212_v3  ;;  %3107 = vrot.lane.b32.xlu1 %v2964_v15, %s7533_s15  ;;  %v2914_v3 = vld [vmem:[#allocation3 + $0xaf] sm:$0xff] }
 0x406   : > { %6708 = vmatprep.mubr.msk.f32.mxu1 %vm3372_vm8, %v9738_v61  ;;  %3105 = vrot.lane.b32.xlu0 %v2963_v59, %s7533_s15 }
 0x407   : > { %6709 = vmatmul.mubr.msk.f32.gmra.mrb[4].mxu1 %vm3372_vm8, %v9735_v52  ;;  %v3074_v50 = vpop.permute.xlu1 %3073 }
 0x408   : > { %v3072_v45 = vpop.permute.xlu0 %3071  ;;  %v3307_v38 = vsel %vm11006_vm12, %v2911_v56, %v3074_v50  ;;  %vm11015_vm12 = vmmov %vm11005_vm0 }
 0x409   : > { %3251 = vrot.lane.b32.xlu1 %v3000_v51, %s7536_s17  ;;  %v3306_v5 = vsel %vm11007_vm13, %v2910_v24, %v3072_v45  ;;  %vm11016_vm13 = vmmov %vm11005_vm0 }
 0x40a   : > { %3249 = vrot.lane.b32.xlu0 %v2999_v47, %s7536_s17 }
 0x40b   : > { %v3218_v40 = vpop.permute.xlu1 %3217 }
 0x40c   : > { %v3216_v30 = vpop.permute.xlu0 %3215  ;;  %v9751_v2 = vsel %vm3325_vm6, %v3307_v38, %v3218_v40 }
 0x40d   : > { %v9754_v34 = vsel %vm3325_vm6, %v3306_v5, %v3216_v30  ;;  %v2916_v5 = vld [vmem:[#allocation3 + $0xbf] sm:$0xff] }
 0x40e   : > { %6711 = vmatprep.mubr.msk.f32.mxu1 %vm3372_vm8, %v9754_v34 }
 0x40f   : > { %6712 = vmatmul.mubr.msk.f32.gmra.mrb[6].mxu1 %vm3372_vm8, %v9751_v2  ;;  %v3078_v23 = vpop.permute.xlu1 %3077 }
 0x410   : > { %v3076_v22 = vpop.permute.xlu0 %3075  ;;  %v3309_v54 = vsel %vm11008_vm14, %v2913_v60, %v3078_v23  ;;  %vm11017_vm14 = vmmov %vm11005_vm0 }
 0x411   : > { %v3308_v16 = vsel %vm11009_vm10, %v2912_v55, %v3076_v22  ;;  %v2917_v22 = vld [vmem:[#allocation3 + $0xc7] sm:$0xff]  ;;  %vm11018_vm10 = vmmov %vm11005_vm0 }
 0x413   : > { %v3222_v18 = vpop.permute.xlu1 %3221 }
 0x414   : > { %v3220_v17 = vpop.permute.xlu0 %3219  ;;  %v9763_v43 = vsel %vm3325_vm6, %v3309_v54, %v3222_v18  ;;  %v2893_v18 = vld [vmem:[#allocation3 + $0x7] sm:$0xff] }
 0x415   : > { %v9766_v59 = vsel %vm3325_vm6, %v3308_v16, %v3220_v17 }
 0x416   : > { %6714 = vmatprep.mubr.msk.f32.mxu1 %vm3372_vm8, %v9766_v59 }
 0x417   : > { %6715 = vmatmul.mubr.msk.f32.gmra.mrb[8].mxu1 %vm3372_vm8, %v9763_v43  ;;  %v3082_v21 = vpop.permute.xlu1 %3081 }
 0x418   : > { %v3080_v36 = vpop.permute.xlu0 %3079  ;;  %v3311_v15 = vsel %vm11010_vm3, %v2915_v39, %v3082_v21  ;;  %vm11019_vm3 = vmmov %vm11005_vm0 }
 0x419   : > { %v3310_v47 = vsel %vm11011_vm9, %v2914_v3, %v3080_v36  ;;  %v2894_v3 = vld [vmem:[#allocation3 + $0xf] sm:$0xff]  ;;  %vm11020_vm9 = vmmov %vm11005_vm0 }
 0x41b   : > { %v3226_v50 = vpop.permute.xlu1 %3225 }
 0x41c   : > { %v3224_v45 = vpop.permute.xlu0 %3223  ;;  %v9775_v51 = vsel %vm3325_vm6, %v3311_v15, %v3226_v50 }
 0x41d   : > { %v9778_v56 = vsel %vm3325_vm6, %v3310_v47, %v3224_v45 }
 0x41e   : > { %6717 = vmatprep.mubr.msk.f32.mxu1 %vm3372_vm8, %v9778_v56 }
 0x41f   : > { %6718 = vmatmul.mubr.msk.f32.gmra.mrb[10].mxu1 %vm3372_vm8, %v9775_v51  ;;  %v3086_v24 = vpop.permute.xlu1 %3085 }
 0x420   : > { %v3084_v38 = vpop.permute.xlu0 %3083  ;;  %v3313_v55 = vsel %vm11013_vm4, %v2917_v22, %v3086_v24  ;;  %v2918_v24 = vld [vmem:[#allocation3 + $0xcf] sm:$0xff]  ;;  %vm11022_vm4 = vmmov %vm11005_vm0 }
 0x421   : > { %v3312_v40 = vsel %vm11012_vm5, %v2916_v5, %v3084_v38  ;;  %vm11021_vm5 = vmmov %vm11005_vm0 }
 0x423   : > { %v3038_v23 = vpop.permute.xlu1 %3037 }
 0x424   : > { %v3228_v30 = vpop.permute.xlu0 %3227  ;;  %v3289_v21 = vsel %vm11014_vm1, %v2893_v18, %v3038_v23  ;;  %v2919_v23 = vld [vmem:[#allocation3 + $0xd7] sm:$0xff]  ;;  %vm11023_vm1 = vmmov %vm11005_vm0 }
 0x425   : > { %v9786_v60 = vsel %vm3325_vm6, %v3312_v40, %v3228_v30 }
 0x426   : > { %6720 = vmatprep.mubr.msk.f32.mxu1 %vm3372_vm8, %v9786_v60 }
 0x427   : > { %v3040_v16 = vpop.permute.xlu1 %3039 }
 0x428   : > { %v3230_v54 = vpop.permute.xlu0 %3229  ;;  %v3290_v47 = vsel %vm11005_vm0, %v2894_v3, %v3040_v16  ;;  %v2896_v3 = vld [vmem:[#allocation3 + $0x1f] sm:$0xff] }
 0x429   : > { %v9792_v17 = vsel %vm3325_vm6, %v3313_v55, %v3230_v54 }
 0x42a   : > { %6721 = vmatmul.mubr.msk.f32.gmra.mrb[12].mxu1 %vm3372_vm8, %v9792_v17 }
 0x42b   : > { %v3088_v39 = vpop.permute.xlu1 %3087 }
 0x42c   : > { %v3182_v36 = vpop.permute.xlu0 %3181  ;;  %v3314_v5 = vsel %vm11015_vm12, %v2918_v24, %v3088_v39  ;;  %vm11024_vm12 = vmmov %vm11005_vm0 }
 0x42d   : > { %v3326_v15 = vsel %vm3325_vm6, %v3289_v21, %v3182_v36 }
 0x42e   : > { %6639 = vmatprep.mubr.msk.f32.mxu0 %vm3372_vm8, %v3326_v15 }
 0x42f   : > { %v3090_v45 = vpop.permute.xlu1 %3089 }
 0x430   : > { %v3184_v50 = vpop.permute.xlu0 %3183  ;;  %v3315_v55 = vsel %vm11016_vm13, %v2919_v23, %v3090_v45  ;;  %v2920_v45 = vld [vmem:[#allocation3 + $0xdf] sm:$0xff]  ;;  %vm11025_vm13 = vmmov %vm11005_vm0 }
 0x431   : > { %v3327_v38 = vsel %vm3325_vm6, %v3290_v47, %v3184_v50 }
 0x432   : > { %6640 = vmatmul.mubr.msk.f32.vlgmr.msra.gmra.mrb[36].mxu0 %vm3372_vm8, %v3327_v38 }
 0x433   : > { %6975 = vmatpush3.bf16.msra.mxu0 %v9618_v31  ;;  %v3042_v30 = vpop.permute.xlu1 %3041  ;;  %v2895_v31 = vld [vmem:[#allocation3 + $0x17] sm:$0xff] }
 0x434   : > { %v3232_v40 = vpop.permute.xlu0 %3231  ;;  %6688 = vmatprep.subr.mxu0 %v9624_v20  ;;  %v3291_v21 = vsel %vm11017_vm14, %v2895_v31, %v3042_v30  ;;  %v2921_v30 = vld [vmem:[#allocation3 + $0xe7] sm:$0xff]  ;;  %vm11026_vm14 = vmmov %vm11005_vm0 }
 0x435   : > { %v9806_v22 = vsel %vm3325_vm6, %v3314_v5, %v3232_v40  ;;  %v2897_v31 = vld [vmem:[#allocation3 + $0x27] sm:$0xff] }
 0x436   : > { %6723 = vmatprep.mubr.msk.f32.mxu1 %vm3372_vm8, %v9806_v22 }
 0x437   : > { %6689 = vmatpush3.msra.mxu0 %v9624_v20  ;;  %v3044_v16 = vpop.permute.xlu1 %3043 }
 0x438   : > { %v3234_v54 = vpop.permute.xlu0 %3233  ;;  %v3292_v20 = vsel %vm11018_vm10, %v2896_v3, %v3044_v16  ;;  %vm11027_vm10 = vmmov %vm11005_vm0 }
 0x439   : > { %v9813_v18 = vsel %vm3325_vm6, %v3315_v55, %v3234_v54 }
 0x43a   : > { %6724 = vmatmul.mubr.msk.f32.gmra.mrb[14].mxu1 %vm3372_vm8, %v9813_v18 }
 0x43b   : > { %v3092_v39 = vpop.permute.xlu1 %3091 }
 0x43c   : > { %v3186_v36 = vpop.permute.xlu0 %3185  ;;  %v3316_v38 = vsel %vm11019_vm3, %v2920_v45, %v3092_v39  ;;  %vm11028_vm3 = vmmov %vm11005_vm0 }
 0x43d   : > { %v3328_v15 = vsel %vm3325_vm6, %v3291_v21, %v3186_v36 }
 0x43e   : > { %6642 = vmatprep.mubr.msk.f32.mxu0 %vm3372_vm8, %v3328_v15  ;;  %v2898_v15 = vld [vmem:[#allocation3 + $0x2f] sm:$0xff] }
 0x43f   : > { %v3094_v50 = vpop.permute.xlu1 %3093 }
 0x440   : > { %v3188_v47 = vpop.permute.xlu0 %3187  ;;  %v3317_v55 = vsel %vm11020_vm9, %v2921_v30, %v3094_v50  ;;  %vm11029_vm9 = vmmov %vm11005_vm0 }
 0x441   : > { %v9822_v24 = vsel %vm3325_vm6, %v3292_v20, %v3188_v47 }
 0x442   : > { %6643 = vmatmul.mubr.msk.f32.gmra.mrb[38].mxu0 %vm3372_vm8, %v9822_v24 }
 0x443   : > { %v3046_v40 = vpop.permute.xlu1 %3045 }
 0x444   : > { %v3236_v5 = vpop.permute.xlu0 %3235  ;;  %v3293_v36 = vsel %vm11021_vm5, %v2897_v31, %v3046_v40  ;;  %vm11030_vm5 = vmmov %vm11005_vm0 }
 0x445   : > { %v9828_v23 = vsel %vm3325_vm6, %v3316_v38, %v3236_v5  ;;  %v2922_v38 = vld [vmem:[#allocation3 + $0xef] sm:$0xff] }
 0x446   : > { %6726 = vmatprep.mubr.msk.f32.mxu1 %vm3372_vm8, %v9828_v23 }
 0x447   : > { %v3048_v16 = vpop.permute.xlu1 %3047 }
 0x448   : > { %v3238_v54 = vpop.permute.xlu0 %3237  ;;  %v3294_v47 = vsel %vm11022_vm4, %v2898_v15, %v3048_v16  ;;  %v2899_v15 = vld [vmem:[#allocation3 + $0x37] sm:$0xff]  ;;  %vm11031_vm4 = vmmov %vm11005_vm0 }
 0x449   : > { %v9834_v21 = vsel %vm3325_vm6, %v3317_v55, %v3238_v54  ;;  %v2923_v54 = vld [vmem:[#allocation3 + $0xf7] sm:$0xff] }
 0x44a   : > { %6727 = vmatmul.mubr.msk.f32.gmra.mrb[16].mxu1 %vm3372_vm8, %v9834_v21 }
 0x44b   : > { %v3096_v3 = vpop.permute.xlu1 %3095 }
 0x44c   : > { %v3190_v39 = vpop.permute.xlu0 %3189  ;;  %v3318_v40 = vsel %vm11023_vm1, %v2922_v38, %v3096_v3  ;;  %vm11032_vm1 = vmmov %vm11005_vm0 }
 0x44d   : > { %v9840_v20 = vsel %vm3325_vm6, %v3293_v36, %v3190_v39 }
 0x44e   : > { %6645 = vmatprep.mubr.msk.f32.mxu0 %vm3372_vm8, %v9840_v20 }
 0x44f   : > { %v3098_v45 = vpop.permute.xlu1 %3097 }
 0x450   : > { %v3192_v50 = vpop.permute.xlu0 %3191  ;;  %v3319_v16 = vsel %vm11005_vm0, %v2923_v54, %v3098_v45 }
 0x451   : > { %v9846_v5 = vsel %vm3325_vm6, %v3294_v47, %v3192_v50 }
 0x452   : > { %6646 = vmatmul.mubr.msk.f32.gmra.mrb[40].mxu0 %vm3372_vm8, %v9846_v5 }
 0x453   : > { %v3050_v55 = vpop.permute.xlu1 %3049 }
 0x454   : > { %v3240_v30 = vpop.permute.xlu0 %3239  ;;  %v3295_v3 = vsel %vm11024_vm12, %v2899_v15, %v3050_v55  ;;  %vm11033_vm12 = vmmov %vm11005_vm0 }
 0x455   : > { %v9852_v31 = vsel %vm3325_vm6, %v3318_v40, %v3240_v30  ;;  %v2900_v40 = vld [vmem:[#allocation3 + $0x3f] sm:$0xff] }
 0x456   : > { %6729 = vmatprep.mubr.msk.f32.mxu1 %vm3372_vm8, %v9852_v31 }
 0x457   : > { %v3052_v39 = vpop.permute.xlu1 %3051 }
 0x458   : > { %v3242_v36 = vpop.permute.xlu0 %3241  ;;  %v3296_v45 = vsel %vm11025_vm13, %v2900_v40, %v3052_v39  ;;  %vm11034_vm13 = vnez %v10840_v19 }
 0x459   : > { %v9858_v47 = vsel %vm3325_vm6, %v3319_v16, %v3242_v36  ;;  %v2924_v16 = vld [vmem:[#allocation3 + $0xff] sm:$0xff] }
 0x45a   : > { %6730 = vmatmul.mubr.msk.f32.gmra.mrb[18].mxu1 %vm3372_vm8, %v9858_v47 }
 0x45b   : > { %v3100_v38 = vpop.permute.xlu1 %3099 }
 0x45c   : > { %v3194_v50 = vpop.permute.xlu0 %3193  ;;  %v3320_v55 = vsel %vm11026_vm14, %v2924_v16, %v3100_v38  ;;  %vm11035_vm14 = vmmov %vm11005_vm0 }
 0x45d   : > { %v9864_v30 = vsel %vm3325_vm6, %v3295_v3, %v3194_v50  ;;  %v2925_v3 = vld [vmem:[#allocation3 + $0x107] sm:$0xff] }
 0x45e   : > { %6648 = vmatprep.mubr.msk.f32.mxu0 %vm3372_vm8, %v9864_v30 }
 0x45f   : > { %v3102_v27 = vpop.permute.xlu1 %3101 }
 0x460   : > { %v3196_v54 = vpop.permute.xlu0 %3195  ;;  %v3321_v39 = vsel %vm11027_vm10, %v2925_v3, %v3102_v27  ;;  %vm11037_vm10 = vmmov %vm11005_vm0 }
 0x461   : > { %v9870_v36 = vsel %vm3325_vm6, %v3296_v45, %v3196_v54  ;;  %v2901_v45 = vld [vmem:[#allocation3 + $0x47] sm:$0xff] }
 0x462   : > { %6649 = vmatmul.mubr.msk.f32.gmra.mrb[42].mxu0 %vm3372_vm8, %v9870_v36 }
 0x463   : > { %v3054_v14 = vpop.permute.xlu1 %3053 }
 0x464   : > { %v3244_v15 = vpop.permute.xlu0 %3243  ;;  %v3297_v38 = vsel %vm11028_vm3, %v2901_v45, %v3054_v14  ;;  %vm11038_vm3 = vnez %v10852_v1 }
 0x465   : > { %v9876_v50 = vsel %vm3325_vm6, %v3320_v55, %v3244_v15 }
 0x466   : > { %6732 = vmatprep.mubr.msk.f32.mxu1 %vm3372_vm8, %v9876_v50 }
 0x467   : > { %v3056_v32 = vpop.permute.xlu1 %3055 }
 0x468   : > { %v3246_v40 = vpop.permute.xlu0 %3245  ;;  %v3298_v16 = vsel %vm11029_vm9, %v2902_v9, %v3056_v32  ;;  %vm11039_vm9 = vmmov %vm11005_vm0 }
 0x469   : > { %v9882_v54 = vsel %vm3325_vm6, %v3321_v39, %v3246_v40  ;;  %v2903_v39 = vld [vmem:[#allocation3 + $0x57] sm:$0xff] }
 0x46a   : > { %6733 = vmatmul.mubr.msk.f32.gmra.mrb[20].mxu1 %vm3372_vm8, %v9882_v54 }
 0x46b   : > { %6741 = vmatprep.mubr.msk.f32.mxu1 %vm3372_vm8, %v9864_v30  ;;  %v3200_v15 = vpop.permute.xlu1 %3199 }
 0x46c   : > { %v3198_v55 = vpop.permute.xlu0 %3197  ;;  %v9894_v3 = vsel %vm3325_vm6, %v3298_v16, %v3200_v15 }
 0x46d   : > { %v9891_v27 = vsel %vm3325_vm6, %v3297_v38, %v3198_v55 }
 0x46e   : > { %6651 = vmatprep.mubr.msk.f32.mxu0 %vm3372_vm8, %v9891_v27  ;;  %6742 = vmatmul.mubr.msk.f32.vlgmr.msra.gmra.mrb[22].mxu1 %vm3372_vm8, %v9870_v36 }
 0x46f   : > { %6652 = vmatmul.mubr.msk.f32.gmra.mrb[44].mxu0 %vm3372_vm8, %v9894_v3  ;;  %6744 = vmatprep.mubr.msk.f32.mxu1 %vm3372_vm8, %v9891_v27  ;;  %v3202_v32 = vpop.permute.xlu1 %3201 }
 0x470   : > { %v3058_v14 = vpop.permute.xlu0 %3057 }
 0x471   : > { %v3299_v9 = vsel %vm11030_vm5, %v2903_v39, %v3058_v14  ;;  %vm11040_vm5 = vnez %v10856_v28 }
 0x472   : > { %v9906_v40 = vsel %vm3325_vm6, %v3299_v9, %v3202_v32  ;;  %6745 = vmatmul.mubr.msk.f32.gmra.mrb[24].mxu1 %vm3372_vm8, %v9894_v3 }
 0x473   : > { %6654 = vmatprep.mubr.msk.f32.mxu0 %vm3372_vm8, %v9906_v40  ;;  %6747 = vmatprep.mubr.msk.f32.mxu1 %vm3372_vm8, %v9906_v40 }
 0x474   : > { %6655 = vmatmul.mubr.msk.f32.gmra.mrb[46].mxu0 %vm3372_vm8, %v9698_v33 }
 0x475   : > { %6657 = vmatprep.mubr.msk.f32.mxu0 %vm3372_vm8, %v9704_v7 }
 0x476   : > { %6748 = vmatmul.mubr.msk.f32.gmra.mrb[26].mxu1 %vm3372_vm8, %v9698_v33  ;;  %v3104_v33 = vpop.permute.xlu0 %3103 }
 0x477   : > { %6750 = vmatprep.mubr.msk.f32.mxu1 %vm3372_vm8, %v9704_v7  ;;  %v3248_v7 = vpop.permute.xlu1 %3247 }
 0x478   : > { %6658 = vmatmul.mubr.msk.f32.gmra.mrb[48].mxu0 %vm3372_vm8, %v9722_v0 }
 0x479   : > { %6660 = vmatprep.mubr.msk.f32.mxu0 %vm3372_vm8, %v9719_v62 }
 0x47a   : > { %6751 = vmatmul.mubr.msk.f32.gmra.mrb[28].mxu1 %vm3372_vm8, %v9722_v0  ;;  %v2926_v0 = vld [vmem:[#allocation3 + $0x10f] sm:$0xff] }
 0x47b   : > { %6753 = vmatprep.mubr.msk.f32.mxu1 %vm3372_vm8, %v9719_v62  ;;  %v3106_v62 = vpop.permute.xlu0 %3105 }
 0x47c   : > { %6661 = vmatmul.mubr.msk.f32.gmra.mrb[50].mxu0 %vm3372_vm8, %v9738_v61 }
 0x47d   : > { %6663 = vmatprep.mubr.msk.f32.mxu0 %vm3372_vm8, %v9735_v52 }
 0x47e   : > { %6754 = vmatmul.mubr.msk.f32.gmra.mrb[0].mxu1 %vm3372_vm8, %v9738_v61  ;;  %v3108_v61 = vpop.permute.xlu1 %3107 }
 0x47f   : > { %6756 = vmatprep.mubr.msk.f32.mxu1 %vm3372_vm8, %v9735_v52  ;;  %v2927_v52 = vld [vmem:[#allocation3 + $0x117] sm:$0xff] }
 0x480   : > { %6664 = vmatmul.mubr.msk.f32.gmra.mrb[52].mxu0 %vm3372_vm8, %v9754_v34 }
 0x481   : > { %6666 = vmatprep.mubr.msk.f32.mxu0 %vm3372_vm8, %v9751_v2 }
 0x482   : > { %6757 = vmatmul.mubr.msk.f32.gmra.mrb[2].mxu1 %vm3372_vm8, %v9754_v34  ;;  %v3323_v34 = vsel %vm11032_vm1, %v2927_v52, %v3106_v62  ;;  %vm11042_vm1 = vnez %v10864_v49 }
 0x483   : > { %6759 = vmatprep.mubr.msk.f32.mxu1 %vm3372_vm8, %v9751_v2  ;;  %v3322_v2 = vsel %vm11031_vm4, %v2926_v0, %v3104_v33  ;;  %vm11041_vm4 = vmmov %vm11005_vm0 }
 0x484   : > { %6667 = vmatmul.mubr.msk.f32.gmra.mrb[54].mxu0 %vm3372_vm8, %v9766_v59 }
 0x485   : > { %6669 = vmatprep.mubr.msk.f32.mxu0 %vm3372_vm8, %v9763_v43 }
 0x486   : > { %6760 = vmatmul.mubr.msk.f32.gmra.mrb[4].mxu1 %vm3372_vm8, %v9766_v59  ;;  %v3250_v59 = vpop.permute.xlu0 %3249 }
 0x487   : > { %6762 = vmatprep.mubr.msk.f32.mxu1 %vm3372_vm8, %v9763_v43  ;;  %v2928_v43 = vld [vmem:[#allocation3 + $0x11f] sm:$0xff] }
 0x488   : > { %6670 = vmatmul.mubr.msk.f32.gmra.mrb[56].mxu0 %vm3372_vm8, %v9778_v56 }
 0x489   : > { %6672 = vmatprep.mubr.msk.f32.mxu0 %vm3372_vm8, %v9775_v51 }
 0x48a   : > { %6763 = vmatmul.mubr.msk.f32.gmra.mrb[6].mxu1 %vm3372_vm8, %v9778_v56  ;;  %v3324_v56 = vsel %vm11005_vm0, %v2928_v43, %v3108_v61 }
 0x48b   : > { %6765 = vmatprep.mubr.msk.f32.mxu1 %vm3372_vm8, %v9775_v51  ;;  %v3359_v51 = vsel %vm3325_vm6, %v3322_v2, %v3248_v7 }
 0x48c   : > { %6673 = vmatmul.mubr.msk.f32.gmra.mrb[58].mxu0 %vm3372_vm8, %v9786_v60 }
 0x48d   : > { %6675 = vmatprep.mubr.msk.f32.mxu0 %vm3372_vm8, %v9792_v17 }
 0x48e   : > { %6766 = vmatmul.mubr.msk.f32.gmra.mrb[8].mxu1 %vm3372_vm8, %v9786_v60  ;;  %v3360_v60 = vsel %vm3325_vm6, %v3323_v34, %v3250_v59 }
 0x48f   : > { %6768 = vmatprep.mubr.msk.f32.mxu1 %vm3372_vm8, %v9792_v17  ;;  %v3252_v17 = vpop.permute.xlu1 %3251 }
 0x490   : > { %6676 = vmatmul.mubr.msk.f32.gmra.mrb[60].mxu0 %vm3372_vm8, %v9806_v22 }
 0x491   : > { %6678 = vmatprep.mubr.msk.f32.mxu0 %vm3372_vm8, %v9813_v18 }
 0x492   : > { %6769 = vmatmul.mubr.msk.f32.gmra.mrb[10].mxu1 %vm3372_vm8, %v9806_v22  ;;  %v3361_v22 = vsel %vm3325_vm6, %v3324_v56, %v3252_v17 }
 0x493   : > { %6771 = vmatprep.mubr.msk.f32.mxu1 %vm3372_vm8, %v9813_v18 }
 0x494   : > { %6679 = vmatmul.mubr.msk.f32.gmra.mrb[62].mxu0 %vm3372_vm8, %v9828_v23 }
 0x495   : > { %6681 = vmatprep.mubr.msk.f32.mxu0 %vm3372_vm8, %v9834_v21 }
 0x496   : > { %6772 = vmatmul.mubr.msk.f32.gmra.mrb[12].mxu1 %vm3372_vm8, %v9828_v23 }
 0x497   : > { %6774 = vmatprep.mubr.msk.f32.mxu1 %vm3372_vm8, %v9834_v21 }
 0x498   : > { %6682 = vmatmul.mubr.msk.f32.gmra.mrb[64].mxu0 %vm3372_vm8, %v9852_v31 }
 0x499   : > { %6690 = vmatprep.mubr.msk.f32.mxu0 %vm3372_vm8, %v9822_v24 }
 0x49a   : > { %6775 = vmatmul.mubr.msk.f32.gmra.mrb[14].mxu1 %vm3372_vm8, %v9852_v31 }
 0x49b   : > { %6777 = vmatprep.mubr.msk.f32.mxu1 %vm3372_vm8, %v9858_v47 }
 0x49c   : > { %6691 = vmatmul.mubr.msk.f32.vlgmr.msra.gmra.mrb[36].mxu0 %vm3372_vm8, %v9840_v20 }
 0x49d   : > { %6693 = vmatprep.mubr.msk.f32.mxu0 %vm3372_vm8, %v9846_v5 }
 0x49e   : > { %6778 = vmatmul.mubr.msk.f32.gmra.mrb[16].mxu1 %vm3372_vm8, %v9876_v50 }
 0x49f   : > { %6780 = vmatprep.mubr.msk.f32.mxu1 %vm3372_vm8, %v9882_v54  ;;  %v10036_v54 = vld [vmem:[%s10644_s5] ss:$0 sm:$0xff] }
 0x4a0   : > { %6694 = vmatmul.mubr.msk.f32.gmra.mrb[38].mxu0 %vm3372_vm8, %v9864_v30 }
 0x4a1   : > { %6696 = vmatprep.mubr.msk.f32.mxu0 %vm3372_vm8, %v9870_v36 }
 0x4a2   : > { %6781 = vmatmul.mubr.msk.f32.gmra.mrb[18].mxu1 %vm3372_vm8, %v3359_v51 }
 0x4a3   : > { %6783 = vmatprep.mubr.msk.f32.mxu1 %vm3372_vm8, %v3360_v60 }
 0x4a4   : > { %6697 = vmatmul.mubr.msk.f32.gmra.mrb[40].mxu0 %vm3372_vm8, %v9891_v27 }
 0x4a5   : > { %6699 = vmatprep.mubr.msk.f32.mxu0 %vm3372_vm8, %v9894_v3 }
 0x4a6   : > { %6784 = vmatmul.mubr.msk.f32.gmra.mrb[20].mxu1 %vm3372_vm8, %v3361_v22 }
 0x4a8   : > { %6700 = vmatmul.mubr.msk.f32.gmra.mrb[42].mxu0 %vm3372_vm8, %v9906_v40 }
 0x541   : > { %v10021_v18 = vpop.f32.mrb[22].mxu1 }
 0x542   : > { %v6653_v24 = vpop.f32.mrb[44].mxu0  ;;  %v10023_v23 = vpop.f32.mrb[23].mxu1 }
 0x543   : > { %v3569_v21 = vpop.f32.mrb[45].mxu0  ;;  %v3687_v15 = vadd.f32 %v6653_v24, %v10036_v54 }
 0x544   : > { %v3686_v3 = vadd.f32 %v10036_v54, %v3569_v21 }
 0x545   : > { %v10025_v20 = vpop.f32.mrb[24].mxu1 }
 0x546   : > { %v10027_v5 = vpop.f32.mrb[25].mxu1 }
 0x547   : > { %v6656_v31 = vpop.f32.mrb[46].mxu0 }
 0x548   : > { %v3579_v47 = vpop.f32.mrb[47].mxu0  ;;  %v3689_v33 = vadd.f32 %v6656_v31, %v10036_v54 }
 0x549   : > { %v10029_v30 = vpop.f32.mrb[26].mxu1  ;;  %v3688_v0 = vadd.f32 %v10036_v54, %v3579_v47 }
 0x54a   : > { %v10031_v36 = vpop.f32.mrb[27].mxu1 }
 0x54b   : > { %v6659_v50 = vpop.f32.mrb[48].mxu0 }
 0x54c   : > { %v3589_v45 = vpop.f32.mrb[49].mxu0  ;;  %v3691_v60 = vadd.f32 %v6659_v50, %v10036_v54 }
 0x54d   : > { %v10038_v38 = vpop.f32.mrb[28].mxu1  ;;  %v3690_v24 = vadd.f32 %v10036_v54, %v3589_v45 }
 0x54e   : > { %v10040_v16 = vpop.f32.mrb[29].mxu1 }
 0x54f   : > { %v6662_v55 = vpop.f32.mrb[50].mxu0 }
 0x550   : > { %v3599_v27 = vpop.f32.mrb[51].mxu0 }
 0x551   : > { %v6755_v39 = vpop.f32.mrb[0].mxu1 }
 0x552   : > { %v7049_v14 = vadd.f32 %v6755_v39, %v3687_v15  ;;  %v4085_v9 = vpop.f32.mrb[1].mxu1  ;;  %v3693_v39 = vadd.f32 %v6662_v55, %v10036_v54 }
 0x553   : > { %v7051_v32 = vadd.f32 %v4085_v9, %v3686_v3  ;;  %v6665_v40 = vpop.f32.mrb[52].mxu0  ;;  %v3692_v9 = vadd.f32 %v10036_v54, %v3599_v27 }
 0x554   : > { %v4233_v7 = vmax.f32 %v7049_v14, 0.0  ;;  %v3609_v62 = vpop.f32.mrb[53].mxu0 }
 0x555   : > { %v4232_v52 = vmax.f32 %v7051_v32, 0.0  ;;  %v6758_v61 = vpop.f32.mrb[2].mxu1 }
 0x556   : > { %v4263_v2 = vsel %vm8944_vm11, %v4233_v7, 0.0  ;;  %v7053_v34 = vadd.f32 %v6758_v61, %v3689_v33  ;;  %v4095_v43 = vpop.f32.mrb[3].mxu1  ;;  %vm11036_vm11 = vnez %v10848_v41  ;;  %v3695_v61 = vadd.f32 %v6665_v40, %v10036_v54 }
 0x557   : > { %4293 = vst.msk [vmem:[#allocation4 + $0x50] sm:$0xff] %vm11033_vm12, %v4263_v2  ;;  %v4262_v59 = vsel %vm11034_vm13, %v4232_v52, 0.0  ;;  %v7055_v51 = vadd.f32 %v4095_v43, %v3688_v0  ;;  %v6668_v56 = vpop.f32.mrb[54].mxu0  ;;  %vm11043_vm12 = vmmov %vm11005_vm0 }
 0x558   : > { %4292 = vst.msk [vmem:[#allocation4 + $0x48] sm:$0xff] %vm11035_vm14, %v4262_v59  ;;  %v4235_v17 = vmax.f32 %v7053_v34, 0.0  ;;  %v3619_v22 = vpop.f32.mrb[55].mxu0  ;;  %v3694_v34 = vadd.f32 %v10036_v54, %v3609_v62  ;;  %vm11044_vm13 = vmmov %vm11005_vm0 }
 0x559   : > { %v4234_v21 = vmax.f32 %v7055_v51, 0.0  ;;  %v6761_v4 = vpop.f32.mrb[4].mxu1  ;;  %vm11046_vm14 = vmmov %vm11005_vm0 }
 0x55a   : > { %v4265_v31 = vsel %vm11036_vm11, %v4235_v17, 0.0  ;;  %v7057_v47 = vadd.f32 %v6761_v4, %v3691_v60  ;;  %v4105_v15 = vpop.f32.mrb[5].mxu1  ;;  %v3696_v4 = vadd.f32 %v10036_v54, %v3619_v22  ;;  %vm11048_vm11 = vmmov %vm11005_vm0 }
 0x55b   : > { %4295 = vst.msk [vmem:[#allocation4 + $0x60] sm:$0xff] %vm11037_vm10, %v4265_v31  ;;  %v4264_v19 = vsel %vm11038_vm3, %v4234_v21, 0.0  ;;  %v7059_v3 = vadd.f32 %v4105_v15, %v3690_v24  ;;  %v6671_v50 = vpop.f32.mrb[56].mxu0  ;;  %v3697_v24 = vadd.f32 %v6668_v56, %v10036_v54  ;;  %vm11049_vm10 = vnez %v10899_v13  ;;  %vm11050_vm3 = vmmov %vm11005_vm0 }
 0x55c   : > { %4294 = vst.msk [vmem:[#allocation4 + $0x58] sm:$0xff] %vm11039_vm9, %v4264_v19  ;;  %v4237_v14 = vmax.f32 %v7057_v47, 0.0  ;;  %v3629_v45 = vpop.f32.mrb[57].mxu0  ;;  %vm11051_vm9 = vnez %v10907_v57 }
 0x55d   : > { %v4236_v32 = vmax.f32 %v7059_v3, 0.0  ;;  %v6764_v41 = vpop.f32.mrb[6].mxu1 }
 0x55e   : > { %v4267_v33 = vsel %vm11040_vm5, %v4237_v14, 0.0  ;;  %v7061_v7 = vadd.f32 %v6764_v41, %v3693_v39  ;;  %v4115_v0 = vpop.f32.mrb[7].mxu1  ;;  %v3699_v39 = vadd.f32 %v6671_v50, %v10036_v54  ;;  %vm11052_vm5 = vmmov %vm11005_vm0 }
 0x55f   : > { %4297 = vst.msk [vmem:[#allocation4 + $0x70] sm:$0xff] %vm11041_vm4, %v4267_v33  ;;  %v4266_v1 = vsel %vm11042_vm1, %v4236_v32, 0.0  ;;  %v7063_v52 = vadd.f32 %v4115_v0, %v3692_v9  ;;  %v6674_v55 = vpop.f32.mrb[58].mxu0  ;;  %v3698_v9 = vadd.f32 %v10036_v54, %v3629_v45  ;;  %vm11053_vm4 = vnez %v10912_v26  ;;  %vm11054_vm1 = vmmov %vm11005_vm0 }
 0x560   : > { %4296 = vst.msk [vmem:[#allocation4 + $0x68] sm:$0xff] %vm11005_vm0, %v4266_v1  ;;  %v4239_v2 = vmax.f32 %v7061_v7, 0.0  ;;  %v3639_v27 = vpop.f32.mrb[59].mxu0  ;;  %v3701_v1 = vadd.f32 %v6674_v55, %v10036_v54  ;;  %vm11055_vm0 = vnez %v10916_v58 }
 0x561   : > { %v4238_v43 = vmax.f32 %v7063_v52, 0.0  ;;  %v6767_v28 = vpop.f32.mrb[8].mxu1 }
 0x562   : > { %v4269_v59 = vsel %vm9115_vm7, %v4239_v2, 0.0  ;;  %v7065_v51 = vadd.f32 %v6767_v28, %v3695_v61  ;;  %v4125_v60 = vpop.f32.mrb[9].mxu1  ;;  %vm11045_vm7 = vnez %v10888_v10  ;;  %v3700_v61 = vadd.f32 %v10036_v54, %v3639_v27 }
 0x563   : > { %4299 = vst.msk [vmem:[#allocation4 + $0x80] sm:$0xff] %vm11043_vm12, %v4269_v59  ;;  %v4268_v49 = vsel %vm9132_vm2, %v4238_v43, 0.0  ;;  %v7067_v17 = vadd.f32 %v4125_v60, %v3694_v34  ;;  %v6677_v40 = vpop.f32.mrb[60].mxu0  ;;  %vm11047_vm2 = vnez %v10891_v12  ;;  %vm11056_vm12 = vmmov %vm11054_vm1 }
 0x564   : > { %4298 = vst.msk [vmem:[#allocation4 + $0x78] sm:$0xff] %vm11044_vm13, %v4268_v49  ;;  %v4241_v21 = vmax.f32 %v7065_v51, 0.0  ;;  %v3649_v62 = vpop.f32.mrb[61].mxu0  ;;  %v3703_v51 = vadd.f32 %v6677_v40, %v10036_v54  ;;  %vm11057_vm13 = vnez %v10920_v29 }
 0x565   : > { %v4240_v31 = vmax.f32 %v7067_v17, 0.0  ;;  %v6770_v8 = vpop.f32.mrb[10].mxu1  ;;  %v3702_v26 = vadd.f32 %v10036_v54, %v3649_v62 }
 0x566   : > { %v4271_v47 = vsel %vm11045_vm7, %v4241_v21, 0.0  ;;  %v7069_v15 = vadd.f32 %v6770_v8, %v3697_v24  ;;  %v4135_v19 = vpop.f32.mrb[11].mxu1  ;;  %vm11058_vm7 = vmmov %vm11054_vm1 }
 0x567   : > { %4301 = vst.msk [vmem:[#allocation4 + $0x90] sm:$0xff] %vm11046_vm14, %v4271_v47  ;;  %v4270_v25 = vsel %vm11047_vm2, %v4240_v31, 0.0  ;;  %v7071_v3 = vadd.f32 %v4135_v19, %v3696_v4  ;;  %v6680_v56 = vpop.f32.mrb[62].mxu0  ;;  %vm11059_vm14 = vnez %v10924_v63  ;;  %vm11060_vm2 = vmmov %vm11054_vm1 }
 0x568   : > { %4300 = vst.msk [vmem:[#allocation4 + $0x88] sm:$0xff] %vm11048_vm11, %v4270_v25  ;;  %v4243_v14 = vmax.f32 %v7069_v15, 0.0  ;;  %v3659_v22 = vpop.f32.mrb[63].mxu0  ;;  %v3705_v19 = vadd.f32 %v6680_v56, %v10036_v54 }
 0x569   : > { %v4242_v32 = vmax.f32 %v7071_v3, 0.0  ;;  %v6773_v10 = vpop.f32.mrb[12].mxu1 }
 0x56a   : > { %v4273_v41 = vsel %vm11049_vm10, %v4243_v14, 0.0  ;;  %v7073_v33 = vadd.f32 %v6773_v10, %v3699_v39  ;;  %v4145_v7 = vpop.f32.mrb[13].mxu1  ;;  %v3704_v39 = vadd.f32 %v10036_v54, %v3659_v22  ;;  %v11061_v10 = vld [vmem:[#allocation31_spill] sm:$0xff]  ;;  %vm11063_vm10 = vnez %v10930_v42 }
 0x56b   : > { %4303 = vst.msk [vmem:[#allocation4 + $0xa0] sm:$0xff] %vm11050_vm3, %v4273_v41  ;;  %v4272_v12 = vsel %vm11051_vm9, %v4242_v32, 0.0  ;;  %v7075_v0 = vadd.f32 %v4145_v7, %v3698_v9  ;;  %v6683_v50 = vpop.f32.mrb[64].mxu0  ;;  %vm11062_vm11 = vnez %v11061_v10  ;;  %vm11064_vm3 = vmmov %vm11054_vm1  ;;  %vm11065_vm9 = vnez %v10783_v48 }
 0x56c   : > { %4302 = vst.msk [vmem:[#allocation4 + $0x98] sm:$0xff] %vm11052_vm5, %v4272_v12  ;;  %v4245_v52 = vmax.f32 %v7073_v33, 0.0  ;;  %v3669_v45 = vpop.f32.mrb[65].mxu0  ;;  %vm11066_vm5 = vmmov %vm11054_vm1  ;;  %v3707_v42 = vadd.f32 %v6683_v50, %v10036_v54 }
 0x56d   : > { %v4244_v2 = vmax.f32 %v7075_v0, 0.0  ;;  %v6776_v13 = vpop.f32.mrb[14].mxu1 }
 0x56e   : > { %v4275_v34 = vsel %vm11053_vm4, %v4245_v52, 0.0  ;;  %v7077_v43 = vadd.f32 %v6776_v13, %v3701_v1  ;;  %v4155_v28 = vpop.f32.mrb[15].mxu1  ;;  %vm11067_vm4 = vnez %v10933_v44  ;;  %v3706_v13 = vadd.f32 %v10036_v54, %v3669_v45 }
 0x56f   : > { %4305 = vst.msk [vmem:[#allocation4 + $0xb0] sm:$0xff] %vm11054_vm1, %v4275_v34  ;;  %v4274_v57 = vsel %vm11055_vm0, %v4244_v2, 0.0  ;;  %v7079_v59 = vadd.f32 %v4155_v28, %v3700_v61  ;;  %v6692_v55 = vpop.f32.mrb[36].mxu0  ;;  %vm11068_vm0 = vmmov %vm11054_vm1 }
 0x570   : > { %4304 = vst.msk [vmem:[#allocation4 + $0xa8] sm:$0xff] %vm11056_vm12, %v4274_v57  ;;  %v4247_v60 = vmax.f32 %v7077_v43, 0.0  ;;  %v7032_v27 = vadd.f32 %v6692_v55, %v10036_v54  ;;  %v3787_v49 = vpop.f32.mrb[37].mxu0  ;;  %vm11069_vm12 = vnez %v10786_v11 }
 0x571   : > { %v4246_v17 = vmax.f32 %v7079_v59, 0.0  ;;  %v7034_v24 = vadd.f32 %v10036_v54, %v3787_v49  ;;  %v6779_v21 = vpop.f32.mrb[16].mxu1 }
 0x572   : > { %v4277_v58 = vsel %vm11057_vm13, %v4247_v60, 0.0  ;;  %v7033_v4 = vadd.f32 %v7032_v27, %v10021_v18  ;;  %v7081_v31 = vadd.f32 %v6779_v21, %v3703_v51  ;;  %v4165_v8 = vpop.f32.mrb[17].mxu1  ;;  %vm11070_vm13 = vnez %v10945_v6 }
 0x573   : > { %4307 = vst.msk [vmem:[#allocation4 + $0xc0] sm:$0xff] %vm11058_vm7, %v4277_v58  ;;  %v4276_v40 = vsel %vm11059_vm14, %v4246_v17, 0.0  ;;  %v7035_v47 = vadd.f32 %v7034_v24, %v10023_v23  ;;  %v7083_v15 = vadd.f32 %v4165_v8, %v3702_v26  ;;  %v6695_v62 = vpop.f32.mrb[38].mxu0  ;;  %vm11071_vm7 = vmmov %vm11068_vm0  ;;  %vm11072_vm14 = vnez %v10789_v37  ;;  %v11080_v58 = vld [vmem:[#allocation33_spill] sm:$0xff] }
 0x574   : > { %4306 = vst.msk [vmem:[#allocation4 + $0xb8] sm:$0xff] %vm11060_vm2, %v4276_v40  ;;  %v4225_v25 = vmax.f32 %v7033_v4, 0.0  ;;  %v4249_v29 = vmax.f32 %v7081_v31, 0.0  ;;  %v7036_v3 = vadd.f32 %v6695_v62, %v10036_v54  ;;  %v3797_v18 = vpop.f32.mrb[39].mxu0  ;;  %vm11073_vm2 = vmmov %vm11068_vm0  ;;  %v11085_v40 = vld [vmem:[#allocation34_spill] sm:$0xff] }
 0x575   : > { %v4224_v14 = vmax.f32 %v7035_v47, 0.0  ;;  %v4248_v9 = vmax.f32 %v7083_v15, 0.0  ;;  %v7038_v63 = vadd.f32 %v10036_v54, %v3797_v18  ;;  %v6782_v32 = vpop.f32.mrb[18].mxu1  ;;  %v11088_v47 = vld [vmem:[#allocation35_spill] sm:$0xff] }
 0x576   : > { %v4255_v23 = vsel %vm11062_vm11, %v4225_v25, 0.0  ;;  %v4279_v56 = vsel %vm11063_vm10, %v4249_v29, 0.0  ;;  %v7037_v41 = vadd.f32 %v7036_v3, %v10025_v20  ;;  %v7085_v33 = vadd.f32 %v6782_v32, %v3705_v19  ;;  %v4175_v7 = vpop.f32.mrb[19].mxu1  ;;  %vm11075_vm10 = vmmov %vm11068_vm0 }
 0x577   : > { %4285 = vst.msk [vmem:[#allocation4 + $0x10] sm:$0xff] %vm11064_vm3, %v4255_v23  ;;  %v4254_v22 = vsel %vm11065_vm9, %v4224_v14, 0.0  ;;  %v4278_v12 = vsel %vm11067_vm4, %v4248_v9, 0.0  ;;  %v7039_v0 = vadd.f32 %v7038_v63, %v10027_v5  ;;  %v7087_v1 = vadd.f32 %v4175_v7, %v3704_v39  ;;  %v6698_v52 = vpop.f32.mrb[40].mxu0  ;;  %vm11076_vm3 = vmmov %vm11068_vm0 }
 0x578   : > { %4309 = vst.msk [vmem:[#allocation4 + $0xd0] sm:$0xff] %vm11066_vm5, %v4279_v56  ;;  %v4227_v20 = vmax.f32 %v7037_v41, 0.0  ;;  %v4251_v61 = vmax.f32 %v7085_v33, 0.0  ;;  %v7040_v48 = vadd.f32 %v6698_v52, %v10036_v54  ;;  %v3807_v2 = vpop.f32.mrb[41].mxu0  ;;  %vm11074_vm11 = vnez %v10948_v35  ;;  %vm11079_vm4 = vmmov %vm11068_vm0 }
 0x579   : > { %4284 = vst.msk [vmem:[#allocation4 + $0x8] sm:$0xff] %vm11054_vm1, %v4254_v22  ;;  %v4226_v34 = vmax.f32 %v7039_v0, 0.0  ;;  %v4250_v44 = vmax.f32 %v7087_v1, 0.0  ;;  %v7042_v43 = vadd.f32 %v10036_v54, %v3807_v2  ;;  %v6785_v5 = vpop.f32.mrb[20].mxu1  ;;  %vm11077_vm9 = vnez %v10796_v53 }
 0x57a   : > { %4308 = vst.msk [vmem:[#allocation4 + $0xc8] sm:$0xff] %vm11068_vm0, %v4278_v12  ;;  %v4257_v28 = vsel %vm11069_vm12, %v4227_v20, 0.0  ;;  %v4281_v50 = vsel %vm11070_vm13, %v4251_v61, 0.0  ;;  %v7041_v57 = vadd.f32 %v7040_v48, %v10029_v30  ;;  %v7089_v59 = vadd.f32 %v6785_v5, %v3707_v42  ;;  %v4185_v55 = vpop.f32.mrb[21].mxu1  ;;  %vm11083_vm12 = vmmov %vm11068_vm0 }
 0x57b   : > { %4287 = vst.msk [vmem:[#allocation4 + $0x20] sm:$0xff] %vm11071_vm7, %v4257_v28  ;;  %v4256_v45 = vsel %vm11072_vm14, %v4226_v34, 0.0  ;;  %v4280_v51 = vsel %vm11074_vm11, %v4250_v44, 0.0  ;;  %v7043_v11 = vadd.f32 %v7042_v43, %v10031_v36  ;;  %v7091_v60 = vadd.f32 %v4185_v55, %v3706_v13  ;;  %v6701_v27 = vpop.f32.mrb[42].mxu0  ;;  %vm11084_vm13 = vmmov %vm11068_vm0 }
 0x57c   : > { %4311 = vst.msk [vmem:[#allocation4 + $0xe0] sm:$0xff] %vm11073_vm2, %v4281_v50  ;;  %v4229_v6 = vmax.f32 %v7041_v57, 0.0  ;;  %v4253_v30 = vmax.f32 %v7089_v59, 0.0  ;;  %v7044_v49 = vadd.f32 %v6701_v27, %v10036_v54  ;;  %v3817_v26 = vpop.f32.mrb[43].mxu0  ;;  %vm11078_vm5 = vnez %v10959_v46  ;;  %vm11087_vm14 = vmmov %vm11068_vm0 }
 0x57d   : > { %4286 = vst.msk [vmem:[#allocation4 + $0x18] sm:$0xff] %vm11075_vm10, %v4256_v45  ;;  %v4228_v37 = vmax.f32 %v7043_v11, 0.0  ;;  %v4252_v17 = vmax.f32 %v7091_v60, 0.0  ;;  %v7046_v24 = vadd.f32 %v10036_v54, %v3817_v26  ;;  %vm11081_vm1 = vnez %v11080_v58  ;;  %vm11090_vm11 = vmmov %vm11068_vm0 }
 0x57e   : > { %4310 = vst.msk [vmem:[#allocation4 + $0xd8] sm:$0xff] %vm11076_vm3, %v4280_v51  ;;  %v4259_v35 = vsel %vm11077_vm9, %v4229_v6, 0.0  ;;  %v4283_v36 = vsel %vm11078_vm5, %v4253_v30, 0.0  ;;  %v7045_v21 = vadd.f32 %v7044_v49, %v10038_v38  ;;  %vm11086_vm7 = vnez %v11085_v40  ;;  %4316 = sbr.rel (%p5938_p0) target bundleno = 1416 (0x588), region = 68 }
 0x57f   : > { %4289 = vst.msk [vmem:[#allocation4 + $0x30] sm:$0xff] %vm11079_vm4, %v4259_v35  ;;  %v4258_v4 = vsel %vm11081_vm1, %v4228_v37, 0.0  ;;  %v4282_v8 = vsel %vm9512_vm15, %v4252_v17, 0.0  ;;  %v7047_v54 = vadd.f32 %v7046_v24, %v10040_v16  ;;  %vm11089_vm2 = vnez %v11088_v47 }
 0x580   : > { %4313 = vst.msk [vmem:[#allocation4 + $0xf0] sm:$0xff] %vm11068_vm0, %v4283_v36  ;;  %v4231_v53 = vmax.f32 %v7045_v21, 0.0  ;;  %v7537_v16 = vmov (!%p5938_p0), 0.0   ;;  %vm11091_vm15 = vcmask (!%p5938_p0), 64512  }
 0x581   : > { %4288 = vst.msk [vmem:[#allocation4 + $0x28] sm:$0xff] %vm11083_vm12, %v4258_v4  ;;  %v4230_v46 = vmax.f32 %v7047_v54, 0.0  ;;  %vm11092_vm10 = vmmov (!%p5938_p0), %vm11091_vm15 }
 0x582   : > { %4312 = vst.msk [vmem:[#allocation4 + $0xe8] sm:$0xff] %vm11084_vm13, %v4282_v8  ;;  %v4261_v38 = vsel %vm11086_vm7, %v4231_v53, 0.0  ;;  %vm11093_vm3 = vmmov (!%p5938_p0), %vm11092_vm10 }
 0x583   : > { %4291 = vst.msk [vmem:[#allocation4 + $0x40] sm:$0xff] %vm11087_vm14, %v4261_v38  ;;  %v4260_v15 = vsel %vm11089_vm2, %v4230_v46, 0.0 }
 0x584   : > { %4290 = vst.msk [vmem:[#allocation4 + $0x38] sm:$0xff] %vm11090_vm11, %v4260_v15 }
 0x585   : > { %4317 = vst.msk [vmem:[#allocation4 + $0x8] sm:$0xff] %vm11091_vm15, %v7537_v16 }
 0x586   : > { %4318 = vst.msk [vmem:[#allocation4 + $0x10] sm:$0xff] %vm11092_vm10, %v7537_v16 }
 0x587   : > { %4319 = vst.msk [vmem:[#allocation4 + $0x18] sm:$0xff] %vm11093_vm3, %v7537_v16 }
 0x588 PF: > { %4322 = sbr.rel (%p5939_p1) target bundleno = 1423 (0x58f), region = 72  ;;  %v7538_v62 = vmov (!%p5939_p1), 0.0   ;;  %vm11094_vm9 = vcmask (!%p5939_p1), 64512  }
 0x589   : > { %4323 = vst.msk [vmem:[#allocation4 + $0xe0] sm:$0xff] (!%p5939_p1), %vm11094_vm9, %v7538_v62  ;;  %vm11095_vm5 = vmmov (!%p5939_p1), %vm11094_vm9 }
 0x58a   : > { %4324 = vst.msk [vmem:[#allocation4 + $0xe8] sm:$0xff] (!%p5939_p1), %vm11095_vm5, %v7538_v62  ;;  %vm11096_vm4 = vmmov (!%p5939_p1), %vm11095_vm5 }
 0x58b   : > { %4325 = vst.msk [vmem:[#allocation4 + $0xf0] sm:$0xff] (!%p5939_p1), %vm11096_vm4, %v7538_v62 }
 0x58f PF: > { %v4386_v19 = vld [vmem:[#allocation4 + $0x9] sm:$0xff]  ;;  %v4387_v29 = vld [vmem:[#allocation4 + $0x11] sm:$0xff]  ;;  %v4359_v18 = vld [vmem:[#allocation4 + $0x20] sm:$0xff]  ;;  %vm11097_vm1 = vcmask 64512   ;;  %s6136_s19 = sshll.u32 %s7516_s13, 1  ;;  %s5716_s21 = sshll.u32 %s370_s28, 4  ;;  %s10584_s21 = int_to_ptr.vmem [resolvable:$true] %s5716_s21 }
 0x590   : > { %v4356_v25 = vld [vmem:[#allocation4 + $0x8] sm:$0xff]  ;;  %4566 = vrot.lane.b32.xlu1 %v4386_v19, %s7536_s17  ;;  %v4357_v3 = vld [vmem:[#allocation4 + $0x10] sm:$0xff]  ;;  %v4358_v39 = vld [vmem:[#allocation4 + $0x18] sm:$0xff]  ;;  %s5712_s20 = sadd.s32 %s7512_s12, %s6136_s19  ;;  %s5701_s25 = scalar_lea.sflag [#allocation6], %s368_s29 }
 0x591   : > { %4446 = vrot.lane.b32.xlu0 %v4356_v25, %s7533_s15  ;;  %v4389_v14 = vld [vmem:[#allocation4 + $0x21] sm:$0xff]  ;;  %v4388_v9 = vld [vmem:[#allocation4 + $0x19] sm:$0xff]  ;;  %v4361_v63 = vld [vmem:[#allocation4 + $0x30] sm:$0xff]  ;;  %s7434_s13 = scalar_lea.vmem %s10584_s21, 128  ;;  %s7539_s12 = smov [#allocation5]  }
 0x592   : > { %v4360_v32 = vld [vmem:[#allocation4 + $0x28] sm:$0xff]  ;;  %v4723_v10 = vld [vmem:[%s10645_s6] sm:$0xff]  ;;  %v4724_v23 = vld [vmem:[%s10645_s6 + $0x8] sm:$0xff]  ;;  %p7435_p2 = scmp.ne.s32.totalorder %s10584_s21, %s7434_s13  ;;  %s7438_s19 = sshll.u32 %s7539_s12, 4  ;;  %s7439_s19 = int_to_ptr.vmem [resolvable:$false] %s7438_s19 }
 0x593   : > { %v6980_v56 = vpack.c.bf16 %v4724_v23, %v4723_v10  ;;  %v4391_v41 = vld [vmem:[#allocation4 + $0x31] sm:$0xff]  ;;  %v4390_v33 = vld [vmem:[#allocation4 + $0x29] sm:$0xff]  ;;  %v4725_v7 = vld [vmem:[%s10645_s6 + $0x10] sm:$0xff]  ;;  %p7441_p6 = scmp.lt.s32.totalorder %s10584_s21, %s7439_s19 }
 0x594   : > { %4568 = vrot.lane.b32.xlu1 %v4387_v29, %s7536_s17  ;;  %v4363_v22 = vld [vmem:[#allocation4 + $0x40] sm:$0xff]  ;;  %v4362_v12 = vld [vmem:[#allocation4 + $0x38] sm:$0xff]  ;;  %v4365_v52 = vld [vmem:[#allocation4 + $0x50] sm:$0xff]  ;;  %p7436_p4 = pnand %p7435_p2, %p7641_p3 }
 0x595   : > { %4448 = vrot.lane.b32.xlu0 %v4357_v3, %s7533_s15  ;;  %6981 = vmatprep.subr.bf16.mxu1 %v6980_v56  ;;  %v4393_v0 = vld [vmem:[#allocation4 + $0x41] sm:$0xff]  ;;  %v4392_v1 = vld [vmem:[#allocation4 + $0x39] sm:$0xff]  ;;  %v4395_v20 = vld [vmem:[#allocation4 + $0x51] sm:$0xff] }
 0x596   : > { %6983 = vmatpush3.bf16.msra.mxu1 %v6980_v56  ;;  %v4364_v42 = vld [vmem:[#allocation4 + $0x48] sm:$0xff]  ;;  %v6065_v2 = vld [vmem:[%s10645_s6 + $0x20] sm:$0xff]  ;;  %v4367_v34 = vld [vmem:[#allocation4 + $0x60] sm:$0xff]  ;;  %p7437_p5 = pneg %p7436_p4 }
 0x597   : > { %6790 = vmatprep.subr.mxu1 %v4725_v7  ;;  %v4394_v61 = vld [vmem:[#allocation4 + $0x49] sm:$0xff]  ;;  %v4366_v44 = vld [vmem:[#allocation4 + $0x58] sm:$0xff]  ;;  %v4397_v43 = vld [vmem:[#allocation4 + $0x61] sm:$0xff] }
 0x598   : > { %4452 = vrot.lane.b32.xlu1 %v4359_v18, %s7533_s15  ;;  %v6064_v48 = vld [vmem:[%s10645_s6 + $0x18] sm:$0xff]  ;;  %v4396_v5 = vld [vmem:[#allocation4 + $0x59] sm:$0xff]  ;;  %v4369_v28 = vld [vmem:[#allocation4 + $0x70] sm:$0xff] }
 0x599   : > { %4450 = vrot.lane.b32.xlu0 %v4358_v39, %s7533_s15  ;;  %v10215_v13 = vpack.c.bf16 %v6065_v2, %v6064_v48  ;;  %v4368_v50 = vld [vmem:[#allocation4 + $0x68] sm:$0xff]  ;;  %v4399_v57 = vld [vmem:[#allocation4 + $0x71] sm:$0xff]  ;;  %v4371_v55 = vld [vmem:[#allocation4 + $0x80] sm:$0xff] }
 0x59a   : > { %6791 = vmatpush3.msra.mxu1 %v4725_v7  ;;  %v4398_v59 = vld [vmem:[#allocation4 + $0x69] sm:$0xff]  ;;  %v4370_v45 = vld [vmem:[#allocation4 + $0x78] sm:$0xff]  ;;  %v4401_v51 = vld [vmem:[#allocation4 + $0x81] sm:$0xff] }
 0x59b   : > { %6985 = vmatprep.subr.bf16.mxu1 %v10215_v13  ;;  %v4400_v11 = vld [vmem:[#allocation4 + $0x79] sm:$0xff]  ;;  %v4373_v60 = vld [vmem:[#allocation4 + $0x90] sm:$0xff]  ;;  %v4372_v27 = vld [vmem:[#allocation4 + $0x88] sm:$0xff] }
 0x59c   : > { %4572 = vrot.lane.b32.xlu1 %v4389_v14, %s7536_s17  ;;  %v4403_v6 = vld [vmem:[#allocation4 + $0x91] sm:$0xff]  ;;  %v4402_v30 = vld [vmem:[#allocation4 + $0x89] sm:$0xff]  ;;  %v4375_v49 = vld [vmem:[#allocation4 + $0xa0] sm:$0xff] }
 0x59d   : > { %4570 = vrot.lane.b32.xlu0 %v4388_v9, %s7536_s17  ;;  %v4374_v26 = vld [vmem:[#allocation4 + $0x98] sm:$0xff]  ;;  %v4405_v37 = vld [vmem:[#allocation4 + $0xa1] sm:$0xff]  ;;  %v4377_v24 = vld [vmem:[#allocation4 + $0xb0] sm:$0xff] }
 0x59e   : > { %v4404_v17 = vld [vmem:[#allocation4 + $0x99] sm:$0xff]  ;;  %v4376_v35 = vld [vmem:[#allocation4 + $0xa8] sm:$0xff]  ;;  %v4407_v36 = vld [vmem:[#allocation4 + $0xb1] sm:$0xff] }
 0x59f   : > { %v4406_v21 = vld [vmem:[#allocation4 + $0xa9] sm:$0xff]  ;;  %v4379_v58 = vld [vmem:[#allocation4 + $0xc0] sm:$0xff]  ;;  %v4378_v4 = vld [vmem:[#allocation4 + $0xb8] sm:$0xff] }
 0x5a0   : > { %4456 = vrot.lane.b32.xlu1 %v4361_v63, %s7533_s15  ;;  %v4409_v31 = vld [vmem:[#allocation4 + $0xc1] sm:$0xff]  ;;  %v4408_v8 = vld [vmem:[#allocation4 + $0xb9] sm:$0xff]  ;;  %v4410_v53 = vld [vmem:[#allocation4 + $0xc9] sm:$0xff] }
 0x5a1   : > { %4454 = vrot.lane.b32.xlu0 %v4360_v32, %s7533_s15  ;;  %v4380_v54 = vld [vmem:[#allocation4 + $0xc8] sm:$0xff]  ;;  %v4381_v46 = vld [vmem:[#allocation4 + $0xd0] sm:$0xff]  ;;  %v4382_v40 = vld [vmem:[#allocation4 + $0xd8] sm:$0xff] }
 0x5a2   : > { %v4411_v38 = vld [vmem:[#allocation4 + $0xd1] sm:$0xff]  ;;  %v4412_v47 = vld [vmem:[#allocation4 + $0xd9] sm:$0xff]  ;;  %v4413_v16 = vld [vmem:[#allocation4 + $0xe1] sm:$0xff] }
 0x5a3   : > { %v4383_v15 = vld [vmem:[#allocation4 + $0xe0] sm:$0xff]  ;;  %v4384_v62 = vld [vmem:[#allocation4 + $0xe8] sm:$0xff]  ;;  %v4385_v19 = vld [vmem:[#allocation4 + $0xf0] sm:$0xff] }
 0x5a4   : > { %4576 = vrot.lane.b32.xlu1 %v4391_v41, %s7536_s17  ;;  %v4326_v25 = vld [vmem:[#allocation4 + $0x7] sm:$0xff]  ;;  %v4415_v3 = vld [vmem:[#allocation4 + $0xf1] sm:$0xff]  ;;  %vm11098_vm0 = vmmov %vm11097_vm1 }
 0x5a5   : > { %4574 = vrot.lane.b32.xlu0 %v4390_v33, %s7536_s17  ;;  %v4414_v29 = vld [vmem:[#allocation4 + $0xe9] sm:$0xff]  ;;  %v6066_v41 = vld [vmem:[%s10645_s6 + $0x28] sm:$0xff]  ;;  %v6091_v33 = vld [vmem:[%s10645_s6 + $0x30] sm:$0xff] }
 0x5a6   : > { %v4327_v63 = vld [vmem:[#allocation4 + $0xf] sm:$0xff]  ;;  %vm11099_vm12 = vmmov %vm11098_vm0 }
 0x5a7   : > { %v6092_v7 = vld [vmem:[%s10645_s6 + $0x38] sm:$0xff]  ;;  %vm11100_vm13 = vmmov %vm11098_vm0 }
 0x5a8   : > { %4460 = vrot.lane.b32.xlu1 %v4363_v22, %s7533_s15  ;;  %vm11101_vm7 = vmmov %vm11098_vm0 }
 0x5a9   : > { %4458 = vrot.lane.b32.xlu0 %v4362_v12, %s7533_s15  ;;  %vm11102_vm14 = vmmov %vm11098_vm0 }
 0x5aa   : > { %vm11103_vm2 = vmmov %vm11098_vm0 }
 0x5ab   : > { %vm11104_vm11 = vmmov %vm11098_vm0 }
 0x5ac   : > { %4580 = vrot.lane.b32.xlu1 %v4393_v0, %s7536_s17  ;;  %v4329_v0 = vld [vmem:[#allocation4 + $0x1f] sm:$0xff]  ;;  %vm11105_vm15 = vmmov %vm11098_vm0 }
 0x5ad   : > { %4578 = vrot.lane.b32.xlu0 %v4392_v1, %s7536_s17  ;;  %v4328_v1 = vld [vmem:[#allocation4 + $0x17] sm:$0xff]  ;;  %vm11106_vm10 = vmmov %vm11098_vm0 }
 0x5ae   : > { %vm11107_vm3 = vmmov %vm11098_vm0 }
 0x5af   : > { %vm11108_vm9 = vmmov %vm11098_vm0 }
 0x5b0   : > { %4464 = vrot.lane.b32.xlu1 %v4365_v52, %s7533_s15  ;;  %v10274_v52 = vpack.c.bf16 %v6092_v7, %v6091_v33  ;;  %vm11109_vm5 = vmmov %vm11098_vm0  ;;  %v4341_v7 = vld [vmem:[#allocation4 + $0x7f] sm:$0xff] }
 0x5b1   : > { %4462 = vrot.lane.b32.xlu0 %v4364_v42, %s7533_s15  ;;  %vm11110_vm4 = vmmov %vm11098_vm0 }
 0x5b4   : > { %4584 = vrot.lane.b32.xlu1 %v4395_v20, %s7536_s17 }
 0x5b5   : > { %4582 = vrot.lane.b32.xlu0 %v4394_v61, %s7536_s17 }
 0x5b8   : > { %4468 = vrot.lane.b32.xlu1 %v4367_v34, %s7533_s15 }
 0x5b9   : > { %4466 = vrot.lane.b32.xlu0 %v4366_v44, %s7533_s15 }
 0x5bc   : > { %4588 = vrot.lane.b32.xlu1 %v4397_v43, %s7536_s17  ;;  %v4331_v43 = vld [vmem:[#allocation4 + $0x2f] sm:$0xff] }
 0x5bd   : > { %4586 = vrot.lane.b32.xlu0 %v4396_v5, %s7536_s17  ;;  %v4330_v5 = vld [vmem:[#allocation4 + $0x27] sm:$0xff] }
 0x5c0   : > { %4472 = vrot.lane.b32.xlu1 %v4369_v28, %s7533_s15 }
 0x5c1   : > { %4470 = vrot.lane.b32.xlu0 %v4368_v50, %s7533_s15 }
 0x5c4   : > { %4592 = vrot.lane.b32.xlu1 %v4399_v57, %s7536_s17 }
 0x5c5   : > { %4590 = vrot.lane.b32.xlu0 %v4398_v59, %s7536_s17 }
 0x5c8   : > { %4476 = vrot.lane.b32.xlu1 %v4371_v55, %s7533_s15 }
 0x5c9   : > { %4474 = vrot.lane.b32.xlu0 %v4370_v45, %s7533_s15 }
 0x5cc   : > { %4596 = vrot.lane.b32.xlu1 %v4401_v51, %s7536_s17 }
 0x5cd   : > { %4594 = vrot.lane.b32.xlu0 %v4400_v11, %s7536_s17 }
 0x5d0   : > { %4480 = vrot.lane.b32.xlu1 %v4373_v60, %s7533_s15  ;;  %v4333_v60 = vld [vmem:[#allocation4 + $0x3f] sm:$0xff] }
 0x5d1   : > { %4478 = vrot.lane.b32.xlu0 %v4372_v27, %s7533_s15  ;;  %v4332_v27 = vld [vmem:[#allocation4 + $0x37] sm:$0xff] }
 0x5d4   : > { %4600 = vrot.lane.b32.xlu1 %v4403_v6, %s7536_s17 }
 0x5d5   : > { %4598 = vrot.lane.b32.xlu0 %v4402_v30, %s7536_s17 }
 0x5d8   : > { %4484 = vrot.lane.b32.xlu1 %v4375_v49, %s7533_s15 }
 0x5d9   : > { %4482 = vrot.lane.b32.xlu0 %v4374_v26, %s7533_s15 }
 0x5dc   : > { %4604 = vrot.lane.b32.xlu1 %v4405_v37, %s7536_s17 }
 0x5dd   : > { %4602 = vrot.lane.b32.xlu0 %v4404_v17, %s7536_s17 }
 0x5e0   : > { %4488 = vrot.lane.b32.xlu1 %v4377_v24, %s7533_s15 }
 0x5e1   : > { %4486 = vrot.lane.b32.xlu0 %v4376_v35, %s7533_s15 }
 0x5e4   : > { %4608 = vrot.lane.b32.xlu1 %v4407_v36, %s7536_s17  ;;  %v4335_v36 = vld [vmem:[#allocation4 + $0x4f] sm:$0xff] }
 0x5e5   : > { %4606 = vrot.lane.b32.xlu0 %v4406_v21, %s7536_s17  ;;  %v4334_v21 = vld [vmem:[#allocation4 + $0x47] sm:$0xff] }
 0x5e8   : > { %4492 = vrot.lane.b32.xlu1 %v4379_v58, %s7533_s15 }
 0x5e9   : > { %4490 = vrot.lane.b32.xlu0 %v4378_v4, %s7533_s15 }
 0x5ec   : > { %4612 = vrot.lane.b32.xlu1 %v4409_v31, %s7536_s17 }
 0x5ed   : > { %4610 = vrot.lane.b32.xlu0 %v4408_v8, %s7536_s17 }
 0x5f0   : > { %4614 = vrot.lane.b32.xlu1 %v4410_v53, %s7536_s17 }
 0x5f1   : > { %4494 = vrot.lane.b32.xlu0 %v4380_v54, %s7533_s15 }
 0x5f4   : > { %4498 = vrot.lane.b32.xlu1 %v4382_v40, %s7533_s15 }
 0x5f5   : > { %4496 = vrot.lane.b32.xlu0 %v4381_v46, %s7533_s15 }
 0x5f8   : > { %4618 = vrot.lane.b32.xlu1 %v4412_v47, %s7536_s17  ;;  %v4336_v47 = vld [vmem:[#allocation4 + $0x57] sm:$0xff] }
 0x5f9   : > { %4616 = vrot.lane.b32.xlu0 %v4411_v38, %s7536_s17  ;;  %v4337_v38 = vld [vmem:[#allocation4 + $0x5f] sm:$0xff] }
 0x5fc   : > { %4620 = vrot.lane.b32.xlu1 %v4413_v16, %s7536_s17 }
 0x5fd   : > { %4500 = vrot.lane.b32.xlu0 %v4383_v15, %s7533_s15 }
 0x600   : > { %4504 = vrot.lane.b32.xlu1 %v4385_v19, %s7533_s15 }
 0x601   : > { %4502 = vrot.lane.b32.xlu0 %v4384_v62, %s7533_s15 }
 0x602   : > { %v4567_v18 = vpop.permute.xlu1 %4566 }
 0x603   : > { %v4447_v39 = vpop.permute.xlu0 %4446 }
 0x604   : > { %v4656_v14 = vsel %vm11097_vm1, %v4326_v25, %v4447_v39  ;;  %4624 = vrot.lane.b32.xlu1 %v4415_v3, %s7536_s17  ;;  %v4339_v39 = vld [vmem:[#allocation4 + $0x6f] sm:$0xff]  ;;  %vm11111_vm1 = vmmov %vm11098_vm0 }
 0x605   : > { %v4686_v9 = vsel %vm3325_vm6, %v4656_v14, %v4567_v18  ;;  %4622 = vrot.lane.b32.xlu0 %v4414_v29, %s7536_s17  ;;  %v4338_v14 = vld [vmem:[#allocation4 + $0x67] sm:$0xff]  ;;  %s6137_s17 = sshll.u32 %s5712_s20, 7  ;;  %s7440_s20 = scalar_lea.vmem %s7439_s19, 256 }
 0x606   : > { %6792 = vmatprep.mubr.msk.f32.mxu1 %vm3372_vm8, %v4686_v9  ;;  %v4569_v32 = vpop.permute.xlu1 %4568  ;;  %s10582_s24 = scalar_lea.hbm %s10648_s9, %s6137_s17  ;;  %p7442_p7 = scmp.lt.s32.totalorder %s7440_s20, %s7434_s13 }
 0x607   : > { %v4449_v10 = vpop.permute.xlu0 %4448 }
 0x608   : > { %v4657_v23 = vsel %vm11098_vm0, %v4327_v63, %v4449_v10  ;;  %p7443_p9 = por %p7442_p7, %p7441_p6 }
 0x609   : > { %v4687_v56 = vsel %vm3325_vm6, %v4657_v23, %v4569_v32 }
 0x60a   : > { %6793 = vmatmul.mubr.msk.f32.vlgmr.msra.gmra.mrb[30].mxu1 %vm3372_vm8, %v4687_v56  ;;  %v4453_v22 = vpop.permute.xlu1 %4452  ;;  %p7444_p10 = pnand %p7443_p9, %p7437_p5 }
 0x60b   : > { %v4451_v12 = vpop.permute.xlu0 %4450  ;;  %6987 = vmatpush3.bf16.msra.mxu1 %v10215_v13  ;;  %v4659_v42 = vsel %vm11099_vm12, %v4329_v0, %v4453_v22  ;;  %v4340_v22 = vld [vmem:[#allocation4 + $0x77] sm:$0xff]  ;;  %vm11112_vm12 = vmmov %vm11098_vm0 }
 0x60c   : > { %6832 = vmatprep.subr.mxu1 %v6066_v41  ;;  %v4658_v20 = vsel %vm11100_vm13, %v4328_v1, %v4451_v12  ;;  %vm11113_vm13 = vmmov %vm11098_vm0 }
 0x60e   : > { %v4573_v61 = vpop.permute.xlu1 %4572 }
 0x60f   : > { %v4571_v48 = vpop.permute.xlu0 %4570  ;;  %6833 = vmatpush3.msra.mxu1 %v6066_v41  ;;  %v10279_v2 = vsel %vm3325_vm6, %v4659_v42, %v4573_v61 }
 0x610   : > { %v4688_v34 = vsel %vm3325_vm6, %v4658_v20, %v4571_v48  ;;  %6989 = vmatprep.subr.bf16.mxu1 %v10274_v52 }
 0x611   : > { %6795 = vmatprep.mubr.msk.f32.mxu1 %vm3372_vm8, %v4688_v34 }
 0x612   : > { %6796 = vmatmul.mubr.msk.f32.gmra.mrb[32].mxu1 %vm3372_vm8, %v10279_v2  ;;  %v4457_v13 = vpop.permute.xlu1 %4456 }
 0x613   : > { %v4455_v44 = vpop.permute.xlu0 %4454  ;;  %v4661_v28 = vsel %vm11101_vm7, %v4331_v43, %v4457_v13  ;;  %v4343_v13 = vld [vmem:[#allocation4 + $0x8f] sm:$0xff]  ;;  %vm11114_vm7 = vmmov %vm11098_vm0 }
 0x614   : > { %v4660_v50 = vsel %vm11102_vm14, %v4330_v5, %v4455_v44  ;;  %v4342_v44 = vld [vmem:[#allocation4 + $0x87] sm:$0xff]  ;;  %vm11115_vm14 = vmmov %vm11098_vm0 }
 0x616   : > { %v4577_v57 = vpop.permute.xlu1 %4576 }
 0x617   : > { %v4575_v59 = vpop.permute.xlu0 %4574  ;;  %v10289_v55 = vsel %vm3325_vm6, %v4661_v28, %v4577_v57 }
 0x618   : > { %v10292_v45 = vsel %vm3325_vm6, %v4660_v50, %v4575_v59 }
 0x619   : > { %6798 = vmatprep.mubr.msk.f32.mxu1 %vm3372_vm8, %v10292_v45 }
 0x61a   : > { %6799 = vmatmul.mubr.msk.f32.gmra.mrb[34].mxu1 %vm3372_vm8, %v10289_v55  ;;  %v4461_v51 = vpop.permute.xlu1 %4460 }
 0x61b   : > { %v4459_v11 = vpop.permute.xlu0 %4458  ;;  %v4663_v6 = vsel %vm11103_vm2, %v4333_v60, %v4461_v51  ;;  %v4345_v60 = vld [vmem:[#allocation4 + $0x9f] sm:$0xff]  ;;  %vm11116_vm2 = vmmov %vm11098_vm0 }
 0x61c   : > { %v4662_v30 = vsel %vm11104_vm11, %v4332_v27, %v4459_v11  ;;  %v4344_v27 = vld [vmem:[#allocation4 + $0x97] sm:$0xff]  ;;  %vm11117_vm11 = vmmov %vm11098_vm0 }
 0x61e   : > { %v4581_v49 = vpop.permute.xlu1 %4580 }
 0x61f   : > { %v4579_v26 = vpop.permute.xlu0 %4578  ;;  %v10301_v37 = vsel %vm3325_vm6, %v4663_v6, %v4581_v49 }
 0x620   : > { %v10304_v17 = vsel %vm3325_vm6, %v4662_v30, %v4579_v26 }
 0x621   : > { %6801 = vmatprep.mubr.msk.f32.mxu1 %vm3372_vm8, %v10304_v17 }
 0x622   : > { %6802 = vmatmul.mubr.msk.f32.gmra.mrb[36].mxu1 %vm3372_vm8, %v10301_v37  ;;  %v4465_v24 = vpop.permute.xlu1 %4464 }
 0x623   : > { %v4463_v35 = vpop.permute.xlu0 %4462  ;;  %v4665_v58 = vsel %vm11105_vm15, %v4335_v36, %v4465_v24  ;;  %vm11118_vm15 = vmmov %vm11098_vm0 }
 0x624   : > { %v4664_v4 = vsel %vm11106_vm10, %v4334_v21, %v4463_v35  ;;  %vm11119_vm10 = vmmov %vm11098_vm0 }
 0x626   : > { %v4585_v31 = vpop.permute.xlu1 %4584 }
 0x627   : > { %v4583_v8 = vpop.permute.xlu0 %4582  ;;  %v10313_v54 = vsel %vm3325_vm6, %v4665_v58, %v4585_v31  ;;  %v4347_v58 = vld [vmem:[#allocation4 + $0xaf] sm:$0xff] }
 0x628   : > { %v10316_v53 = vsel %vm3325_vm6, %v4664_v4, %v4583_v8  ;;  %v4346_v4 = vld [vmem:[#allocation4 + $0xa7] sm:$0xff] }
 0x629   : > { %6804 = vmatprep.mubr.msk.f32.mxu1 %vm3372_vm8, %v10316_v53 }
 0x62a   : > { %6805 = vmatmul.mubr.msk.f32.gmra.mrb[38].mxu1 %vm3372_vm8, %v10313_v54  ;;  %v4469_v46 = vpop.permute.xlu1 %4468 }
 0x62b   : > { %v4467_v40 = vpop.permute.xlu0 %4466  ;;  %v4667_v15 = vsel %vm11107_vm3, %v4337_v38, %v4469_v46  ;;  %vm11120_vm3 = vcmask 1043456  }
 0x62c   : > { %v4666_v16 = vsel %vm11108_vm9, %v4336_v47, %v4467_v40  ;;  %vm11121_vm9 = vmmov %vm11098_vm0 }
 0x62e   : > { %v4589_v62 = vpop.permute.xlu1 %4588 }
 0x62f   : > { %v4587_v19 = vpop.permute.xlu0 %4586  ;;  %v10325_v25 = vsel %vm3325_vm6, %v4667_v15, %v4589_v62  ;;  %v4349_v62 = vld [vmem:[#allocation4 + $0xbf] sm:$0xff] }
 0x630   : > { %v10328_v29 = vsel %vm3325_vm6, %v4666_v16, %v4587_v19  ;;  %v4348_v19 = vld [vmem:[#allocation4 + $0xb7] sm:$0xff] }
 0x631   : > { %6807 = vmatprep.mubr.msk.f32.mxu1 %vm3372_vm8, %v10328_v29 }
 0x632   : > { %6808 = vmatmul.mubr.msk.f32.gmra.mrb[40].mxu1 %vm3372_vm8, %v10325_v25  ;;  %v4473_v3 = vpop.permute.xlu1 %4472 }
 0x633   : > { %v4471_v18 = vpop.permute.xlu0 %4470  ;;  %v4669_v9 = vsel %vm11109_vm5, %v4339_v39, %v4473_v3  ;;  %vm11122_vm5 = vmmov %vm11098_vm0 }
 0x634   : > { %v4668_v63 = vsel %vm11110_vm4, %v4338_v14, %v4471_v18  ;;  %vm11123_vm4 = vmmov %vm11098_vm0 }
 0x636   : > { %v4593_v32 = vpop.permute.xlu1 %4592 }
 0x637   : > { %v4591_v10 = vpop.permute.xlu0 %4590  ;;  %v10337_v23 = vsel %vm3325_vm6, %v4669_v9, %v4593_v32  ;;  %v6093_v32 = vld [vmem:[%s10645_s6 + $0x40] sm:$0xff] }
 0x638   : > { %v10340_v56 = vsel %vm3325_vm6, %v4668_v63, %v4591_v10  ;;  %v5403_v10 = vld [vmem:[%s10647_s8] sm:$0xf] }
 0x639   : > { %6810 = vmatprep.mubr.msk.f32.mxu1 %vm3372_vm8, %v10340_v56 }
 0x63a   : > { %6811 = vmatmul.mubr.msk.f32.gmra.mrb[42].mxu1 %vm3372_vm8, %v10337_v23  ;;  %v4477_v41 = vpop.permute.xlu1 %4476 }
 0x63b   : > { %v4475_v33 = vpop.permute.xlu0 %4474  ;;  %v4671_v12 = vsel %vm11111_vm1, %v4341_v7, %v4477_v41  ;;  %v4350_v41 = vld [vmem:[#allocation4 + $0xc7] sm:$0xff]  ;;  %vm11124_vm1 = vmmov %vm11120_vm3 }
 0x63c   : > { %v4670_v0 = vsel %vm11098_vm0, %v4340_v22, %v4475_v33 }
 0x63e   : > { %v4597_v1 = vpop.permute.xlu1 %4596 }
 0x63f   : > { %v4595_v42 = vpop.permute.xlu0 %4594  ;;  %v10349_v20 = vsel %vm3325_vm6, %v4671_v12, %v4597_v1 }
 0x640   : > { %v10352_v61 = vsel %vm3325_vm6, %v4670_v0, %v4595_v42  ;;  %v4352_v0 = vld [vmem:[#allocation4 + $0xd7] sm:$0xff] }
 0x641   : > { %6813 = vmatprep.mubr.msk.f32.mxu1 %vm3372_vm8, %v10352_v61 }
 0x642   : > { %6814 = vmatmul.mubr.msk.f32.gmra.mrb[44].mxu1 %vm3372_vm8, %v10349_v20  ;;  %v4481_v48 = vpop.permute.xlu1 %4480 }
 0x643   : > { %v4479_v34 = vpop.permute.xlu0 %4478  ;;  %v4673_v43 = vsel %vm11112_vm12, %v4343_v13, %v4481_v48  ;;  %vm11125_vm12 = vmmov %vm11098_vm0 }
 0x644   : > { %v4672_v5 = vsel %vm11113_vm13, %v4342_v44, %v4479_v34  ;;  %vm11126_vm13 = vmmov %vm11098_vm0 }
 0x646   : > { %v4601_v28 = vpop.permute.xlu1 %4600 }
 0x647   : > { %v4599_v50 = vpop.permute.xlu0 %4598  ;;  %v10361_v57 = vsel %vm3325_vm6, %v4673_v43, %v4601_v28 }
 0x648   : > { %v10364_v59 = vsel %vm3325_vm6, %v4672_v5, %v4599_v50 }
 0x649   : > { %6816 = vmatprep.mubr.msk.f32.mxu1 %vm3372_vm8, %v10364_v59 }
 0x64a   : > { %6817 = vmatmul.mubr.msk.f32.gmra.mrb[46].mxu1 %vm3372_vm8, %v10361_v57  ;;  %v4485_v51 = vpop.permute.xlu1 %4484 }
 0x64b   : > { %v4483_v11 = vpop.permute.xlu0 %4482  ;;  %v4675_v6 = vsel %vm11114_vm7, %v4345_v60, %v4485_v51  ;;  %vm11128_vm7 = vcmask 31744   ;;  %v11131_v51 = vmov 0.0   ;;  %v11134_v60 = vld [vmem:[#allocation14_spill] sm:$0xff] }
 0x64c   : > { %v4674_v30 = vsel %vm11115_vm14, %v4344_v27, %v4483_v11  ;;  %vm11130_vm14 = vmmov %vm11128_vm7  ;;  %v11132_v11 = vld [vmem:[#allocation13_spill] sm:$0xff]  ;;  %v11136_v27 = vld [vmem:[#allocation15_spill] sm:$0xff] }
 0x64e   : > { %v4605_v49 = vpop.permute.xlu1 %4604 }
 0x64f   : > { %v4603_v26 = vpop.permute.xlu0 %4602  ;;  %v10373_v24 = vsel %vm3325_vm6, %v4675_v6, %v4605_v49  ;;  %v11138_v6 = vld [vmem:[#allocation16_spill] sm:$0xff]  ;;  %v11142_v49 = vld [vmem:[#allocation18_spill] sm:$0xff] }
 0x650   : > { %v10376_v35 = vsel %vm3325_vm6, %v4674_v30, %v4603_v26  ;;  %v11140_v30 = vld [vmem:[#allocation17_spill] sm:$0xff]  ;;  %v11144_v26 = vld [vmem:[#allocation19_spill] sm:$0xff] }
 0x651   : > { %6819 = vmatprep.mubr.msk.f32.mxu1 %vm3372_vm8, %v10376_v35 }
 0x652   : > { %6820 = vmatmul.mubr.msk.f32.gmra.mrb[48].mxu1 %vm3372_vm8, %v10373_v24  ;;  %v4489_v36 = vpop.permute.xlu1 %4488 }
 0x653   : > { %v4487_v21 = vpop.permute.xlu0 %4486  ;;  %v4677_v31 = vsel %vm11116_vm2, %v4347_v58, %v4489_v36  ;;  %vm11133_vm2 = vmmov %vm11128_vm7  ;;  %v11150_v36 = vld [vmem:[#allocation22_spill] sm:$0xff]  ;;  %v11154_v58 = vld [vmem:[#allocation24_spill] sm:$0xff] }
 0x654   : > { %v4676_v8 = vsel %vm11117_vm11, %v4346_v4, %v4487_v21  ;;  %vm11135_vm11 = vmmov %vm11133_vm2  ;;  %v11152_v21 = vld [vmem:[#allocation23_spill] sm:$0xff]  ;;  %v11156_v4 = vld [vmem:[#allocation25_spill] sm:$0xff] }
 0x656   : > { %v4609_v46 = vpop.permute.xlu1 %4608 }
 0x657   : > { %v4607_v40 = vpop.permute.xlu0 %4606  ;;  %v10385_v38 = vsel %vm3325_vm6, %v4677_v31, %v4609_v46  ;;  %v11158_v31 = vld [vmem:[#allocation26_spill] sm:$0xff] }
 0x658   : > { %v10388_v47 = vsel %vm3325_vm6, %v4676_v8, %v4607_v40  ;;  %v10557_v8 = vld [vmem:[%s10646_s7] ss:$0 sm:$0xff] }
 0x659   : > { %6822 = vmatprep.mubr.msk.f32.mxu1 %vm3372_vm8, %v10388_v47 }
 0x65a   : > { %6823 = vmatmul.mubr.msk.f32.gmra.mrb[50].mxu1 %vm3372_vm8, %v10385_v38  ;;  %v4493_v15 = vpop.permute.xlu1 %4492 }
 0x65b   : > { %v4491_v16 = vpop.permute.xlu0 %4490  ;;  %v4679_v3 = vsel %vm11118_vm15, %v4349_v62, %v4493_v15  ;;  %vm11141_vm15 = vmmov %vm11133_vm2 }
 0x65c   : > { %v4678_v18 = vsel %vm11119_vm10, %v4348_v19, %v4491_v16  ;;  %vm11143_vm10 = vmmov %vm11133_vm2 }
 0x65e   : > { %v4613_v39 = vpop.permute.xlu1 %4612 }
 0x65f   : > { %v4611_v14 = vpop.permute.xlu0 %4610  ;;  %v10397_v9 = vsel %vm3325_vm6, %v4679_v3, %v4613_v39 }
 0x660   : > { %v10400_v63 = vsel %vm3325_vm6, %v4678_v18, %v4611_v14 }
 0x661   : > { %6825 = vmatprep.mubr.msk.f32.mxu1 %vm3372_vm8, %v10400_v63 }
 0x662   : > { %6826 = vmatmul.mubr.msk.f32.gmra.mrb[52].mxu1 %vm3372_vm8, %v10397_v9 }
 0x663   : > { %6834 = vmatprep.mubr.msk.f32.mxu1 %vm3372_vm8, %v10279_v2  ;;  %v4615_v2 = vpop.permute.xlu1 %4614 }
 0x666   : > { %6835 = vmatmul.mubr.msk.f32.vlgmr.msra.gmra.mrb[30].mxu1 %vm3372_vm8, %v10292_v45  ;;  %v4351_v45 = vld [vmem:[#allocation4 + $0xcf] sm:$0xff] }
 0x667   : > { %6991 = vmatpush3.bf16.msra.mxu1 %v10274_v52  ;;  %6837 = vmatprep.mubr.msk.f32.mxu1 %vm3372_vm8, %v10289_v55  ;;  %v4495_v52 = vpop.permute.xlu0 %4494  ;;  %v4499_v33 = vpop.permute.xlu1 %4498 }
 0x668   : > { %6874 = vmatprep.subr.mxu1 %v6093_v32  ;;  %v4680_v12 = vsel %vm11122_vm5, %v4350_v41, %v4495_v52  ;;  %v4682_v48 = vsel %vm11123_vm4, %v4352_v0, %v4499_v33  ;;  %vm11149_vm5 = vmmov %vm11133_vm2 }
 0x669   : > { %v4710_v42 = vsel %vm3325_vm6, %v4680_v12, %v4615_v2  ;;  %vm11151_vm4 = vmmov %vm11133_vm2 }
 0x66a   : > { %6838 = vmatmul.mubr.msk.f32.gmra.mrb[32].mxu1 %vm3372_vm8, %v10304_v17 }
 0x66b   : > { %6840 = vmatprep.mubr.msk.f32.mxu1 %vm3372_vm8, %v10301_v37  ;;  %6875 = vmatpush3.msra.mxu1 %v6093_v32  ;;  %v4497_v55 = vpop.permute.xlu0 %4496  ;;  %v4619_v34 = vpop.permute.xlu1 %4618 }
 0x66c   : > { %6912 = vmatprep.subr.msk.mxu1 %vm11120_vm3, %v5403_v10  ;;  %v4681_v7 = vsel %vm11121_vm9, %v4351_v45, %v4497_v55  ;;  %v4712_v13 = vsel %vm3325_vm6, %v4682_v48, %v4619_v34  ;;  %vm11145_vm3 = vmmov %vm11133_vm2 }
 0x66d   : > { %vm11147_vm9 = vmmov %vm11133_vm2 }
 0x66e   : > { %6841 = vmatmul.mubr.msk.f32.gmra.mrb[34].mxu1 %vm3372_vm8, %v10316_v53 }
 0x66f   : > { %6843 = vmatprep.mubr.msk.f32.mxu1 %vm3372_vm8, %v10313_v54  ;;  %v4617_v22 = vpop.permute.xlu0 %4616 }
 0x670   : > { %v4711_v1 = vsel %vm3325_vm6, %v4681_v7, %v4617_v22 }
 0x672   : > { %6844 = vmatmul.mubr.msk.f32.gmra.mrb[36].mxu1 %vm3372_vm8, %v10328_v29 }
 0x673   : > { %6846 = vmatprep.mubr.msk.f32.mxu1 %vm3372_vm8, %v10325_v25 }
 0x676   : > { %6847 = vmatmul.mubr.msk.f32.gmra.mrb[38].mxu1 %vm3372_vm8, %v10340_v56 }
 0x677   : > { %6849 = vmatprep.mubr.msk.f32.mxu1 %vm3372_vm8, %v10337_v23 }
 0x67a   : > { %6850 = vmatmul.mubr.msk.f32.gmra.mrb[40].mxu1 %vm3372_vm8, %v10352_v61 }
 0x67b   : > { %6852 = vmatprep.mubr.msk.f32.mxu1 %vm3372_vm8, %v10349_v20 }
 0x67e   : > { %6853 = vmatmul.mubr.msk.f32.gmra.mrb[42].mxu1 %vm3372_vm8, %v10364_v59 }
 0x67f   : > { %6855 = vmatprep.mubr.msk.f32.mxu1 %vm3372_vm8, %v10361_v57 }
 0x682   : > { %6856 = vmatmul.mubr.msk.f32.gmra.mrb[44].mxu1 %vm3372_vm8, %v10376_v35 }
 0x683   : > { %6858 = vmatprep.mubr.msk.f32.mxu1 %vm3372_vm8, %v10373_v24 }
 0x686   : > { %6859 = vmatmul.mubr.msk.f32.gmra.mrb[46].mxu1 %vm3372_vm8, %v10388_v47 }
 0x687   : > { %6861 = vmatprep.mubr.msk.f32.mxu1 %vm3372_vm8, %v10385_v38 }
 0x68a   : > { %6862 = vmatmul.mubr.msk.f32.gmra.mrb[48].mxu1 %vm3372_vm8, %v10400_v63 }
 0x68b   : > { %6864 = vmatprep.mubr.msk.f32.mxu1 %vm3372_vm8, %v10397_v9 }
 0x68e   : > { %6865 = vmatmul.mubr.msk.f32.gmra.mrb[50].mxu1 %vm3372_vm8, %v4710_v42 }
 0x68f   : > { %6867 = vmatprep.mubr.msk.f32.mxu1 %vm3372_vm8, %v4711_v1 }
 0x692   : > { %6868 = vmatmul.mubr.msk.f32.gmra.mrb[52].mxu1 %vm3372_vm8, %v4712_v13 }
 0x693   : > { %6876 = vmatprep.mubr.msk.f32.mxu1 %vm3372_vm8, %v10304_v17  ;;  %v4621_v17 = vpop.permute.xlu1 %4620 }
 0x696   : > { %6877 = vmatmul.mubr.msk.f32.vlgmr.msra.gmra.mrb[30].mxu1 %vm3372_vm8, %v10301_v37  ;;  %v4501_v37 = vpop.permute.xlu0 %4500 }
 0x697   : > { %6913 = vmatpush3.msk.msra.mxu1 %vm11124_vm1, %v5403_v10  ;;  %6879 = vmatprep.mubr.msk.f32.mxu1 %vm3372_vm8, %v10316_v53  ;;  %v4354_v53 = vld [vmem:[#allocation4 + $0xe7] sm:$0xff]  ;;  %vm11153_vm1 = vmmov %vm11133_vm2 }
 0x69a   : > { %6880 = vmatmul.mubr.msk.f32.gmra.mrb[32].mxu1 %vm3372_vm8, %v10313_v54  ;;  %v4503_v54 = vpop.permute.xlu0 %4502 }
 0x69b   : > { %6882 = vmatprep.mubr.msk.f32.mxu1 %vm3372_vm8, %v10328_v29  ;;  %v4505_v29 = vpop.permute.xlu1 %4504 }
 0x69e   : > { %6883 = vmatmul.mubr.msk.f32.gmra.mrb[34].mxu1 %vm3372_vm8, %v10325_v25  ;;  %v4353_v25 = vld [vmem:[#allocation4 + $0xdf] sm:$0xff] }
 0x69f   : > { %6885 = vmatprep.mubr.msk.f32.mxu1 %vm3372_vm8, %v10340_v56  ;;  %v4623_v56 = vpop.permute.xlu0 %4622  ;;  %v4625_v28 = vpop.permute.xlu1 %4624 }
 0x6a2   : > { %6886 = vmatmul.mubr.msk.f32.gmra.mrb[36].mxu1 %vm3372_vm8, %v10337_v23  ;;  %v4684_v23 = vsel %vm11098_vm0, %v4354_v53, %v4503_v54  ;;  %vm11155_vm0 = vmmov %vm11153_vm1 }
 0x6a3   : > { %6888 = vmatprep.mubr.msk.f32.mxu1 %vm3372_vm8, %v10352_v61  ;;  %v4355_v61 = vld [vmem:[#allocation4 + $0xef] sm:$0xff]  ;;  %v4714_v44 = vsel %vm3325_vm6, %v4684_v23, %v4623_v56 }
 0x6a4   : > { %v4685_v5 = vsel %vm11126_vm13, %v4355_v61, %v4505_v29  ;;  %vm11159_vm13 = vmmov %vm11155_vm0 }
 0x6a5   : > { %v4715_v50 = vsel %vm3325_vm6, %v4685_v5, %v4625_v28 }
 0x6a6   : > { %6889 = vmatmul.mubr.msk.f32.gmra.mrb[38].mxu1 %vm3372_vm8, %v10349_v20  ;;  %v4683_v20 = vsel %vm11125_vm12, %v4353_v25, %v4501_v37  ;;  %vm11157_vm12 = vmmov %vm11155_vm0 }
 0x6a7   : > { %6891 = vmatprep.mubr.msk.f32.mxu1 %vm3372_vm8, %v10364_v59  ;;  %v4713_v43 = vsel %vm3325_vm6, %v4683_v20, %v4621_v17  ;;  %v11129_v59 = vld [vmem:[#allocation12_spill] sm:$0xff]  ;;  %vm11137_vm6 = vmmov %vm11133_vm2 }
 0x6aa   : > { %6892 = vmatmul.mubr.msk.f32.gmra.mrb[40].mxu1 %vm3372_vm8, %v10361_v57  ;;  %v11127_v57 = vld [vmem:[#allocation11_spill] sm:$0xff] }
 0x6ab   : > { %6894 = vmatprep.mubr.msk.f32.mxu1 %vm3372_vm8, %v10376_v35  ;;  %v11148_v35 = vld [vmem:[#allocation21_spill] sm:$0xff] }
 0x6ae   : > { %6895 = vmatmul.mubr.msk.f32.gmra.mrb[42].mxu1 %vm3372_vm8, %v10373_v24  ;;  %v11146_v24 = vld [vmem:[#allocation20_spill] sm:$0xff] }
 0x6af   : > { %6897 = vmatprep.mubr.msk.f32.mxu1 %vm3372_vm8, %v10388_v47 }
 0x6b2   : > { %6898 = vmatmul.mubr.msk.f32.gmra.mrb[44].mxu1 %vm3372_vm8, %v10385_v38 }
 0x6b3   : > { %6900 = vmatprep.mubr.msk.f32.mxu1 %vm3372_vm8, %v10400_v63 }
 0x6b6   : > { %6901 = vmatmul.mubr.msk.f32.gmra.mrb[46].mxu1 %vm3372_vm8, %v10397_v9 }
 0x6b7   : > { %6903 = vmatprep.mubr.msk.f32.mxu1 %vm3372_vm8, %v4710_v42 }
 0x6ba   : > { %6904 = vmatmul.mubr.msk.f32.gmra.mrb[48].mxu1 %vm3372_vm8, %v4711_v1 }
 0x6bb   : > { %6906 = vmatprep.mubr.msk.f32.mxu1 %vm3372_vm8, %v4712_v13 }
 0x6be   : > { %6907 = vmatmul.mubr.msk.f32.gmra.mrb[50].mxu1 %vm3372_vm8, %v4713_v43 }
 0x6bf   : > { %6909 = vmatprep.mubr.msk.f32.mxu1 %vm3372_vm8, %v4714_v44 }
 0x6c2   : > { %6910 = vmatmul.mubr.msk.f32.gmra.mrb[52].mxu1 %vm3372_vm8, %v4715_v50  ;;  %vm11139_vm8 = vmmov %vm11133_vm2 }
 0x6c3   : > { %6914 = vmatprep.mubr.msk.f32.mxu1 %vm11128_vm7, %v11127_v57 }
 0x6c6   : > { %6915 = vmatmul.mubr.msk.f32.vlgmr.msra.gmra.mrb[30].mxu1 %vm11130_vm14, %v11129_v59 }
 0x6c7   : > { %6917 = vmatprep.mubr.f32.mxu1 %v11131_v51 }
 0x6ca   : > { %6918 = vmatmul.mubr.msk.f32.gmra.mrb[32].mxu1 %vm11133_vm2, %v11132_v11 }
 0x6cb   : > { %6920 = vmatprep.mubr.msk.f32.mxu1 %vm11135_vm11, %v11134_v60 }
 0x6ce   : > { %6921 = vmatmul.mubr.f32.gmra.mrb[34].mxu1 %v11131_v51 }
 0x6cf   : > { %6923 = vmatprep.mubr.msk.f32.mxu1 %vm11137_vm6, %v11136_v27 }
 0x6d2   : > { %6924 = vmatmul.mubr.msk.f32.gmra.mrb[36].mxu1 %vm11139_vm8, %v11138_v6 }
 0x6d3   : > { %6926 = vmatprep.mubr.f32.mxu1 %v11131_v51 }
 0x6d6   : > { %6927 = vmatmul.mubr.msk.f32.gmra.mrb[38].mxu1 %vm11141_vm15, %v11140_v30 }
 0x6d7   : > { %6929 = vmatprep.mubr.msk.f32.mxu1 %vm11143_vm10, %v11142_v49 }
 0x6da   : > { %6930 = vmatmul.mubr.f32.gmra.mrb[40].mxu1 %v11131_v51 }
 0x6db   : > { %6932 = vmatprep.mubr.msk.f32.mxu1 %vm11145_vm3, %v11144_v26 }
 0x6de   : > { %6933 = vmatmul.mubr.msk.f32.gmra.mrb[42].mxu1 %vm11147_vm9, %v11146_v24 }
 0x6df   : > { %6935 = vmatprep.mubr.f32.mxu1 %v11131_v51 }
 0x6e2   : > { %6936 = vmatmul.mubr.msk.f32.gmra.mrb[44].mxu1 %vm11149_vm5, %v11148_v35 }
 0x6e3   : > { %6938 = vmatprep.mubr.msk.f32.mxu1 %vm11151_vm4, %v11150_v36 }
 0x6e6   : > { %6939 = vmatmul.mubr.f32.gmra.mrb[46].mxu1 %v11131_v51 }
 0x6e7   : > { %6941 = vmatprep.mubr.msk.f32.mxu1 %vm11153_vm1, %v11152_v21 }
 0x6ea   : > { %6942 = vmatmul.mubr.msk.f32.gmra.mrb[48].mxu1 %vm11155_vm0, %v11154_v58 }
 0x6eb   : > { %6944 = vmatprep.mubr.f32.mxu1 %v11131_v51 }
 0x6ee   : > { %6945 = vmatmul.mubr.msk.f32.gmra.mrb[50].mxu1 %vm11157_vm12, %v11156_v4 }
 0x6ef   : > { %6947 = vmatprep.mubr.msk.f32.mxu1 %vm11159_vm13, %v11158_v31 }
 0x6f2   : > { %6948 = vmatmul.mubr.f32.gmra.mrb[52].mxu1 %v11131_v51 }
 0x799   : > { %v6916_v46 = vpop.f32.mrb[30].mxu1 }
 0x79a   : > { %v5524_v40 = vpop.f32.mrb[31].mxu1  ;;  %v7092_v47 = vadd.f32 %v6916_v46, %v10557_v8 }
 0x79b   : > { %v7093_v38 = vadd.f32 %v10557_v8, %v5524_v40 }
 0x79c   : > { %v5652_v19 = vmax.f32 %v7092_v47, 0.0 }
 0x79d   : > { %v5651_v15 = vmax.f32 %v7093_v38, 0.0  ;;  %v6919_v16 = vpop.f32.mrb[32].mxu1 }
 0x79e   : > { %v5534_v62 = vpop.f32.mrb[33].mxu1  ;;  %v7094_v3 = vadd.f32 %v6919_v16, %v10557_v8 }
 0x79f   : > { %5667 = vxpose.xlu0.b32.start [1/16] (narrow) %v5651_v15, 8 }
 0x7a0   : > { %v5653_v14 = vmax.f32 %v7094_v3, 0.0 }
 0x7a1   : > { %v6922_v18 = vpop.f32.mrb[34].mxu1 }
 0x7a2   : > { %v5543_v39 = vpop.f32.mrb[35].mxu1 }
 0x7a3   : > { %5668 = vxpose.xlu0.b32.cont [2/16] (narrow) %v5652_v19, 8  ;;  %v7095_v9 = vadd.f32 %v10557_v8, %v5543_v39 }
 0x7a5   : > { %v6925_v63 = vpop.f32.mrb[36].mxu1  ;;  %v5654_v10 = vmax.f32 %v7095_v9, 0.0 }
 0x7a6   : > { %v5552_v32 = vpop.f32.mrb[37].mxu1  ;;  %v7096_v45 = vadd.f32 %v6925_v63, %v10557_v8 }
 0x7a7   : > { %5669 = vxpose.xlu0.b32.cont [3/16] (narrow) %v5653_v14, 8  ;;  %v7097_v52 = vadd.f32 %v10557_v8, %v5552_v32 }
 0x7a8   : > { %v5656_v22 = vmax.f32 %v7096_v45, 0.0 }
 0x7a9   : > { %v6928_v2 = vpop.f32.mrb[38].mxu1  ;;  %v5655_v41 = vmax.f32 %v7097_v52, 0.0 }
 0x7aa   : > { %v5562_v55 = vpop.f32.mrb[39].mxu1  ;;  %v7098_v12 = vadd.f32 %v6928_v2, %v10557_v8 }
 0x7ab   : > { %5670 = vxpose.xlu0.b32.cont [4/16] (narrow) %v5654_v10, 8 }
 0x7ac   : > { %v5657_v42 = vmax.f32 %v7098_v12, 0.0 }
 0x7ad   : > { %v6931_v33 = vpop.f32.mrb[40].mxu1 }
 0x7ae   : > { %v5571_v7 = vpop.f32.mrb[41].mxu1 }
 0x7af   : > { %5671 = vxpose.xlu0.b32.cont [5/16] (narrow) %v5655_v41, 8  ;;  %v7099_v48 = vadd.f32 %v10557_v8, %v5571_v7 }
 0x7b1   : > { %v6934_v0 = vpop.f32.mrb[42].mxu1  ;;  %v5658_v37 = vmax.f32 %v7099_v48, 0.0 }
 0x7b2   : > { %v5580_v1 = vpop.f32.mrb[43].mxu1  ;;  %v7100_v25 = vadd.f32 %v6934_v0, %v10557_v8 }
 0x7b3   : > { %5672 = vxpose.xlu0.b32.cont [6/16] (narrow) %v5656_v22, 8  ;;  %v7101_v17 = vadd.f32 %v10557_v8, %v5580_v1 }
 0x7b4   : > { %v5660_v20 = vmax.f32 %v7100_v25, 0.0 }
 0x7b5   : > { %v6937_v34 = vpop.f32.mrb[44].mxu1  ;;  %v5659_v29 = vmax.f32 %v7101_v17, 0.0 }
 0x7b6   : > { %v5590_v13 = vpop.f32.mrb[45].mxu1  ;;  %v7102_v61 = vadd.f32 %v6937_v34, %v10557_v8 }
 0x7b7   : > { %5673 = vxpose.xlu0.b32.cont [7/16] (narrow) %v5657_v42, 8 }
 0x7b8   : > { %v5661_v5 = vmax.f32 %v7102_v61, 0.0 }
 0x7b9   : > { %v6940_v54 = vpop.f32.mrb[46].mxu1 }
 0x7ba   : > { %v5599_v53 = vpop.f32.mrb[47].mxu1 }
 0x7bb   : > { %5674 = vxpose.xlu0.b32.cont [8/16] (narrow) %v5658_v37, 8  ;;  %v7103_v28 = vadd.f32 %v10557_v8, %v5599_v53 }
 0x7bd   : > { %v6943_v23 = vpop.f32.mrb[48].mxu1  ;;  %v5662_v59 = vmax.f32 %v7103_v28, 0.0 }
 0x7be   : > { %v5608_v56 = vpop.f32.mrb[49].mxu1  ;;  %v7104_v11 = vadd.f32 %v6943_v23, %v10557_v8 }
 0x7bf   : > { %5675 = vxpose.xlu0.b32.cont [9/16] (narrow) %v5659_v29, 8  ;;  %v7105_v51 = vadd.f32 %v10557_v8, %v5608_v56 }
 0x7c0   : > { %v5664_v27 = vmax.f32 %v7104_v11, 0.0 }
 0x7c1   : > { %v6946_v44 = vpop.f32.mrb[50].mxu1  ;;  %v5663_v60 = vmax.f32 %v7105_v51, 0.0 }
 0x7c2   : > { %v5618_v43 = vpop.f32.mrb[51].mxu1  ;;  %v7106_v6 = vadd.f32 %v6946_v44, %v10557_v8 }
 0x7c3   : > { %5676 = vxpose.xlu0.b32.cont [10/16] (narrow) %v5660_v20, 8 }
 0x7c4   : > { %v5665_v30 = vmax.f32 %v7106_v6, 0.0 }
 0x7c5   : > { %v6949_v50 = vpop.f32.mrb[52].mxu1 }
 0x7c6   : > { %v5627_v57 = vpop.f32.mrb[53].mxu1 }
 0x7c7   : > { %5677 = vxpose.xlu0.b32.cont [11/16] (narrow) %v5661_v5, 8  ;;  %v7107_v49 = vadd.f32 %v10557_v8, %v5627_v57 }
 0x7c9   : > { %v5666_v26 = vmax.f32 %v7107_v49, 0.0 }
 0x7cb   : > { %5678 = vxpose.xlu0.b32.cont [12/16] (narrow) %v5662_v59, 8 }
 0x7cf   : > { %5679 = vxpose.xlu0.b32.cont [13/16] (narrow) %v5663_v60, 8 }
 0x7d3   : > { %5680 = vxpose.xlu0.b32.cont [14/16] (narrow) %v5664_v27, 8 }
 0x7d7   : > { %5681 = vxpose.xlu0.b32.cont [15/16] (narrow) %v5665_v30, 8 }
 0x7db   : > { %5682 = vxpose.xlu0.b32.end [16/16] (narrow) %v5666_v26, 8 }
 0x81f   : > { %v5683_v24 = vpop.trf.xlu0 }
 0x820   : > { %5699 = vst [vmem:[%s370_s28] sm:$0xff] %v5683_v24 }
 0x821   : > { %7447 = shalt.err (!%p7444_p10)
}
 0x822   : > { %s7448_s29 = scalar_lea.hbm %s10582_s24, 128  ;;  %s7452_s17 = scalar_lea.hbm %s10648_s9, 512 }
 0x823   : > { %p7449_p11 = scmp.ne.s32.totalorder %s10582_s24, %s7448_s29  ;;  %p7453_p0 = scmp.lt.u32.totalorder %s10582_s24, %s10648_s9 }
 0x824   : > { %p7454_p1 = scmp.lt.u32.totalorder %s7452_s17, %s7448_s29  ;;  %p7456_p4 = scmp.lt.u32.totalorder %s7448_s29, %s10582_s24 }
 0x825   : > { %p7450_p12 = pnand %p7449_p11, %p7641_p3 }
 0x826   : > { %p7455_p2 = por %p7454_p1, %p7453_p0 }
 0x827   : > { %p7451_p13 = pneg %p7450_p12 }
 0x828   : > { %p7457_p5 = por %p7456_p4, %p7455_p2 }
 0x82a   : > { %p7458_p6 = pnand %p7457_p5, %p7451_p13 }
 0x82c   : > { %7461 = shalt.err (!%p7458_p6)
}
 0x82d   : > { %7354 = dma.vmem_to_hbm [thread:$0]  (%p7641_p3), %s10584_s21, 128, %s10582_s24, %s5701_s25  }
 0x82e PF: > { %p7360_p7 = scmp.ge.s32.totalorder %s7528_s16, 2  ;;  %s5728_s13 = sand.u32 1, %s7500_s30  }
 0x82f   : > { %s5729_s12 = scalar_lea.sflag [#allocation6], %s5728_s13 }
 0x830   : > { %p7357_p9 = pnand %p7360_p7, %p7650_p8 }
 0x832   : > { %7495 = dma.done.wait (!%p7357_p9), %s5729_s12, 128  }
 0x833   : > { %7497 = vsyncadd (!%p7357_p9), %s5729_s12, 4294967168  ;;  %s22_s16 = sadd.s32 1, %s7528_s16   ;;  %s11160_s13 = sld [smem:[#allocation8_spill]] }
 0x834   : > { %p19_p10 = scmp.ge.s32.totalorder %s22_s16, 6   ;;  %s11161_s22 = sld [smem:[#allocation9_spill]] }
 0x835   : > { %s11162_s15 = sld [smem:[#allocation10_spill]]  ;;  %s11163_s30 = smov %s7504_s10 }
 0x836   : > { %s11164_s10 = smov %s7508_s11  ;;  %s11165_s11 = smov %s7659_s27 }
 0x837   : > { %s11166_s12 = smov %s7520_s14  ;;  %21 = sbr.rel (!%p19_p10) target bundleno = 5 (0x5), region = 116 }
 0x83a   : > { %s11167_s14 = smov %s11161_s22 }
 0x83e   :  { %5734 = vsyncpa [#allocation6], 1 }
 0x83f   :  { %5736 = vsyncpa [#allocation6 + $0x1], 1 }

</bundles_post_ra>
